<compile_context>
chip_gen: v6e
topology: v6e:2x2x1
jax: 0.10.0
libtpu: 0.0.40
codegen_flags: <defaults>
</compile_context>

<pallas_src>
import functools

import jax
import jax.numpy as jnp
import numpy as np
from jax.experimental import pallas as pl
from jax.experimental.pallas import tpu as pltpu

ROI_CHUNK = 16                    # ROIs per pooling grid step (MXU M = ROI_CHUNK * R)


def _round_up(x, m):
    return (x + m - 1) // m * m


def _vmem_limit_bytes():
    """Per-generation VMEM limit: ~109 MiB on v5e/v6e (128 MiB), ~54 MiB on v7x (64 MiB)."""
    try:
        cap = int(pltpu.get_tpu_info().vmem_capacity_bytes)
    except Exception:
        return 48 * 1024 * 1024
    return min(int(cap * 0.85), 110 * 1024 * 1024)


VMEM_LIMIT = _vmem_limit_bytes()


def _maybe_buffered_spec(block_shape, index_map, buffer_count):
    """BlockSpec with pipeline_mode=pl.Buffered(n); falls back to default buffering."""
    try:
        return pl.BlockSpec(block_shape, index_map,
                            pipeline_mode=pl.Buffered(buffer_count))
    except Exception:
        return pl.BlockSpec(block_shape, index_map)


# ----------------------------------------------------------------------------
# ROIAlign 1-D interpolation matrices (separable construction, no scatter).
# Matches maskrcnn-benchmark / torchvision ROIAlign (aligned=False) semantics.
# ----------------------------------------------------------------------------
def _axis_interp_matrix(start, length, R, sr, size):
    """start, length: (K,) in feature-map coordinates.  Returns A: (K, R, size) with
    the per-bin, sample-averaged 1-D bilinear interpolation weights along this axis."""
    bin_sz = length / R                                            # (K,)
    p = jnp.arange(R, dtype=jnp.float32)                           # (R,)
    s = jnp.arange(sr, dtype=jnp.float32)                          # (sr,)
    c = (start[:, None, None]
         + p[None, :, None] * bin_sz[:, None, None]
         + (s[None, None, :] + 0.5) * bin_sz[:, None, None] / sr)  # (K, R, sr)

    empty = (c < -1.0) | (c > float(size))
    c = jnp.maximum(c, 0.0)
    low = jnp.floor(c).astype(jnp.int32)
    at_edge = low >= size - 1
    low = jnp.where(at_edge, size - 1, low)
    high = jnp.where(at_edge, size - 1, low + 1)
    c = jnp.where(at_edge, low.astype(c.dtype), c)
    w_hi = c - low.astype(c.dtype)          # weight for `high` corner
    w_lo = 1.0 - w_hi                       # weight for `low` corner
    w_lo = jnp.where(empty, 0.0, w_lo)
    w_hi = jnp.where(empty, 0.0, w_hi)

    grid = jnp.arange(size, dtype=jnp.int32)
    oh_lo = (low[..., None] == grid).astype(jnp.float32)           # (K, R, sr, size)
    oh_hi = (high[..., None] == grid).astype(jnp.float32)
    return (w_lo[..., None] * oh_lo + w_hi[..., None] * oh_hi).sum(axis=2) / sr


def build_roi_align_axis_weights(boxes, spatial_scale, R, sampling_ratio, feat_h, feat_w):
    """boxes: (K, 4) float32 (x1, y1, x2, y2) in image coordinates.
    Returns Ay: (K, R, H), Ax: (K, R, W) so that
      pooled[k, ph, pw, c] = sum_{h,w} Ay[k,ph,h] * Ax[k,pw,w] * feat[h,w,c]."""
    # TODO(synk): sampling_ratio <= 0 (adaptive ceil(roi/R) sampling) is not handled.
    assert sampling_ratio > 0
    x1 = boxes[:, 0] * spatial_scale
    y1 = boxes[:, 1] * spatial_scale
    x2 = boxes[:, 2] * spatial_scale
    y2 = boxes[:, 3] * spatial_scale
    roi_w = jnp.maximum(x2 - x1, 1.0)
    roi_h = jnp.maximum(y2 - y1, 1.0)
    Ay = _axis_interp_matrix(y1, roi_h, R, sampling_ratio, feat_h)
    Ax = _axis_interp_matrix(x1, roi_w, R, sampling_ratio, feat_w)
    return Ay, Ax


# ----------------------------------------------------------------------------
# Pallas kernels
# ----------------------------------------------------------------------------
def _roi_pool_kernel(counts_ref, ay_ref, ax_ref, feat_ref, out_ref, *,
                     ch, r, w, cp, w_tile):
    # counts_ref: (N,) int32 in SMEM (scalar prefetch)
    # ay_ref:   (1, ch*r, H)         bf16, rows ordered (ph, k)
    # ax_ref:   (1, 1, ch*r, w*ch)   bf16, block-diagonal: [(k,pw), (w,k')] = d(k,k')*Ax[k,pw,w]
    # feat_ref: (1, H, w*cp)         bf16, resident per image (single-buffered)
    # out_ref:  (1, ch*r, r*cp)      bf16, rows (k, pw), cols (ph, c)
    n = pl.program_id(0)
    c = pl.program_id(1)
    valid = c * ch < counts_ref[n]

    @pl.when(valid)
    def _compute():
        ay = ay_ref[0]                      # (ch*r, H)
        axbd = ax_ref[0, 0]                 # (ch*r, w*ch)
        acc = jnp.zeros((ch * r, r * cp), jnp.float32)
        for w0 in range(0, w, w_tile):
            w1 = min(w0 + w_tile, w)
            nw = w1 - w0
            # Stage 1 (MXU): H contraction against a W-slice of the feature tile.
            t = jnp.dot(ay, feat_ref[0, :, w0 * cp:w1 * cp],
                        preferred_element_type=jnp.float32)        # (ch*r, nw*cp)
            # Rearrange rows (ph, k) / cols (w, c) -> rows (w, k) / cols (ph, c)
            # using sublane/lane-aligned static slices + concats only.
            row_blocks = []
            for wi in range(nw):
                cols = [t[ph * ch:(ph + 1) * ch, wi * cp:(wi + 1) * cp]
                        for ph in range(r)]
                row_blocks.append(jnp.concatenate(cols, axis=1))   # (ch, r*cp)
            t2 = jnp.concatenate(row_blocks, axis=0).astype(jnp.bfloat16)  # (nw*ch, r*cp)
            # Stage 2 (MXU): W contraction, block-diagonal over the ROI chunk.
            acc += jnp.dot(axbd[:, w0 * ch:w1 * ch], t2,
                           preferred_element_type=jnp.float32)
        out_ref[0] = acc.astype(out_ref.dtype)

    @pl.when(jnp.logical_not(valid))
    def _skip():
        # Chunk is entirely ROI padding: skip the MXU work, just zero the block.
        out_ref[...] = jnp.zeros(out_ref.shape, out_ref.dtype)


def _linear_relu_kernel(x_ref, w_ref, b_ref, o_ref, acc_ref):
    # Tiled y = relu(x @ w + b); bf16 operands, f32 accumulation; K is the last grid axis.
    k = pl.program_id(2)

    @pl.when(k == 0)
    def _init():
        acc_ref[...] = jnp.zeros_like(acc_ref)

    acc_ref[...] += jnp.dot(x_ref[...], w_ref[...],
                            preferred_element_type=jnp.float32)

    @pl.when(k == pl.num_programs(2) - 1)
    def _finalize():
        o_ref[...] = jnp.maximum(acc_ref[...] + b_ref[...], 0.0).astype(o_ref.dtype)


def _linear_relu(x, w, b, out_dtype, *, tm=2048, tn=512, tk=2048):
    """relu(x @ w + b) as a tiled Pallas matmul.  tm covers M (weights stream once)."""
    M, Kd = x.shape
    Kd2, Nd = w.shape
    assert Kd == Kd2 and b.shape == (1, Nd)

    tm = min(tm, _round_up(M, 8))
    tn = min(tn, _round_up(Nd, 128))
    tk = min(tk, _round_up(Kd, 128))
    Mp, Np, Kp = _round_up(M, tm), _round_up(Nd, tn), _round_up(Kd, tk)

    xp = jnp.pad(x, ((0, Mp - M), (0, Kp - Kd)))
    wp = jnp.pad(w, ((0, Kp - Kd), (0, Np - Nd)))
    bp = jnp.pad(b, ((0, 0), (0, Np - Nd)))

    out = pl.pallas_call(
        _linear_relu_kernel,
        out_shape=jax.ShapeDtypeStruct((Mp, Np), out_dtype),
        grid=(Mp // tm, Np // tn, Kp // tk),
        in_specs=[
            pl.BlockSpec((tm, tk), lambda i, j, k: (i, k)),
            pl.BlockSpec((tk, tn), lambda i, j, k: (k, j)),
            pl.BlockSpec((1, tn), lambda i, j, k: (0, j)),
        ],
        out_specs=pl.BlockSpec((tm, tn), lambda i, j, k: (i, j)),
        scratch_shapes=[pltpu.VMEM((tm, tn), jnp.float32)],
        compiler_params=pltpu.CompilerParams(
            dimension_semantics=("parallel", "parallel", "arbitrary"),
            vmem_limit_bytes=VMEM_LIMIT),
    )(xp, wp, bp)
    return out[:M, :Nd]


# ----------------------------------------------------------------------------
# Module forward
# ----------------------------------------------------------------------------
@functools.partial(jax.jit, static_argnames=("counts", "resolution",
                                             "sampling_ratio", "spatial_scale"))
def _forward(feats, boxes_padded, counts_arr, params, *, counts, resolution,
             sampling_ratio, spatial_scale):
    N, C, H, W = feats.shape
    R = resolution
    Cp = _round_up(C, 128)
    mpad = boxes_padded.shape[1]                # multiple of ROI_CHUNK
    n_chunks = mpad // ROI_CHUNK
    w1, b1, w2, b2 = params

    # ---- separable 1-D ROIAlign interpolation weights (tiny, built in XLA) ----
    flat_boxes = boxes_padded.reshape(N * mpad, 4)
    Ay, Ax = build_roi_align_axis_weights(flat_boxes, spatial_scale, R,
                                          sampling_ratio, H, W)
    Ay = Ay.reshape(N, n_chunks, ROI_CHUNK, R, H)
    Ax = Ax.reshape(N, n_chunks, ROI_CHUNK, R, W)

    # Stacked Ay, rows ordered (chunk, ph, k):  (N, n_chunks*R*ROI_CHUNK, H)
    ayT = Ay.transpose(0, 1, 3, 2, 4).reshape(
        N, n_chunks * R * ROI_CHUNK, H).astype(jnp.bfloat16)

    # Block-diagonal Ax per chunk: [(k, pw), (w, k')] = delta(k, k') * Ax[k, pw, w].
    eye = jnp.eye(ROI_CHUNK, dtype=Ax.dtype)
    axbd = jnp.einsum('nckpw,kj->nckpwj', Ax, eye)
    axbd = axbd.reshape(N, n_chunks, ROI_CHUNK * R,
                        W * ROI_CHUNK).astype(jnp.bfloat16)

    # Feature map as (N, H, W*Cp) bf16 -- one resident tile per image.
    feat_hwc = feats.transpose(0, 2, 3, 1)
    feat_hwc = jnp.pad(feat_hwc, ((0, 0), (0, 0), (0, 0), (0, Cp - C)))
    feat_hwc = feat_hwc.reshape(N, H, W * Cp).astype(jnp.bfloat16)

    # Inner W tiling bounds the live intermediate (fits v7x VMEM at production C).
    w_tile = max(1, min(W, 8192 // Cp))

    kernel = functools.partial(_roi_pool_kernel, ch=ROI_CHUNK, r=R, w=W, cp=Cp,
                               w_tile=w_tile)
    pooled = pl.pallas_call(
        kernel,
        out_shape=jax.ShapeDtypeStruct((N, mpad * R, R * Cp), jnp.bfloat16),
        grid_spec=pltpu.PrefetchScalarGridSpec(
            num_scalar_prefetch=1,
            grid=(N, n_chunks),
            in_specs=[
                pl.BlockSpec((1, ROI_CHUNK * R, H),
                             lambda n, c, cnt: (n, c, 0)),
                pl.BlockSpec((1, 1, ROI_CHUNK * R, W * ROI_CHUNK),
                             lambda n, c, cnt: (n, c, 0, 0)),
                _maybe_buffered_spec((1, H, W * Cp),
                                     lambda n, c, cnt: (n, 0, 0), 1),
            ],
            out_specs=pl.BlockSpec((1, ROI_CHUNK * R, R * Cp),
                                   lambda n, c, cnt: (n, c, 0)),
        ),
        compiler_params=pltpu.CompilerParams(
            dimension_semantics=("parallel", "arbitrary"),
            vmem_limit_bytes=VMEM_LIMIT),
    )(counts_arr, ayT, axbd, feat_hwc)
    # pooled[n, m*R + pw, ph*Cp + c] == ROIAlign(feat_n, roi_m)[ph, pw, c]

    # ---- classifier over the padded ROI set (padding sliced away at the end) ----
    # TODO(synk): nn.Dropout is stochastic in train mode; implemented as identity (eval).
    X = pooled.reshape(N * mpad, R * R * Cp)    # flatten order (pw, ph, c) matches w1
    h1 = _linear_relu(X, w1, b1, jnp.bfloat16)
    h2 = _linear_relu(h1, w2, b2, jnp.float32)

    x_out = jnp.concatenate(
        [h2[n * mpad:n * mpad + counts[n]] for n in range(N)], axis=0)

    pooled5 = pooled.reshape(N, mpad, R, R, Cp)            # (n, m, pw, ph, c)
    pooled_valid = jnp.concatenate(
        [pooled5[n, :counts[n]] for n in range(N)], axis=0)
    # TODO(synk): the NCHW relayout below is off the compute path but costs HBM
    # bandwidth at production size; consumers accepting (K, R, R, C) should use
    # pooled_valid directly.
    pooled_nchw = pooled_valid[..., :C].transpose(0, 3, 2, 1).astype(jnp.float32)
    return x_out, pooled_nchw


def roi_box_feature_extractor(feats, proposals, params, *, resolution,
                              sampling_ratio, spatial_scale):
    """feats: (N, C, H, W); proposals: list of (n_i, 4) boxes (x1,y1,x2,y2) per image.
    Returns (x, pooled_feats): x (K, hidden) f32, pooled_feats (K, C, R, R) f32,
    with K = sum(n_i), ROIs in per-image concatenation order (same as torch Pooler)."""
    N = feats.shape[0]
    assert len(proposals) == N
    counts = tuple(int(p.shape[0]) for p in proposals)
    mpad = _round_up(max(counts), ROI_CHUNK)
    boxes_padded = jnp.stack([
        jnp.pad(jnp.asarray(p, jnp.float32), ((0, mpad - c), (0, 0)))
        for p, c in zip(proposals, counts)])
    counts_arr = jnp.asarray(counts, jnp.int32)
    return _forward(feats, boxes_padded, counts_arr, params, counts=counts,
                    resolution=resolution, sampling_ratio=sampling_ratio,
                    spatial_scale=spatial_scale)


def init_params(key, channels, resolution, hidden, *, c_pad):
    """Mimics _initialize_weights: Linear weights ~ N(0, 0.01), biases = 0.

    w1 rows are stored pre-permuted from torch's (c, ph, pw) flatten order to the
    pooling kernel's (pw, ph, c_padded) order (zero rows at padded channels), so the
    forward pass needs no relayout between pooling and classifier.  Weights bf16
    (f32 accumulation in the kernels); biases f32."""
    k1, k2 = jax.random.split(key)
    r = resolution
    w1 = 0.01 * jax.random.normal(k1, (r, r, channels, hidden), jnp.float32)
    w1 = jnp.pad(w1, ((0, 0), (0, 0), (0, c_pad - channels), (0, 0)))
    w1 = w1.reshape(r * r * c_pad, hidden).astype(jnp.bfloat16)
    b1 = jnp.zeros((1, hidden), jnp.float32)
    w2 = (0.01 * jax.random.normal(k2, (hidden, hidden), jnp.float32)).astype(jnp.bfloat16)
    b2 = jnp.zeros((1, hidden), jnp.float32)
    return (w1, b1, w2, b2)


if __name__ == "__main__":
    key = jax.random.PRNGKey(0)
    # Small, shape-consistent configuration (real module: C=2048, resolution=7, hidden=4096).
    N, C, H, W = 2, 32, 16, 16
    RESOLUTION = 7
    SAMPLING_RATIO = 2
    SPATIAL_SCALE = 0.25          # single pooler scale level
    HIDDEN = 128
    ROI_COUNTS = (3, 19)          # exercises both partially-valid and all-padding chunks

    k_feat, k_b0, k_b1, k_par = jax.random.split(key, 4)
    feats = jax.random.normal(k_feat, (N, C, H, W), jnp.float32)

    img_size = H / SPATIAL_SCALE  # boxes live in image coordinates

    def make_boxes(k, n):
        pts = jax.random.uniform(k, (n, 4), minval=0.0, maxval=img_size)
        x1 = jnp.minimum(pts[:, 0], pts[:, 2])
        x2 = jnp.maximum(pts[:, 0], pts[:, 2])
        y1 = jnp.minimum(pts[:, 1], pts[:, 3])
        y2 = jnp.maximum(pts[:, 1], pts[:, 3])
        return jnp.stack([x1, y1, x2, y2], axis=-1)

    proposals = [make_boxes(k_b0, ROI_COUNTS[0]), make_boxes(k_b1, ROI_COUNTS[1])]

    Cp = _round_up(C, 128)
    params = init_params(k_par, C, RESOLUTION, HIDDEN, c_pad=Cp)

    x_out, pooled_feats = roi_box_feature_extractor(
        feats, proposals, params,
        resolution=RESOLUTION, sampling_ratio=SAMPLING_RATIO,
        spatial_scale=SPATIAL_SCALE)
    jax.block_until_ready((x_out, pooled_feats))

    K = sum(ROI_COUNTS)
    assert x_out.shape == (K, HIDDEN)
    assert x_out.dtype == jnp.float32
    assert pooled_feats.shape == (K, C, RESOLUTION, RESOLUTION)

    # ---- pure-JAX float32 reference (same separable ROIAlign weight construction) ----
    mpad = _round_up(max(ROI_COUNTS), ROI_CHUNK)
    boxes_padded = jnp.stack([
        jnp.pad(p, ((0, mpad - p.shape[0]), (0, 0))) for p in proposals])
    Ay, Ax = build_roi_align_axis_weights(
        boxes_padded.reshape(N * mpad, 4), SPATIAL_SCALE, RESOLUTION,
        SAMPLING_RATIO, H, W)
    Ay = Ay.reshape(N, mpad, RESOLUTION, H)
    Ax = Ax.reshape(N, mpad, RESOLUTION, W)
    feat_hwc = feats.transpose(0, 2, 3, 1)
    pooled_ref = jnp.einsum('nkph,nkqw,nhwc->nkpqc', Ay, Ax, feat_hwc)   # (n,m,ph,pw,c)
    pooled_ref = jnp.concatenate(
        [pooled_ref[n, :ROI_COUNTS[n]] for n in range(N)], axis=0)       # (K,ph,pw,c)
    w1, b1, w2, b2 = params
    flat_ref = jnp.pad(pooled_ref, ((0, 0), (0, 0), (0, 0), (0, Cp - C)))
    flat_ref = flat_ref.transpose(0, 2, 1, 3).reshape(K, RESOLUTION * RESOLUTION * Cp)
    h1_ref = jnp.maximum(flat_ref @ w1.astype(jnp.float32) + b1, 0.0)
    x_ref = jnp.maximum(h1_ref @ w2.astype(jnp.float32) + b2, 0.0)
    pooled_ref_nchw = pooled_ref.transpose(0, 3, 1, 2)

    np.testing.assert_allclose(np.asarray(pooled_feats), np.asarray(pooled_ref_nchw),
                               rtol=0.05, atol=0.03)
    np.testing.assert_allclose(np.asarray(x_out), np.asarray(x_ref),
                               rtol=0.05, atol=5e-3)
    print("KERNEL_OK")
</pallas_src>

<mosaic_0001>
module attributes {stable_mosaic.version = 11 : i64} {
  func.func @_roi_pool_kernel(%arg0: i32, %arg1: i32, %arg2: memref<2xi32, #tpu.memory_space<smem>>, %arg3: memref<1x112x16xbf16, #tpu.memory_space<vmem>>, %arg4: memref<1x1x112x256xbf16, #tpu.memory_space<vmem>>, %arg5: memref<1x16x2048xbf16, #tpu.memory_space<vmem>>, %arg6: memref<1x112x896xbf16, #tpu.memory_space<vmem>>) attributes {dimension_semantics = [#tpu.dimension_semantics<parallel>, #tpu.dimension_semantics<arbitrary>], iteration_bounds = array<i64: 2, 2>, scalar_prefetch = 1 : i64, scratch_operands = 0 : i64, tpu.core_type = #tpu.core_type<tc>, window_params = [{transform_indices = @transform_0, window_bounds = array<i64: 1, 112, 16>}, {transform_indices = @transform_1, window_bounds = array<i64: 1, 1, 112, 256>}, {pipeline_mode = #tpu.pipeline_mode<synchronous>, transform_indices = @transform_2, window_bounds = array<i64: 1, 16, 2048>}, {transform_indices = @transform_3, window_bounds = array<i64: 1, 112, 896>}]} {
    %c16_i32 = arith.constant 16 : i32
    %0 = arith.muli %arg1, %c16_i32 : i32
    %1 = arith.index_cast %arg0 : i32 to index
    %2 = memref.load %arg2[%1] : memref<2xi32, #tpu.memory_space<smem>>
    %3 = arith.cmpi slt, %0, %2 : i32
    %4 = arith.extui %3 : i1 to i32
    %c0_i32 = arith.constant 0 : i32
    %5 = arith.cmpi ne, %4, %c0_i32 : i32
    scf.if %5 {
      %c0 = arith.constant 0 : index
      %c0_1 = arith.constant 0 : index
      %c0_2 = arith.constant 0 : index
      %9 = vector.load %arg3[%c0, %c0_1, %c0_2] : memref<1x112x16xbf16, #tpu.memory_space<vmem>>, vector<1x112x16xbf16>
      %10 = vector.shape_cast %9 : vector<1x112x16xbf16> to vector<112x16xbf16>
      %c0_3 = arith.constant 0 : index
      %c0_4 = arith.constant 0 : index
      %c0_5 = arith.constant 0 : index
      %c0_6 = arith.constant 0 : index
      %11 = vector.load %arg4[%c0_3, %c0_4, %c0_5, %c0_6] : memref<1x1x112x256xbf16, #tpu.memory_space<vmem>>, vector<1x1x112x256xbf16>
      %12 = vector.shape_cast %11 : vector<1x1x112x256xbf16> to vector<112x256xbf16>
      %cst = arith.constant 0.000000e+00 : f32
      %13 = vector.broadcast %cst : f32 to vector<112x896xf32>
      %c0_7 = arith.constant 0 : index
      %c0_8 = arith.constant 0 : index
      %c0_9 = arith.constant 0 : index
      %14 = vector.load %arg5[%c0_7, %c0_8, %c0_9] : memref<1x16x2048xbf16, #tpu.memory_space<vmem>>, vector<1x16x2048xbf16>
      %15 = vector.shape_cast %14 : vector<1x16x2048xbf16> to vector<16x2048xbf16>
      %cst_10 = arith.constant dense<0.000000e+00> : vector<112x2048xf32>
      %16 = tpu.matmul %10, %15, %cst_10 {dimension_numbers = #tpu.dot_dimension_numbers<[1], [0], [0], [1], [0, 0, 1, 1], [], []>} : vector<112x16xbf16>, vector<16x2048xbf16>, vector<112x2048xf32> -> vector<112x2048xf32>
      %17 = vector.extract_strided_slice %16 {offsets = [0, 0], sizes = [16, 128], strides = [1, 1]} : vector<112x2048xf32> to vector<16x128xf32>
      %18 = vector.extract_strided_slice %16 {offsets = [16, 0], sizes = [16, 128], strides = [1, 1]} : vector<112x2048xf32> to vector<16x128xf32>
      %19 = vector.extract_strided_slice %16 {offsets = [32, 0], sizes = [16, 128], strides = [1, 1]} : vector<112x2048xf32> to vector<16x128xf32>
      %20 = vector.extract_strided_slice %16 {offsets = [48, 0], sizes = [16, 128], strides = [1, 1]} : vector<112x2048xf32> to vector<16x128xf32>
      %21 = vector.extract_strided_slice %16 {offsets = [64, 0], sizes = [16, 128], strides = [1, 1]} : vector<112x2048xf32> to vector<16x128xf32>
      %22 = vector.extract_strided_slice %16 {offsets = [80, 0], sizes = [16, 128], strides = [1, 1]} : vector<112x2048xf32> to vector<16x128xf32>
      %23 = vector.extract_strided_slice %16 {offsets = [96, 0], sizes = [16, 128], strides = [1, 1]} : vector<112x2048xf32> to vector<16x128xf32>
      %24 = tpu.concatenate %17, %18, %19, %20, %21, %22, %23 in 1 : vector<16x128xf32>, vector<16x128xf32>, vector<16x128xf32>, vector<16x128xf32>, vector<16x128xf32>, vector<16x128xf32>, vector<16x128xf32> -> vector<16x896xf32>
      %25 = vector.extract_strided_slice %16 {offsets = [0, 128], sizes = [16, 128], strides = [1, 1]} : vector<112x2048xf32> to vector<16x128xf32>
      %26 = vector.extract_strided_slice %16 {offsets = [16, 128], sizes = [16, 128], strides = [1, 1]} : vector<112x2048xf32> to vector<16x128xf32>
      %27 = vector.extract_strided_slice %16 {offsets = [32, 128], sizes = [16, 128], strides = [1, 1]} : vector<112x2048xf32> to vector<16x128xf32>
      %28 = vector.extract_strided_slice %16 {offsets = [48, 128], sizes = [16, 128], strides = [1, 1]} : vector<112x2048xf32> to vector<16x128xf32>
      %29 = vector.extract_strided_slice %16 {offsets = [64, 128], sizes = [16, 128], strides = [1, 1]} : vector<112x2048xf32> to vector<16x128xf32>
      %30 = vector.extract_strided_slice %16 {offsets = [80, 128], sizes = [16, 128], strides = [1, 1]} : vector<112x2048xf32> to vector<16x128xf32>
      %31 = vector.extract_strided_slice %16 {offsets = [96, 128], sizes = [16, 128], strides = [1, 1]} : vector<112x2048xf32> to vector<16x128xf32>
      %32 = tpu.concatenate %25, %26, %27, %28, %29, %30, %31 in 1 : vector<16x128xf32>, vector<16x128xf32>, vector<16x128xf32>, vector<16x128xf32>, vector<16x128xf32>, vector<16x128xf32>, vector<16x128xf32> -> vector<16x896xf32>
      %33 = vector.extract_strided_slice %16 {offsets = [0, 256], sizes = [16, 128], strides = [1, 1]} : vector<112x2048xf32> to vector<16x128xf32>
      %34 = vector.extract_strided_slice %16 {offsets = [16, 256], sizes = [16, 128], strides = [1, 1]} : vector<112x2048xf32> to vector<16x128xf32>
      %35 = vector.extract_strided_slice %16 {offsets = [32, 256], sizes = [16, 128], strides = [1, 1]} : vector<112x2048xf32> to vector<16x128xf32>
      %36 = vector.extract_strided_slice %16 {offsets = [48, 256], sizes = [16, 128], strides = [1, 1]} : vector<112x2048xf32> to vector<16x128xf32>
      %37 = vector.extract_strided_slice %16 {offsets = [64, 256], sizes = [16, 128], strides = [1, 1]} : vector<112x2048xf32> to vector<16x128xf32>
      %38 = vector.extract_strided_slice %16 {offsets = [80, 256], sizes = [16, 128], strides = [1, 1]} : vector<112x2048xf32> to vector<16x128xf32>
      %39 = vector.extract_strided_slice %16 {offsets = [96, 256], sizes = [16, 128], strides = [1, 1]} : vector<112x2048xf32> to vector<16x128xf32>
      %40 = tpu.concatenate %33, %34, %35, %36, %37, %38, %39 in 1 : vector<16x128xf32>, vector<16x128xf32>, vector<16x128xf32>, vector<16x128xf32>, vector<16x128xf32>, vector<16x128xf32>, vector<16x128xf32> -> vector<16x896xf32>
      %41 = vector.extract_strided_slice %16 {offsets = [0, 384], sizes = [16, 128], strides = [1, 1]} : vector<112x2048xf32> to vector<16x128xf32>
      %42 = vector.extract_strided_slice %16 {offsets = [16, 384], sizes = [16, 128], strides = [1, 1]} : vector<112x2048xf32> to vector<16x128xf32>
      %43 = vector.extract_strided_slice %16 {offsets = [32, 384], sizes = [16, 128], strides = [1, 1]} : vector<112x2048xf32> to vector<16x128xf32>
      %44 = vector.extract_strided_slice %16 {offsets = [48, 384], sizes = [16, 128], strides = [1, 1]} : vector<112x2048xf32> to vector<16x128xf32>
      %45 = vector.extract_strided_slice %16 {offsets = [64, 384], sizes = [16, 128], strides = [1, 1]} : vector<112x2048xf32> to vector<16x128xf32>
      %46 = vector.extract_strided_slice %16 {offsets = [80, 384], sizes = [16, 128], strides = [1, 1]} : vector<112x2048xf32> to vector<16x128xf32>
      %47 = vector.extract_strided_slice %16 {offsets = [96, 384], sizes = [16, 128], strides = [1, 1]} : vector<112x2048xf32> to vector<16x128xf32>
      %48 = tpu.concatenate %41, %42, %43, %44, %45, %46, %47 in 1 : vector<16x128xf32>, vector<16x128xf32>, vector<16x128xf32>, vector<16x128xf32>, vector<16x128xf32>, vector<16x128xf32>, vector<16x128xf32> -> vector<16x896xf32>
      %49 = vector.extract_strided_slice %16 {offsets = [0, 512], sizes = [16, 128], strides = [1, 1]} : vector<112x2048xf32> to vector<16x128xf32>
      %50 = vector.extract_strided_slice %16 {offsets = [16, 512], sizes = [16, 128], strides = [1, 1]} : vector<112x2048xf32> to vector<16x128xf32>
      %51 = vector.extract_strided_slice %16 {offsets = [32, 512], sizes = [16, 128], strides = [1, 1]} : vector<112x2048xf32> to vector<16x128xf32>
      %52 = vector.extract_strided_slice %16 {offsets = [48, 512], sizes = [16, 128], strides = [1, 1]} : vector<112x2048xf32> to vector<16x128xf32>
      %53 = vector.extract_strided_slice %16 {offsets = [64, 512], sizes = [16, 128], strides = [1, 1]} : vector<112x2048xf32> to vector<16x128xf32>
      %54 = vector.extract_strided_slice %16 {offsets = [80, 512], sizes = [16, 128], strides = [1, 1]} : vector<112x2048xf32> to vector<16x128xf32>
      %55 = vector.extract_strided_slice %16 {offsets = [96, 512], sizes = [16, 128], strides = [1, 1]} : vector<112x2048xf32> to vector<16x128xf32>
      %56 = tpu.concatenate %49, %50, %51, %52, %53, %54, %55 in 1 : vector<16x128xf32>, vector<16x128xf32>, vector<16x128xf32>, vector<16x128xf32>, vector<16x128xf32>, vector<16x128xf32>, vector<16x128xf32> -> vector<16x896xf32>
      %57 = vector.extract_strided_slice %16 {offsets = [0, 640], sizes = [16, 128], strides = [1, 1]} : vector<112x2048xf32> to vector<16x128xf32>
      %58 = vector.extract_strided_slice %16 {offsets = [16, 640], sizes = [16, 128], strides = [1, 1]} : vector<112x2048xf32> to vector<16x128xf32>
      %59 = vector.extract_strided_slice %16 {offsets = [32, 640], sizes = [16, 128], strides = [1, 1]} : vector<112x2048xf32> to vector<16x128xf32>
      %60 = vector.extract_strided_slice %16 {offsets = [48, 640], sizes = [16, 128], strides = [1, 1]} : vector<112x2048xf32> to vector<16x128xf32>
      %61 = vector.extract_strided_slice %16 {offsets = [64, 640], sizes = [16, 128], strides = [1, 1]} : vector<112x2048xf32> to vector<16x128xf32>
      %62 = vector.extract_strided_slice %16 {offsets = [80, 640], sizes = [16, 128], strides = [1, 1]} : vector<112x2048xf32> to vector<16x128xf32>
      %63 = vector.extract_strided_slice %16 {offsets = [96, 640], sizes = [16, 128], strides = [1, 1]} : vector<112x2048xf32> to vector<16x128xf32>
      %64 = tpu.concatenate %57, %58, %59, %60, %61, %62, %63 in 1 : vector<16x128xf32>, vector<16x128xf32>, vector<16x128xf32>, vector<16x128xf32>, vector<16x128xf32>, vector<16x128xf32>, vector<16x128xf32> -> vector<16x896xf32>
      %65 = vector.extract_strided_slice %16 {offsets = [0, 768], sizes = [16, 128], strides = [1, 1]} : vector<112x2048xf32> to vector<16x128xf32>
      %66 = vector.extract_strided_slice %16 {offsets = [16, 768], sizes = [16, 128], strides = [1, 1]} : vector<112x2048xf32> to vector<16x128xf32>
      %67 = vector.extract_strided_slice %16 {offsets = [32, 768], sizes = [16, 128], strides = [1, 1]} : vector<112x2048xf32> to vector<16x128xf32>
      %68 = vector.extract_strided_slice %16 {offsets = [48, 768], sizes = [16, 128], strides = [1, 1]} : vector<112x2048xf32> to vector<16x128xf32>
      %69 = vector.extract_strided_slice %16 {offsets = [64, 768], sizes = [16, 128], strides = [1, 1]} : vector<112x2048xf32> to vector<16x128xf32>
      %70 = vector.extract_strided_slice %16 {offsets = [80, 768], sizes = [16, 128], strides = [1, 1]} : vector<112x2048xf32> to vector<16x128xf32>
      %71 = vector.extract_strided_slice %16 {offsets = [96, 768], sizes = [16, 128], strides = [1, 1]} : vector<112x2048xf32> to vector<16x128xf32>
      %72 = tpu.concatenate %65, %66, %67, %68, %69, %70, %71 in 1 : vector<16x128xf32>, vector<16x128xf32>, vector<16x128xf32>, vector<16x128xf32>, vector<16x128xf32>, vector<16x128xf32>, vector<16x128xf32> -> vector<16x896xf32>
      %73 = vector.extract_strided_slice %16 {offsets = [0, 896], sizes = [16, 128], strides = [1, 1]} : vector<112x2048xf32> to vector<16x128xf32>
      %74 = vector.extract_strided_slice %16 {offsets = [16, 896], sizes = [16, 128], strides = [1, 1]} : vector<112x2048xf32> to vector<16x128xf32>
      %75 = vector.extract_strided_slice %16 {offsets = [32, 896], sizes = [16, 128], strides = [1, 1]} : vector<112x2048xf32> to vector<16x128xf32>
      %76 = vector.extract_strided_slice %16 {offsets = [48, 896], sizes = [16, 128], strides = [1, 1]} : vector<112x2048xf32> to vector<16x128xf32>
      %77 = vector.extract_strided_slice %16 {offsets = [64, 896], sizes = [16, 128], strides = [1, 1]} : vector<112x2048xf32> to vector<16x128xf32>
      %78 = vector.extract_strided_slice %16 {offsets = [80, 896], sizes = [16, 128], strides = [1, 1]} : vector<112x2048xf32> to vector<16x128xf32>
      %79 = vector.extract_strided_slice %16 {offsets = [96, 896], sizes = [16, 128], strides = [1, 1]} : vector<112x2048xf32> to vector<16x128xf32>
      %80 = tpu.concatenate %73, %74, %75, %76, %77, %78, %79 in 1 : vector<16x128xf32>, vector<16x128xf32>, vector<16x128xf32>, vector<16x128xf32>, vector<16x128xf32>, vector<16x128xf32>, vector<16x128xf32> -> vector<16x896xf32>
      %81 = vector.extract_strided_slice %16 {offsets = [0, 1024], sizes = [16, 128], strides = [1, 1]} : vector<112x2048xf32> to vector<16x128xf32>
      %82 = vector.extract_strided_slice %16 {offsets = [16, 1024], sizes = [16, 128], strides = [1, 1]} : vector<112x2048xf32> to vector<16x128xf32>
      %83 = vector.extract_strided_slice %16 {offsets = [32, 1024], sizes = [16, 128], strides = [1, 1]} : vector<112x2048xf32> to vector<16x128xf32>
      %84 = vector.extract_strided_slice %16 {offsets = [48, 1024], sizes = [16, 128], strides = [1, 1]} : vector<112x2048xf32> to vector<16x128xf32>
      %85 = vector.extract_strided_slice %16 {offsets = [64, 1024], sizes = [16, 128], strides = [1, 1]} : vector<112x2048xf32> to vector<16x128xf32>
      %86 = vector.extract_strided_slice %16 {offsets = [80, 1024], sizes = [16, 128], strides = [1, 1]} : vector<112x2048xf32> to vector<16x128xf32>
      %87 = vector.extract_strided_slice %16 {offsets = [96, 1024], sizes = [16, 128], strides = [1, 1]} : vector<112x2048xf32> to vector<16x128xf32>
      %88 = tpu.concatenate %81, %82, %83, %84, %85, %86, %87 in 1 : vector<16x128xf32>, vector<16x128xf32>, vector<16x128xf32>, vector<16x128xf32>, vector<16x128xf32>, vector<16x128xf32>, vector<16x128xf32> -> vector<16x896xf32>
      %89 = vector.extract_strided_slice %16 {offsets = [0, 1152], sizes = [16, 128], strides = [1, 1]} : vector<112x2048xf32> to vector<16x128xf32>
      %90 = vector.extract_strided_slice %16 {offsets = [16, 1152], sizes = [16, 128], strides = [1, 1]} : vector<112x2048xf32> to vector<16x128xf32>
      %91 = vector.extract_strided_slice %16 {offsets = [32, 1152], sizes = [16, 128], strides = [1, 1]} : vector<112x2048xf32> to vector<16x128xf32>
      %92 = vector.extract_strided_slice %16 {offsets = [48, 1152], sizes = [16, 128], strides = [1, 1]} : vector<112x2048xf32> to vector<16x128xf32>
      %93 = vector.extract_strided_slice %16 {offsets = [64, 1152], sizes = [16, 128], strides = [1, 1]} : vector<112x2048xf32> to vector<16x128xf32>
      %94 = vector.extract_strided_slice %16 {offsets = [80, 1152], sizes = [16, 128], strides = [1, 1]} : vector<112x2048xf32> to vector<16x128xf32>
      %95 = vector.extract_strided_slice %16 {offsets = [96, 1152], sizes = [16, 128], strides = [1, 1]} : vector<112x2048xf32> to vector<16x128xf32>
      %96 = tpu.concatenate %89, %90, %91, %92, %93, %94, %95 in 1 : vector<16x128xf32>, vector<16x128xf32>, vector<16x128xf32>, vector<16x128xf32>, vector<16x128xf32>, vector<16x128xf32>, vector<16x128xf32> -> vector<16x896xf32>
      %97 = vector.extract_strided_slice %16 {offsets = [0, 1280], sizes = [16, 128], strides = [1, 1]} : vector<112x2048xf32> to vector<16x128xf32>
      %98 = vector.extract_strided_slice %16 {offsets = [16, 1280], sizes = [16, 128], strides = [1, 1]} : vector<112x2048xf32> to vector<16x128xf32>
      %99 = vector.extract_strided_slice %16 {offsets = [32, 1280], sizes = [16, 128], strides = [1, 1]} : vector<112x2048xf32> to vector<16x128xf32>
      %100 = vector.extract_strided_slice %16 {offsets = [48, 1280], sizes = [16, 128], strides = [1, 1]} : vector<112x2048xf32> to vector<16x128xf32>
      %101 = vector.extract_strided_slice %16 {offsets = [64, 1280], sizes = [16, 128], strides = [1, 1]} : vector<112x2048xf32> to vector<16x128xf32>
      %102 = vector.extract_strided_slice %16 {offsets = [80, 1280], sizes = [16, 128], strides = [1, 1]} : vector<112x2048xf32> to vector<16x128xf32>
      %103 = vector.extract_strided_slice %16 {offsets = [96, 1280], sizes = [16, 128], strides = [1, 1]} : vector<112x2048xf32> to vector<16x128xf32>
      %104 = tpu.concatenate %97, %98, %99, %100, %101, %102, %103 in 1 : vector<16x128xf32>, vector<16x128xf32>, vector<16x128xf32>, vector<16x128xf32>, vector<16x128xf32>, vector<16x128xf32>, vector<16x128xf32> -> vector<16x896xf32>
      %105 = vector.extract_strided_slice %16 {offsets = [0, 1408], sizes = [16, 128], strides = [1, 1]} : vector<112x2048xf32> to vector<16x128xf32>
      %106 = vector.extract_strided_slice %16 {offsets = [16, 1408], sizes = [16, 128], strides = [1, 1]} : vector<112x2048xf32> to vector<16x128xf32>
      %107 = vector.extract_strided_slice %16 {offsets = [32, 1408], sizes = [16, 128], strides = [1, 1]} : vector<112x2048xf32> to vector<16x128xf32>
      %108 = vector.extract_strided_slice %16 {offsets = [48, 1408], sizes = [16, 128], strides = [1, 1]} : vector<112x2048xf32> to vector<16x128xf32>
      %109 = vector.extract_strided_slice %16 {offsets = [64, 1408], sizes = [16, 128], strides = [1, 1]} : vector<112x2048xf32> to vector<16x128xf32>
      %110 = vector.extract_strided_slice %16 {offsets = [80, 1408], sizes = [16, 128], strides = [1, 1]} : vector<112x2048xf32> to vector<16x128xf32>
      %111 = vector.extract_strided_slice %16 {offsets = [96, 1408], sizes = [16, 128], strides = [1, 1]} : vector<112x2048xf32> to vector<16x128xf32>
      %112 = tpu.concatenate %105, %106, %107, %108, %109, %110, %111 in 1 : vector<16x128xf32>, vector<16x128xf32>, vector<16x128xf32>, vector<16x128xf32>, vector<16x128xf32>, vector<16x128xf32>, vector<16x128xf32> -> vector<16x896xf32>
      %113 = vector.extract_strided_slice %16 {offsets = [0, 1536], sizes = [16, 128], strides = [1, 1]} : vector<112x2048xf32> to vector<16x128xf32>
      %114 = vector.extract_strided_slice %16 {offsets = [16, 1536], sizes = [16, 128], strides = [1, 1]} : vector<112x2048xf32> to vector<16x128xf32>
      %115 = vector.extract_strided_slice %16 {offsets = [32, 1536], sizes = [16, 128], strides = [1, 1]} : vector<112x2048xf32> to vector<16x128xf32>
      %116 = vector.extract_strided_slice %16 {offsets = [48, 1536], sizes = [16, 128], strides = [1, 1]} : vector<112x2048xf32> to vector<16x128xf32>
      %117 = vector.extract_strided_slice %16 {offsets = [64, 1536], sizes = [16, 128], strides = [1, 1]} : vector<112x2048xf32> to vector<16x128xf32>
      %118 = vector.extract_strided_slice %16 {offsets = [80, 1536], sizes = [16, 128], strides = [1, 1]} : vector<112x2048xf32> to vector<16x128xf32>
      %119 = vector.extract_strided_slice %16 {offsets = [96, 1536], sizes = [16, 128], strides = [1, 1]} : vector<112x2048xf32> to vector<16x128xf32>
      %120 = tpu.concatenate %113, %114, %115, %116, %117, %118, %119 in 1 : vector<16x128xf32>, vector<16x128xf32>, vector<16x128xf32>, vector<16x128xf32>, vector<16x128xf32>, vector<16x128xf32>, vector<16x128xf32> -> vector<16x896xf32>
      %121 = vector.extract_strided_slice %16 {offsets = [0, 1664], sizes = [16, 128], strides = [1, 1]} : vector<112x2048xf32> to vector<16x128xf32>
      %122 = vector.extract_strided_slice %16 {offsets = [16, 1664], sizes = [16, 128], strides = [1, 1]} : vector<112x2048xf32> to vector<16x128xf32>
      %123 = vector.extract_strided_slice %16 {offsets = [32, 1664], sizes = [16, 128], strides = [1, 1]} : vector<112x2048xf32> to vector<16x128xf32>
      %124 = vector.extract_strided_slice %16 {offsets = [48, 1664], sizes = [16, 128], strides = [1, 1]} : vector<112x2048xf32> to vector<16x128xf32>
      %125 = vector.extract_strided_slice %16 {offsets = [64, 1664], sizes = [16, 128], strides = [1, 1]} : vector<112x2048xf32> to vector<16x128xf32>
      %126 = vector.extract_strided_slice %16 {offsets = [80, 1664], sizes = [16, 128], strides = [1, 1]} : vector<112x2048xf32> to vector<16x128xf32>
      %127 = vector.extract_strided_slice %16 {offsets = [96, 1664], sizes = [16, 128], strides = [1, 1]} : vector<112x2048xf32> to vector<16x128xf32>
      %128 = tpu.concatenate %121, %122, %123, %124, %125, %126, %127 in 1 : vector<16x128xf32>, vector<16x128xf32>, vector<16x128xf32>, vector<16x128xf32>, vector<16x128xf32>, vector<16x128xf32>, vector<16x128xf32> -> vector<16x896xf32>
      %129 = vector.extract_strided_slice %16 {offsets = [0, 1792], sizes = [16, 128], strides = [1, 1]} : vector<112x2048xf32> to vector<16x128xf32>
      %130 = vector.extract_strided_slice %16 {offsets = [16, 1792], sizes = [16, 128], strides = [1, 1]} : vector<112x2048xf32> to vector<16x128xf32>
      %131 = vector.extract_strided_slice %16 {offsets = [32, 1792], sizes = [16, 128], strides = [1, 1]} : vector<112x2048xf32> to vector<16x128xf32>
      %132 = vector.extract_strided_slice %16 {offsets = [48, 1792], sizes = [16, 128], strides = [1, 1]} : vector<112x2048xf32> to vector<16x128xf32>
      %133 = vector.extract_strided_slice %16 {offsets = [64, 1792], sizes = [16, 128], strides = [1, 1]} : vector<112x2048xf32> to vector<16x128xf32>
      %134 = vector.extract_strided_slice %16 {offsets = [80, 1792], sizes = [16, 128], strides = [1, 1]} : vector<112x2048xf32> to vector<16x128xf32>
      %135 = vector.extract_strided_slice %16 {offsets = [96, 1792], sizes = [16, 128], strides = [1, 1]} : vector<112x2048xf32> to vector<16x128xf32>
      %136 = tpu.concatenate %129, %130, %131, %132, %133, %134, %135 in 1 : vector<16x128xf32>, vector<16x128xf32>, vector<16x128xf32>, vector<16x128xf32>, vector<16x128xf32>, vector<16x128xf32>, vector<16x128xf32> -> vector<16x896xf32>
      %137 = vector.extract_strided_slice %16 {offsets = [0, 1920], sizes = [16, 128], strides = [1, 1]} : vector<112x2048xf32> to vector<16x128xf32>
      %138 = vector.extract_strided_slice %16 {offsets = [16, 1920], sizes = [16, 128], strides = [1, 1]} : vector<112x2048xf32> to vector<16x128xf32>
      %139 = vector.extract_strided_slice %16 {offsets = [32, 1920], sizes = [16, 128], strides = [1, 1]} : vector<112x2048xf32> to vector<16x128xf32>
      %140 = vector.extract_strided_slice %16 {offsets = [48, 1920], sizes = [16, 128], strides = [1, 1]} : vector<112x2048xf32> to vector<16x128xf32>
      %141 = vector.extract_strided_slice %16 {offsets = [64, 1920], sizes = [16, 128], strides = [1, 1]} : vector<112x2048xf32> to vector<16x128xf32>
      %142 = vector.extract_strided_slice %16 {offsets = [80, 1920], sizes = [16, 128], strides = [1, 1]} : vector<112x2048xf32> to vector<16x128xf32>
      %143 = vector.extract_strided_slice %16 {offsets = [96, 1920], sizes = [16, 128], strides = [1, 1]} : vector<112x2048xf32> to vector<16x128xf32>
      %144 = tpu.concatenate %137, %138, %139, %140, %141, %142, %143 in 1 : vector<16x128xf32>, vector<16x128xf32>, vector<16x128xf32>, vector<16x128xf32>, vector<16x128xf32>, vector<16x128xf32>, vector<16x128xf32> -> vector<16x896xf32>
      %145 = tpu.concatenate %24, %32, %40, %48, %56, %64, %72, %80, %88, %96, %104, %112, %120, %128, %136, %144 in 0 : vector<16x896xf32>, vector<16x896xf32>, vector<16x896xf32>, vector<16x896xf32>, vector<16x896xf32>, vector<16x896xf32>, vector<16x896xf32>, vector<16x896xf32>, vector<16x896xf32>, vector<16x896xf32>, vector<16x896xf32>, vector<16x896xf32>, vector<16x896xf32>, vector<16x896xf32>, vector<16x896xf32>, vector<16x896xf32> -> vector<256x896xf32>
      %146 = arith.truncf %145 : vector<256x896xf32> to vector<256x896xbf16>
      %cst_11 = arith.constant dense<0.000000e+00> : vector<112x896xf32>
      %147 = tpu.matmul %12, %146, %cst_11 {dimension_numbers = #tpu.dot_dimension_numbers<[1], [0], [0], [1], [0, 0, 1, 1], [], []>} : vector<112x256xbf16>, vector<256x896xbf16>, vector<112x896xf32> -> vector<112x896xf32>
      %148 = arith.addf %13, %147 : vector<112x896xf32>
      %149 = arith.truncf %148 : vector<112x896xf32> to vector<112x896xbf16>
      %c0_12 = arith.constant 0 : index
      %c0_13 = arith.constant 0 : index
      %c0_14 = arith.constant 0 : index
      %150 = vector.load %arg6[%c0_12, %c0_13, %c0_14] : memref<1x112x896xbf16, #tpu.memory_space<vmem>>, vector<1x112x896xbf16>
      %151 = vector.shape_cast %150 : vector<1x112x896xbf16> to vector<112x896xbf16>
      %152 = vector.shape_cast %149 : vector<112x896xbf16> to vector<1x112x896xbf16>
      tpu.vector_store %arg6[%c0_12, %c0_13, %c0_14], %152 {strides = array<i32>} : memref<1x112x896xbf16, #tpu.memory_space<vmem>>, vector<1x112x896xbf16>,
    } else {
    }
    %true = arith.constant true
    %6 = arith.xori %3, %true : i1
    %7 = arith.extui %6 : i1 to i32
    %c0_i32_0 = arith.constant 0 : i32
    %8 = arith.cmpi ne, %7, %c0_i32_0 : i32
    scf.if %8 {
      %cst = arith.constant 0.000000e+00 : bf16
      %9 = vector.broadcast %cst : bf16 to vector<1x112x896xbf16>
      %c0 = arith.constant 0 : index
      %c0_1 = arith.constant 0 : index
      %c0_2 = arith.constant 0 : index
      %10 = vector.load %arg6[%c0, %c0_1, %c0_2] : memref<1x112x896xbf16, #tpu.memory_space<vmem>>, vector<1x112x896xbf16>
      tpu.vector_store %arg6[%c0, %c0_1, %c0_2], %9 {strides = array<i32>} : memref<1x112x896xbf16, #tpu.memory_space<vmem>>, vector<1x112x896xbf16>,
    } else {
    }
    return
  }
  func.func @transform_0(%arg0: i32, %arg1: i32, %arg2: memref<2xi32, #tpu.memory_space<smem>>) -> (i32, i32, i32) {
    %c0_i32 = arith.constant 0 : i32
    %c0_i32_0 = arith.constant 0 : i32
    return %arg0, %arg1, %c0_i32 : i32, i32, i32
  }
  func.func @transform_1(%arg0: i32, %arg1: i32, %arg2: memref<2xi32, #tpu.memory_space<smem>>) -> (i32, i32, i32, i32) {
    %c0_i32 = arith.constant 0 : i32
    %c0_i32_0 = arith.constant 0 : i32
    %c0_i32_1 = arith.constant 0 : i32
    return %arg0, %arg1, %c0_i32, %c0_i32_0 : i32, i32, i32, i32
  }
  func.func @transform_2(%arg0: i32, %arg1: i32, %arg2: memref<2xi32, #tpu.memory_space<smem>>) -> (i32, i32, i32) {
    %c0_i32 = arith.constant 0 : i32
    %c0_i32_0 = arith.constant 0 : i32
    %c0_i32_1 = arith.constant 0 : i32
    return %arg0, %c0_i32, %c0_i32_0 : i32, i32, i32
  }
  func.func @transform_3(%arg0: i32, %arg1: i32, %arg2: memref<2xi32, #tpu.memory_space<smem>>) -> (i32, i32, i32) {
    %c0_i32 = arith.constant 0 : i32
    %c0_i32_0 = arith.constant 0 : i32
    return %arg0, %arg1, %c0_i32 : i32, i32, i32
  }
}

module attributes {stable_mosaic.version = 11 : i64} {
  func.func @_linear_relu_kernel(%arg0: i32, %arg1: i32, %arg2: i32, %arg3: memref<64x2048xbf16, #tpu.memory_space<vmem>>, %arg4: memref<2048x128xbf16, #tpu.memory_space<vmem>>, %arg5: memref<1x128xf32, #tpu.memory_space<vmem>>, %arg6: memref<64x128xbf16, #tpu.memory_space<vmem>>, %arg7: memref<64x128xf32, #tpu.memory_space<vmem>>) attributes {dimension_semantics = [#tpu.dimension_semantics<parallel>, #tpu.dimension_semantics<parallel>, #tpu.dimension_semantics<arbitrary>], iteration_bounds = array<i64: 1, 1, 4>, scalar_prefetch = 0 : i64, scratch_operands = 1 : i64, tpu.core_type = #tpu.core_type<tc>, window_params = [{transform_indices = @transform_0, window_bounds = array<i64: 64, 2048>}, {transform_indices = @transform_1, window_bounds = array<i64: 2048, 128>}, {transform_indices = @transform_2, window_bounds = array<i64: 1, 128>}, {transform_indices = @transform_3, window_bounds = array<i64: 64, 128>}]} {
    %c0_i32 = arith.constant 0 : i32
    %0 = arith.cmpi eq, %arg2, %c0_i32 : i32
    %1 = arith.extui %0 : i1 to i32
    %c0_i32_0 = arith.constant 0 : i32
    %2 = arith.cmpi ne, %1, %c0_i32_0 : i32
    scf.if %2 {
      %cst_9 = arith.constant 0.000000e+00 : f32
      %12 = vector.broadcast %cst_9 : f32 to vector<64x128xf32>
      %c0_10 = arith.constant 0 : index
      %c0_11 = arith.constant 0 : index
      %13 = vector.load %arg7[%c0_10, %c0_11] : memref<64x128xf32, #tpu.memory_space<vmem>>, vector<64x128xf32>
      tpu.vector_store %arg7[%c0_10, %c0_11], %12 {strides = array<i32>} : memref<64x128xf32, #tpu.memory_space<vmem>>, vector<64x128xf32>,
    } else {
    }
    %c0 = arith.constant 0 : index
    %c0_1 = arith.constant 0 : index
    %3 = vector.load %arg7[%c0, %c0_1] : memref<64x128xf32, #tpu.memory_space<vmem>>, vector<64x128xf32>
    %c0_2 = arith.constant 0 : index
    %c0_3 = arith.constant 0 : index
    %4 = vector.load %arg3[%c0_2, %c0_3] : memref<64x2048xbf16, #tpu.memory_space<vmem>>, vector<64x2048xbf16>
    %c0_4 = arith.constant 0 : index
    %c0_5 = arith.constant 0 : index
    %5 = vector.load %arg4[%c0_4, %c0_5] : memref<2048x128xbf16, #tpu.memory_space<vmem>>, vector<2048x128xbf16>
    %cst = arith.constant dense<0.000000e+00> : vector<64x128xf32>
    %6 = tpu.matmul %4, %5, %cst {dimension_numbers = #tpu.dot_dimension_numbers<[1], [0], [0], [1], [0, 0, 1, 1], [], []>} : vector<64x2048xbf16>, vector<2048x128xbf16>, vector<64x128xf32> -> vector<64x128xf32>
    %7 = arith.addf %3, %6 : vector<64x128xf32>
    %c0_6 = arith.constant 0 : index
    %c0_7 = arith.constant 0 : index
    %8 = vector.load %arg7[%c0_6, %c0_7] : memref<64x128xf32, #tpu.memory_space<vmem>>, vector<64x128xf32>
    tpu.vector_store %arg7[%c0_6, %c0_7], %7 {strides = array<i32>} : memref<64x128xf32, #tpu.memory_space<vmem>>, vector<64x128xf32>,
    %c3_i32 = arith.constant 3 : i32
    %9 = arith.cmpi eq, %arg2, %c3_i32 : i32
    %10 = arith.extui %9 : i1 to i32
    %c0_i32_8 = arith.constant 0 : i32
    %11 = arith.cmpi ne, %10, %c0_i32_8 : i32
    scf.if %11 {
      %c0_9 = arith.constant 0 : index
      %c0_10 = arith.constant 0 : index
      %12 = vector.load %arg7[%c0_9, %c0_10] : memref<64x128xf32, #tpu.memory_space<vmem>>, vector<64x128xf32>
      %c0_11 = arith.constant 0 : index
      %c0_12 = arith.constant 0 : index
      %13 = vector.load %arg5[%c0_11, %c0_12] : memref<1x128xf32, #tpu.memory_space<vmem>>, vector<1x128xf32>
      %14 = vector.broadcast %13 : vector<1x128xf32> to vector<64x128xf32>
      %15 = arith.addf %12, %14 : vector<64x128xf32>
      %cst_13 = arith.constant 0.000000e+00 : f32
      %16 = vector.broadcast %cst_13 : f32 to vector<64x128xf32>
      %17 = arith.maximumf %15, %16 : vector<64x128xf32>
      %18 = arith.truncf %17 : vector<64x128xf32> to vector<64x128xbf16>
      %c0_14 = arith.constant 0 : index
      %c0_15 = arith.constant 0 : index
      %19 = vector.load %arg6[%c0_14, %c0_15] : memref<64x128xbf16, #tpu.memory_space<vmem>>, vector<64x128xbf16>
      tpu.vector_store %arg6[%c0_14, %c0_15], %18 {strides = array<i32>} : memref<64x128xbf16, #tpu.memory_space<vmem>>, vector<64x128xbf16>,
    } else {
    }
    return
  }
  func.func @transform_0(%arg0: i32, %arg1: i32, %arg2: i32) -> (i32, i32) {
    %c0_i32 = arith.constant 0 : i32
    return %arg0, %arg2 : i32, i32
  }
  func.func @transform_1(%arg0: i32, %arg1: i32, %arg2: i32) -> (i32, i32) {
    %c0_i32 = arith.constant 0 : i32
    return %arg2, %arg1 : i32, i32
  }
  func.func @transform_2(%arg0: i32, %arg1: i32, %arg2: i32) -> (i32, i32) {
    %c0_i32 = arith.constant 0 : i32
    %c0_i32_0 = arith.constant 0 : i32
    return %c0_i32, %arg1 : i32, i32
  }
  func.func @transform_3(%arg0: i32, %arg1: i32, %arg2: i32) -> (i32, i32) {
    %c0_i32 = arith.constant 0 : i32
    return %arg0, %arg1 : i32, i32
  }
}

module attributes {stable_mosaic.version = 11 : i64} {
  func.func @_linear_relu_kernel(%arg0: i32, %arg1: i32, %arg2: i32, %arg3: memref<64x128xbf16, #tpu.memory_space<vmem>>, %arg4: memref<128x128xbf16, #tpu.memory_space<vmem>>, %arg5: memref<1x128xf32, #tpu.memory_space<vmem>>, %arg6: memref<64x128xf32, #tpu.memory_space<vmem>>, %arg7: memref<64x128xf32, #tpu.memory_space<vmem>>) attributes {dimension_semantics = [#tpu.dimension_semantics<parallel>, #tpu.dimension_semantics<parallel>, #tpu.dimension_semantics<arbitrary>], iteration_bounds = array<i64: 1, 1, 1>, scalar_prefetch = 0 : i64, scratch_operands = 1 : i64, tpu.core_type = #tpu.core_type<tc>, window_params = [{transform_indices = @transform_0, window_bounds = array<i64: 64, 128>}, {transform_indices = @transform_1, window_bounds = array<i64: 128, 128>}, {transform_indices = @transform_2, window_bounds = array<i64: 1, 128>}, {transform_indices = @transform_3, window_bounds = array<i64: 64, 128>}]} {
    %c0_i32 = arith.constant 0 : i32
    %0 = arith.cmpi eq, %arg2, %c0_i32 : i32
    %1 = arith.extui %0 : i1 to i32
    %c0_i32_0 = arith.constant 0 : i32
    %2 = arith.cmpi ne, %1, %c0_i32_0 : i32
    scf.if %2 {
      %cst_10 = arith.constant 0.000000e+00 : f32
      %12 = vector.broadcast %cst_10 : f32 to vector<64x128xf32>
      %c0_11 = arith.constant 0 : index
      %c0_12 = arith.constant 0 : index
      %13 = vector.load %arg7[%c0_11, %c0_12] : memref<64x128xf32, #tpu.memory_space<vmem>>, vector<64x128xf32>
      tpu.vector_store %arg7[%c0_11, %c0_12], %12 {strides = array<i32>} : memref<64x128xf32, #tpu.memory_space<vmem>>, vector<64x128xf32>,
    } else {
    }
    %c0 = arith.constant 0 : index
    %c0_1 = arith.constant 0 : index
    %3 = vector.load %arg7[%c0, %c0_1] : memref<64x128xf32, #tpu.memory_space<vmem>>, vector<64x128xf32>
    %c0_2 = arith.constant 0 : index
    %c0_3 = arith.constant 0 : index
    %4 = vector.load %arg3[%c0_2, %c0_3] : memref<64x128xbf16, #tpu.memory_space<vmem>>, vector<64x128xbf16>
    %c0_4 = arith.constant 0 : index
    %c0_5 = arith.constant 0 : index
    %5 = vector.load %arg4[%c0_4, %c0_5] : memref<128x128xbf16, #tpu.memory_space<vmem>>, vector<128x128xbf16>
    %cst = arith.constant dense<0.000000e+00> : vector<64x128xf32>
    %6 = tpu.matmul %4, %5, %cst {dimension_numbers = #tpu.dot_dimension_numbers<[1], [0], [0], [1], [0, 0, 1, 1], [], []>} : vector<64x128xbf16>, vector<128x128xbf16>, vector<64x128xf32> -> vector<64x128xf32>
    %7 = arith.addf %3, %6 : vector<64x128xf32>
    %c0_6 = arith.constant 0 : index
    %c0_7 = arith.constant 0 : index
    %8 = vector.load %arg7[%c0_6, %c0_7] : memref<64x128xf32, #tpu.memory_space<vmem>>, vector<64x128xf32>
    tpu.vector_store %arg7[%c0_6, %c0_7], %7 {strides = array<i32>} : memref<64x128xf32, #tpu.memory_space<vmem>>, vector<64x128xf32>,
    %c0_i32_8 = arith.constant 0 : i32
    %9 = arith.cmpi eq, %arg2, %c0_i32_8 : i32
    %10 = arith.extui %9 : i1 to i32
    %c0_i32_9 = arith.constant 0 : i32
    %11 = arith.cmpi ne, %10, %c0_i32_9 : i32
    scf.if %11 {
      %c0_10 = arith.constant 0 : index
      %c0_11 = arith.constant 0 : index
      %12 = vector.load %arg7[%c0_10, %c0_11] : memref<64x128xf32, #tpu.memory_space<vmem>>, vector<64x128xf32>
      %c0_12 = arith.constant 0 : index
      %c0_13 = arith.constant 0 : index
      %13 = vector.load %arg5[%c0_12, %c0_13] : memref<1x128xf32, #tpu.memory_space<vmem>>, vector<1x128xf32>
      %14 = vector.broadcast %13 : vector<1x128xf32> to vector<64x128xf32>
      %15 = arith.addf %12, %14 : vector<64x128xf32>
      %cst_14 = arith.constant 0.000000e+00 : f32
      %16 = vector.broadcast %cst_14 : f32 to vector<64x128xf32>
      %17 = arith.maximumf %15, %16 : vector<64x128xf32>
      %c0_15 = arith.constant 0 : index
      %c0_16 = arith.constant 0 : index
      %18 = vector.load %arg6[%c0_15, %c0_16] : memref<64x128xf32, #tpu.memory_space<vmem>>, vector<64x128xf32>
      tpu.vector_store %arg6[%c0_15, %c0_16], %17 {strides = array<i32>} : memref<64x128xf32, #tpu.memory_space<vmem>>, vector<64x128xf32>,
    } else {
    }
    return
  }
  func.func @transform_0(%arg0: i32, %arg1: i32, %arg2: i32) -> (i32, i32) {
    %c0_i32 = arith.constant 0 : i32
    return %arg0, %arg2 : i32, i32
  }
  func.func @transform_1(%arg0: i32, %arg1: i32, %arg2: i32) -> (i32, i32) {
    %c0_i32 = arith.constant 0 : i32
    return %arg2, %arg1 : i32, i32
  }
  func.func @transform_2(%arg0: i32, %arg1: i32, %arg2: i32) -> (i32, i32) {
    %c0_i32 = arith.constant 0 : i32
    %c0_i32_0 = arith.constant 0 : i32
    return %c0_i32, %arg1 : i32, i32
  }
  func.func @transform_3(%arg0: i32, %arg1: i32, %arg2: i32) -> (i32, i32) {
    %c0_i32 = arith.constant 0 : i32
    return %arg0, %arg1 : i32, i32
  }
}

</mosaic_0001>

<bundles_post_ra>
// kernel: _forward.3
= control target key start
LH: loop header
LB: loop body
LE: loop exit
PB: predicated region body
PF: predicated region fallthrough
CT: control target
= control target key end

     0   :  { %s3946_s0 = inlined_call_operand.vmem [shape: s32[2], index: 0, kind: input, shape index: {}]   ;;  %s3947_s1 = inlined_call_operand.vmem [shape: bf16[2,224,16], index: 1, kind: input, shape index: {}]   ;;  %s3948_s2 = inlined_call_operand.vmem [shape: bf16[2,2,112,256], index: 2, kind: input, shape index: {}]   ;;  %s3949_s3 = inlined_call_operand.vmem [shape: bf16[2,16,2048], index: 3, kind: input, shape index: {}]   ;;  %s3950_s4 = inlined_call_operand.vmem [shape: bf16[2,224,896], index: 4, kind: output, shape index: {}]  }
   0x1   :  { %s9_s17 = sshll.u32 %s3946_s0, 4  ;;  %s10_s17 = int_to_ptr.vmem [resolvable:$true] %s9_s17 }
   0x2   :  { %s2776_s18 = scalar_lea.vmem %s10_s17, 16  ;;  %p2781_p1 = scmp.lt.s32.totalorder %s10_s17, %s10_s17 }
   0x3   :  { %p2777_p0 = scmp.ne.s32.totalorder %s10_s17, %s2776_s18  ;;  %p2782_p2 = scmp.lt.s32.totalorder %s2776_s18, %s2776_s18 }
   0x5   :  { %p2783_p3 = por %p2782_p2, %p2781_p1 }
   0x7   :  { %p2784_p4 = pnand %p2783_p3, %p2777_p0 }
   0x9   :  { %2787 = shalt.err (!%p2784_p4)  }
   0xa   :  { %s2830_s19 = smov [#allocation3]  }
   0xb   :  { %12 = dma.vmem_to_smem %s10_s17, 16, %s2830_s19, [#allocation2] }
   0xc   :  { %2808 = dma.done.wait [#allocation2], 16 }
   0xd   :  { %2809 = vsyncadd [#allocation2], 4294967280 }
   0xe   :  { %14 = sfence }
   0xf   :  { %s2861_s20 = smov 0   ;;  %s2863_s21 = smov 0  }
  0x10   :  { %s2865_s22 = smov 0   ;;  %s2867_s0 = smov 0  }
  0x11   :  { %s2869_s23 = smov 0  }
  0x12 LB: > { %s29_s24 = sadd.s32 1, %s2820_s22  ;;  %s32_s25 = sadd.s32 1, %s2824_s0  ;;  %s2828_s23 = sphi %s2869_s23, %s20_s23   ;;  %s2824_s0 = sphi %s2867_s0, %s4204_s0   ;;  %s2820_s22 = sphi %s2865_s22, %s4203_s22   ;;  %s2816_s21 = sphi %s2863_s21, %s4202_s21   ;;  %s2812_s20 = sphi %s2861_s20, %s4201_s20  }
  0x13   : > { %p30_p5 = scmp.ge.s32.totalorder %s29_s24, 2  ;;  %p2425_p6 = scmp.ge.s32.totalorder %s2828_s23, 1 }
  0x14   : > { %p191_p7 = scmp.lt.s32.totalorder %s2828_s23, 5 }
  0x15   : > { %s4206_s24 = smov (%p30_p5, %s29_s24), 0  ;;  %s4208_s25 = smov (!%p30_p5, %s32_s25), %s2824_s0 }
  0x16   : > { %4005 = sst [smem:[#allocation5_spill]] %s4206_s24  ;;  %p192_p8 = pnand %p2425_p6, %p191_p7 }
  0x17   : > { %p34_p9 = scmp.ge.s32.totalorder %s4208_s25, 2  ;;  %s238_s26 = smul.u32 (!%p192_p8), 14, %s2812_s20 }
  0x18   : > { %195 = sbr.rel (%p192_p8) target bundleno = 824 (0x338), region = 32  ;;  %p239_p10 = scmp.lt.s32.totalorder (!%p192_p8), %s2816_s21, 1 }
  0x19   : > { %s4210_s25 = smov (%p34_p9, %s4208_s25), 0  ;;  %p250_p11 = scmp.lt.s32.totalorder (!%p192_p8), %s2812_s20, 1 }
  0x1a   : > { %4006 = sst [smem:[#allocation6_spill]] %s4210_s25  ;;  %p241_p12 = scmp.lt.s32.totalorder (!%p192_p8), %s238_s26, 27 }
  0x1b   : > { %s2896_s29 = sld [smem:[#allocation3 + %s2816_s21]] (!%p192_p8) }
  0x1d   : > { %s240_s28 = scalar_select %p239_p10, %s2816_s21, 1 }
  0x1e   : > { %s4212_s26 = smov (!%p241_p12, %s238_s26), 27 }
  0x1f   : > { %s2700_s30 = smul.u32 28, %s240_s28  ;;  %s2585_s5 = sshll.u32 %s240_s28, 7 }
  0x20   : > { %s251_s6 = scalar_select %p250_p11, %s2812_s20, 1 }
  0x21   : > { %s244_s7 = sadd.s32 %s2700_s30, %s4212_s26  ;;  %s2702_s8 = smul.u32 56, %s240_s28 }
  0x22   : > { %s2426_s9 = sshll.u32 %s244_s7, 2  ;;  %s2701_s10 = smul.u32 28, %s251_s6 }
  0x23   : > { %s2902_s13 = scalar_lea.vmem %s3947_s1, %s2426_s9  ;;  %s2907_s16 = scalar_lea.vmem %s3949_s3, %s2585_s5 }
  0x24   : > { %s254_s17 = sadd.s32 %s2702_s8, %s2701_s10  ;;  %s2703_s18 = smul.u32 7, %s4212_s26 }
  0x25   : > { %s2427_s19 = sshll.u32 %s254_s17, 2  ;;  %s2704_s21 = smul.u32 196, %s240_s28 }
  0x26   : > { %s2912_s30 = scalar_lea.vmem %s3948_s2, %s2427_s19  ;;  %s4007_s5 = sshll.u32 %s2812_s20, 4 }
  0x27   : > { %s269_s6 = sadd.s32 %s2704_s21, %s2703_s18  ;;  %p2432_p13 = scmp.ge.s32.totalorder %s4007_s5, %s2896_s29 }
  0x28   : > { %s2430_s7 = sshll.u32 %s269_s6, 2 }
  0x29   : > { %s2917_s9 = scalar_lea.vmem %s3950_s4, %s2430_s7  ;;  %279 = sbr.rel (%p2432_p13) target bundleno = 787 (0x313), region = 36 }
  0x2e   : > { %v309_v0 = vld [vmem:[%s2907_s16 + $0x8] sm:$0xff]  ;;  %v308_v2 = vld [vmem:[%s2907_s16] sm:$0xff]  ;;  %v2831_v6 = vmov 0   ;;  %v311_v9 = vld [vmem:[%s2907_s16 + $0x18] sm:$0xff]  ;;  %vm439_vm0 = vcmask 130048  }
  0x2f   : > { %v317_v1 = vld [vmem:[%s2907_s16 + $0x48] sm:$0xff]  ;;  %v316_v5 = vld [vmem:[%s2907_s16 + $0x40] sm:$0xff]  ;;  %596 = vmatprep.mubr.bf16.mxu1 %v2831_v6  ;;  %493 = vmatprep.mubr.bf16.mxu0 %v2831_v6  ;;  %v319_v10 = vld [vmem:[%s2907_s16 + $0x58] sm:$0xff] }
  0x30   : > { %v2443_v3 = vcombine.high %v309_v0, %v317_v1  ;;  %v2442_v4 = vcombine.low %v309_v0, %v317_v1  ;;  %v2441_v7 = vcombine.high %v308_v2, %v316_v5  ;;  %v2440_v8 = vcombine.low %v308_v2, %v316_v5  ;;  %v2931_v11 = vld [vmem:[%s2902_s13] sm:$0xff]   ;;  %v310_v14 = vld [vmem:[%s2907_s16 + $0x10] sm:$0xff]  ;;  %v313_v18 = vld [vmem:[%s2907_s16 + $0x28] sm:$0xff] }
  0x31   : > { %v2447_v12 = vcombine.high %v311_v9, %v319_v10  ;;  %v2446_v13 = vcombine.low %v311_v9, %v319_v10  ;;  %v318_v15 = vld [vmem:[%s2907_s16 + $0x50] sm:$0xff]  ;;  %v321_v19 = vld [vmem:[%s2907_s16 + $0x68] sm:$0xff]  ;;  %v312_v20 = vld [vmem:[%s2907_s16 + $0x20] sm:$0xff] }
  0x32   : > { %578 = vmatprep.subr.bf16.mxu1 %v2443_v3  ;;  %475 = vmatprep.subr.bf16.mxu0 %v2441_v7  ;;  %v2445_v16 = vcombine.high %v310_v14, %v318_v15  ;;  %v2444_v17 = vcombine.low %v310_v14, %v318_v15  ;;  %v320_v21 = vld [vmem:[%s2907_s16 + $0x60] sm:$0xff]  ;;  %v2946_v22 = vld [vmem:[%s2902_s13 + $0x8] sm:$0xff]   ;;  %v2451_v23 = vcombine.high %v313_v18, %v321_v19  ;;  %v2955_v25 = vld [vmem:[%s2902_s13 + $0x10] sm:$0xff]  }
  0x33   : > { %579 = vmatpush1.bf16.msra.mxu1 %v2442_v4  ;;  %476 = vmatpush1.bf16.msra.mxu0 %v2440_v8  ;;  %v2449_v24 = vcombine.high %v312_v20, %v320_v21  ;;  %v2964_v26 = vld [vmem:[%s2902_s13 + $0x18] sm:$0xff]   ;;  %v2973_v27 = vld [vmem:[%s2902_s13 + $0x20] sm:$0xff]   ;;  %v2982_v28 = vld [vmem:[%s2902_s13 + $0x28] sm:$0xff]   ;;  %v2450_v32 = vcombine.low %v313_v18, %v321_v19  ;;  %v2448_v35 = vcombine.low %v312_v20, %v320_v21 }
  0x34   : > { %784 = vmatprep.subr.bf16.mxu1 %v2447_v12  ;;  %681 = vmatprep.subr.bf16.mxu0 %v2445_v16  ;;  %v2991_v29 = vld [vmem:[%s2902_s13 + $0x30] sm:$0xff]   ;;  %v315_v30 = vld [vmem:[%s2907_s16 + $0x38] sm:$0xff] }
  0x35   : > { %v323_v31 = vld [vmem:[%s2907_s16 + $0x78] sm:$0xff]  ;;  %v314_v33 = vld [vmem:[%s2907_s16 + $0x30] sm:$0xff] }
  0x36   : > { %2463 = vmatmul.mubr.msk.bf16.vlgmr.msra.gmra.mxu1 %vm439_vm0, %v2931_v11  ;;  %2456 = vmatmul.mubr.msk.bf16.vlgmr.msra.gmra.mxu0 %vm439_vm0, %v2931_v11  ;;  %v322_v34 = vld [vmem:[%s2907_s16 + $0x70] sm:$0xff]  ;;  %v2455_v36 = vcombine.high %v315_v30, %v323_v31  ;;  %v2454_v38 = vcombine.low %v315_v30, %v323_v31 }
  0x37   : > { %785 = vmatpush1.bf16.msra.mxu1 %v2446_v13  ;;  %606 = vmatprep.mubr.bf16.mxu1 %v2831_v6  ;;  %v2453_v37 = vcombine.high %v314_v33, %v322_v34  ;;  %v2452_v39 = vcombine.low %v314_v33, %v322_v34 }
  0x38   : > { %503 = vmatprep.mubr.bf16.mxu0 %v2831_v6  ;;  %682 = vmatpush1.bf16.msra.mxu0 %v2444_v17 }
  0x39   : > { %990 = vmatprep.subr.bf16.mxu1 %v2451_v23  ;;  %887 = vmatprep.subr.bf16.mxu0 %v2449_v24 }
  0x3e   : > { %2464 = vmatmul.mubr.msk.bf16.gmra.mxu1 %vm439_vm0, %v2946_v22  ;;  %2457 = vmatmul.mubr.msk.bf16.gmra.mxu0 %vm439_vm0, %v2946_v22 }
  0x3f   : > { %616 = vmatprep.mubr.bf16.mxu1 %v2831_v6  ;;  %513 = vmatprep.mubr.bf16.mxu0 %v2831_v6 }
  0x46   : > { %2465 = vmatmul.mubr.msk.bf16.gmra.mxu1 %vm439_vm0, %v2955_v25  ;;  %2458 = vmatmul.mubr.msk.bf16.gmra.mxu0 %vm439_vm0, %v2955_v25 }
  0x47   : > { %626 = vmatprep.mubr.bf16.mxu1 %v2831_v6  ;;  %523 = vmatprep.mubr.bf16.mxu0 %v2831_v6 }
  0x4e   : > { %2466 = vmatmul.mubr.msk.bf16.gmra.mxu1 %vm439_vm0, %v2964_v26  ;;  %2459 = vmatmul.mubr.msk.bf16.gmra.mxu0 %vm439_vm0, %v2964_v26 }
  0x4f   : > { %636 = vmatprep.mubr.bf16.mxu1 %v2831_v6  ;;  %533 = vmatprep.mubr.bf16.mxu0 %v2831_v6 }
  0x56   : > { %2467 = vmatmul.mubr.msk.bf16.gmra.mxu1 %vm439_vm0, %v2973_v27  ;;  %2460 = vmatmul.mubr.msk.bf16.gmra.mxu0 %vm439_vm0, %v2973_v27 }
  0x57   : > { %646 = vmatprep.mubr.bf16.mxu1 %v2831_v6  ;;  %543 = vmatprep.mubr.bf16.mxu0 %v2831_v6 }
  0x5e   : > { %2468 = vmatmul.mubr.msk.bf16.gmra.mxu1 %vm439_vm0, %v2982_v28  ;;  %2461 = vmatmul.mubr.msk.bf16.gmra.mxu0 %vm439_vm0, %v2982_v28 }
  0x5f   : > { %656 = vmatprep.mubr.bf16.mxu1 %v2831_v6  ;;  %553 = vmatprep.mubr.bf16.mxu0 %v2831_v6 }
  0x66   : > { %2469 = vmatmul.mubr.msk.bf16.gmra.mxu1 %vm439_vm0, %v2991_v29  ;;  %2462 = vmatmul.mubr.msk.bf16.gmra.mxu0 %vm439_vm0, %v2991_v29 }
  0x67   : > { %802 = vmatprep.mubr.bf16.mxu1 %v2831_v6  ;;  %699 = vmatprep.mubr.bf16.mxu0 %v2831_v6 }
  0x6e   : > { %2477 = vmatmul.mubr.msk.bf16.vlgmr.msra.gmra.mxu1 %vm439_vm0, %v2931_v11  ;;  %2470 = vmatmul.mubr.msk.bf16.vlgmr.msra.gmra.mxu0 %vm439_vm0, %v2931_v11 }
  0x6f   : > { %991 = vmatpush1.bf16.msra.mxu1 %v2450_v32  ;;  %812 = vmatprep.mubr.bf16.mxu1 %v2831_v6 }
  0x70   : > { %709 = vmatprep.mubr.bf16.mxu0 %v2831_v6  ;;  %888 = vmatpush1.bf16.msra.mxu0 %v2448_v35 }
  0x71   : > { %1196 = vmatprep.subr.bf16.mxu1 %v2455_v36  ;;  %1093 = vmatprep.subr.bf16.mxu0 %v2453_v37 }
  0x76   : > { %2478 = vmatmul.mubr.msk.bf16.gmra.mxu1 %vm439_vm0, %v2946_v22  ;;  %2471 = vmatmul.mubr.msk.bf16.gmra.mxu0 %vm439_vm0, %v2946_v22 }
  0x77   : > { %822 = vmatprep.mubr.bf16.mxu1 %v2831_v6  ;;  %719 = vmatprep.mubr.bf16.mxu0 %v2831_v6 }
  0x7e   : > { %2479 = vmatmul.mubr.msk.bf16.gmra.mxu1 %vm439_vm0, %v2955_v25  ;;  %2472 = vmatmul.mubr.msk.bf16.gmra.mxu0 %vm439_vm0, %v2955_v25 }
  0x7f   : > { %832 = vmatprep.mubr.bf16.mxu1 %v2831_v6  ;;  %729 = vmatprep.mubr.bf16.mxu0 %v2831_v6 }
  0x86   : > { %2480 = vmatmul.mubr.msk.bf16.gmra.mxu1 %vm439_vm0, %v2964_v26  ;;  %2473 = vmatmul.mubr.msk.bf16.gmra.mxu0 %vm439_vm0, %v2964_v26 }
  0x87   : > { %842 = vmatprep.mubr.bf16.mxu1 %v2831_v6  ;;  %739 = vmatprep.mubr.bf16.mxu0 %v2831_v6 }
  0x8e   : > { %2481 = vmatmul.mubr.msk.bf16.gmra.mxu1 %vm439_vm0, %v2973_v27  ;;  %2474 = vmatmul.mubr.msk.bf16.gmra.mxu0 %vm439_vm0, %v2973_v27 }
  0x8f   : > { %852 = vmatprep.mubr.bf16.mxu1 %v2831_v6  ;;  %749 = vmatprep.mubr.bf16.mxu0 %v2831_v6 }
  0x96   : > { %2482 = vmatmul.mubr.msk.bf16.gmra.mxu1 %vm439_vm0, %v2982_v28  ;;  %2475 = vmatmul.mubr.msk.bf16.gmra.mxu0 %vm439_vm0, %v2982_v28 }
  0x97   : > { %862 = vmatprep.mubr.bf16.mxu1 %v2831_v6  ;;  %759 = vmatprep.mubr.bf16.mxu0 %v2831_v6 }
  0x9e   : > { %2483 = vmatmul.mubr.msk.bf16.gmra.mxu1 %vm439_vm0, %v2991_v29  ;;  %2476 = vmatmul.mubr.msk.bf16.gmra.mxu0 %vm439_vm0, %v2991_v29 }
  0x9f   : > { %1008 = vmatprep.mubr.bf16.mxu1 %v2831_v6  ;;  %905 = vmatprep.mubr.bf16.mxu0 %v2831_v6 }
  0xa6   : > { %2491 = vmatmul.mubr.msk.bf16.vlgmr.msra.gmra.mxu1 %vm439_vm0, %v2931_v11  ;;  %2484 = vmatmul.mubr.msk.bf16.vlgmr.msra.gmra.mxu0 %vm439_vm0, %v2931_v11 }
  0xa7   : > { %1197 = vmatpush1.bf16.msra.mxu1 %v2454_v38  ;;  %1018 = vmatprep.mubr.bf16.mxu1 %v2831_v6 }
  0xa8   : > { %915 = vmatprep.mubr.bf16.mxu0 %v2831_v6  ;;  %1094 = vmatpush1.bf16.msra.mxu0 %v2452_v39 }
  0xae   : > { %2492 = vmatmul.mubr.msk.bf16.gmra.mxu1 %vm439_vm0, %v2946_v22  ;;  %2485 = vmatmul.mubr.msk.bf16.gmra.mxu0 %vm439_vm0, %v2946_v22 }
  0xaf   : > { %1028 = vmatprep.mubr.bf16.mxu1 %v2831_v6  ;;  %925 = vmatprep.mubr.bf16.mxu0 %v2831_v6 }
  0xb6   : > { %2493 = vmatmul.mubr.msk.bf16.gmra.mxu1 %vm439_vm0, %v2955_v25  ;;  %2486 = vmatmul.mubr.msk.bf16.gmra.mxu0 %vm439_vm0, %v2955_v25 }
  0xb7   : > { %1038 = vmatprep.mubr.bf16.mxu1 %v2831_v6  ;;  %935 = vmatprep.mubr.bf16.mxu0 %v2831_v6 }
  0xbe   : > { %2494 = vmatmul.mubr.msk.bf16.gmra.mxu1 %vm439_vm0, %v2964_v26  ;;  %2487 = vmatmul.mubr.msk.bf16.gmra.mxu0 %vm439_vm0, %v2964_v26 }
  0xbf   : > { %1048 = vmatprep.mubr.bf16.mxu1 %v2831_v6  ;;  %945 = vmatprep.mubr.bf16.mxu0 %v2831_v6 }
  0xc6   : > { %2495 = vmatmul.mubr.msk.bf16.gmra.mxu1 %vm439_vm0, %v2973_v27  ;;  %2488 = vmatmul.mubr.msk.bf16.gmra.mxu0 %vm439_vm0, %v2973_v27 }
  0xc7   : > { %1058 = vmatprep.mubr.bf16.mxu1 %v2831_v6  ;;  %955 = vmatprep.mubr.bf16.mxu0 %v2831_v6 }
  0xce   : > { %2496 = vmatmul.mubr.msk.bf16.gmra.mxu1 %vm439_vm0, %v2982_v28  ;;  %2489 = vmatmul.mubr.msk.bf16.gmra.mxu0 %vm439_vm0, %v2982_v28 }
  0xcf   : > { %1068 = vmatprep.mubr.bf16.mxu1 %v2831_v6  ;;  %965 = vmatprep.mubr.bf16.mxu0 %v2831_v6 }
  0xd6   : > { %2497 = vmatmul.mubr.msk.bf16.gmra.mxu1 %vm439_vm0, %v2991_v29  ;;  %2490 = vmatmul.mubr.msk.bf16.gmra.mxu0 %vm439_vm0, %v2991_v29 }
  0xd7   : > { %1214 = vmatprep.mubr.bf16.mxu1 %v2831_v6  ;;  %1111 = vmatprep.mubr.bf16.mxu0 %v2831_v6 }
  0xde   : > { %2505 = vmatmul.mubr.msk.bf16.vlgmr.msra.gmra.mxu1 %vm439_vm0, %v2931_v11  ;;  %2498 = vmatmul.mubr.msk.bf16.vlgmr.msra.gmra.mxu0 %vm439_vm0, %v2931_v11 }
  0xdf   : > { %1224 = vmatprep.mubr.bf16.mxu1 %v2831_v6  ;;  %1121 = vmatprep.mubr.bf16.mxu0 %v2831_v6 }
  0xe6   : > { %2506 = vmatmul.mubr.msk.bf16.gmra.mxu1 %vm439_vm0, %v2946_v22  ;;  %2499 = vmatmul.mubr.msk.bf16.gmra.mxu0 %vm439_vm0, %v2946_v22 }
  0xe7   : > { %1234 = vmatprep.mubr.bf16.mxu1 %v2831_v6  ;;  %1131 = vmatprep.mubr.bf16.mxu0 %v2831_v6 }
  0xee   : > { %2507 = vmatmul.mubr.msk.bf16.gmra.mxu1 %vm439_vm0, %v2955_v25  ;;  %2500 = vmatmul.mubr.msk.bf16.gmra.mxu0 %vm439_vm0, %v2955_v25 }
  0xef   : > { %1244 = vmatprep.mubr.bf16.mxu1 %v2831_v6  ;;  %1141 = vmatprep.mubr.bf16.mxu0 %v2831_v6 }
  0xf6   : > { %v3105_v40 = vpop.f32.mrf.mxu1  ;;  %2508 = vmatmul.mubr.msk.bf16.gmra.mxu1 %vm439_vm0, %v2964_v26  ;;  %v3109_v41 = vpop.f32.mrf.mxu0  ;;  %2501 = vmatmul.mubr.msk.bf16.gmra.mxu0 %vm439_vm0, %v2964_v26 }
  0xf7   : > { %1254 = vmatprep.mubr.bf16.mxu1 %v2831_v6  ;;  %1151 = vmatprep.mubr.bf16.mxu0 %v2831_v6 }
  0xf8   : > { %v3114_v42 = vpop.f32.mrf.mxu1  ;;  %v3117_v43 = vpop.f32.mrf.mxu0 }
  0xfa   : > { %v3119_v44 = vpop.f32.mrf.mxu1  ;;  %v3123_v46 = vpop.f32.mrf.mxu0 }
  0xfc   : > { %v3127_v48 = vpop.f32.mrf.mxu1  ;;  %v3129_v49 = vpop.f32.mrf.mxu0 }
  0xfe   : > { %v3131_v50 = vpop.f32.mrf.mxu1  ;;  %2509 = vmatmul.mubr.msk.bf16.gmra.mxu1 %vm439_vm0, %v2973_v27  ;;  %v3135_v51 = vpop.f32.mrf.mxu0  ;;  %2502 = vmatmul.mubr.msk.bf16.gmra.mxu0 %vm439_vm0, %v2973_v27 }
  0xff   : > { %1264 = vmatprep.mubr.bf16.mxu1 %v2831_v6  ;;  %1161 = vmatprep.mubr.bf16.mxu0 %v2831_v6 }
 0x100   : > { %v3140_v52 = vpop.f32.mrf.mxu1  ;;  %v3143_v53 = vpop.f32.mrf.mxu0 }
 0x102   : > { %v3145_v54 = vpop.f32.mrf.mxu1  ;;  %v3149_v56 = vpop.f32.mrf.mxu0 }
 0x104   : > { %v3153_v58 = vpop.f32.mrf.mxu1  ;;  %v3155_v59 = vpop.f32.mrf.mxu0 }
 0x106   : > { %v3157_v60 = vpop.f32.mrf.mxu1  ;;  %2510 = vmatmul.mubr.msk.bf16.gmra.mxu1 %vm439_vm0, %v2982_v28  ;;  %v3161_v61 = vpop.f32.mrf.mxu0  ;;  %2503 = vmatmul.mubr.msk.bf16.gmra.mxu0 %vm439_vm0, %v2982_v28 }
 0x107   : > { %1274 = vmatprep.mubr.bf16.mxu1 %v2831_v6  ;;  %1171 = vmatprep.mubr.bf16.mxu0 %v2831_v6 }
 0x108   : > { %v3166_v62 = vpop.f32.mrf.mxu1  ;;  %v3169_v63 = vpop.f32.mrf.mxu0 }
 0x10a   : > { %v3171_v0 = vpop.f32.mrf.mxu1  ;;  %v3175_v2 = vpop.f32.mrf.mxu0 }
 0x10c   : > { %v3179_v4 = vpop.f32.mrf.mxu1  ;;  %v3181_v5 = vpop.f32.mrf.mxu0 }
 0x10e   : > { %v3183_v7 = vpop.f32.mrf.mxu1  ;;  %2511 = vmatmul.mubr.msk.bf16.gmra.mxu1 %vm439_vm0, %v2991_v29  ;;  %v3187_v6 = vpop.f32.mrf.mxu0  ;;  %2504 = vmatmul.mubr.msk.bf16.gmra.mxu0 %vm439_vm0, %v2991_v29 }
 0x110   : > { %v3191_v8 = vpop.f32.mrf.mxu1  ;;  %v3193_v9 = vpop.f32.mrf.mxu0 }
 0x112   : > { %v3195_v10 = vpop.f32.mrf.mxu1  ;;  %v3199_v12 = vpop.f32.mrf.mxu0 }
 0x114   : > { %v3203_v14 = vpop.f32.mrf.mxu1  ;;  %v3205_v15 = vpop.f32.mrf.mxu0 }
 0x116   : > { %v3207_v16 = vpop.f32.mrf.mxu1  ;;  %v3209_v17 = vpop.f32.mrf.mxu0 }
 0x117   : > { %4008 = vst [vmem:[#allocation7_spill] sm:$0xff] %v3207_v16  ;;  %4009 = vst [vmem:[#allocation8_spill] sm:$0xff] %v3209_v17 }
 0x118   : > { %v3211_v18 = vpop.f32.mrf.mxu1  ;;  %v3213_v19 = vpop.f32.mrf.mxu0 }
 0x119   : > { %4010 = vst [vmem:[#allocation9_spill] sm:$0xff] %v3211_v18  ;;  %4011 = vst [vmem:[#allocation10_spill] sm:$0xff] %v3213_v19 }
 0x11a   : > { %v3215_v20 = vpop.f32.mrf.mxu1  ;;  %v3219_v22 = vpop.f32.mrf.mxu0 }
 0x11b   : > { %4012 = vst [vmem:[#allocation11_spill] sm:$0xff] %v3215_v20  ;;  %4013 = vst [vmem:[#allocation12_spill] sm:$0xff] %v3219_v22 }
 0x11c   : > { %v3223_v24 = vpop.f32.mrf.mxu1  ;;  %v3225_v25 = vpop.f32.mrf.mxu0 }
 0x11d   : > { %4014 = vst [vmem:[#allocation13_spill] sm:$0xff] %v3223_v24  ;;  %4015 = vst [vmem:[#allocation14_spill] sm:$0xff] %v3225_v25 }
 0x11e   : > { %v3227_v26 = vpop.f32.mrf.mxu1  ;;  %v3229_v27 = vpop.f32.mrf.mxu0 }
 0x11f   : > { %4016 = vst [vmem:[#allocation15_spill] sm:$0xff] %v3227_v26  ;;  %4017 = vst [vmem:[#allocation16_spill] sm:$0xff] %v3229_v27 }
 0x120   : > { %v3231_v28 = vpop.f32.mrf.mxu1  ;;  %v3233_v29 = vpop.f32.mrf.mxu0 }
 0x121   : > { %4018 = vst [vmem:[#allocation17_spill] sm:$0xff] %v3231_v28  ;;  %4019 = vst [vmem:[#allocation18_spill] sm:$0xff] %v3233_v29 }
 0x122   : > { %v3235_v30 = vpop.f32.mrf.mxu1  ;;  %v3239_v32 = vpop.f32.mrf.mxu0 }
 0x123   : > { %4020 = vst [vmem:[#allocation19_spill] sm:$0xff] %v3235_v30  ;;  %4021 = vst [vmem:[#allocation20_spill] sm:$0xff] %v3239_v32 }
 0x124   : > { %v3243_v34 = vpop.f32.mrf.mxu1  ;;  %v3245_v35 = vpop.f32.mrf.mxu0 }
 0x125   : > { %4022 = vst [vmem:[#allocation21_spill] sm:$0xff] %v3243_v34  ;;  %4023 = vst [vmem:[#allocation22_spill] sm:$0xff] %v3245_v35 }
 0x126   : > { %v3247_v36 = vpop.f32.mrf.mxu1  ;;  %v3249_v37 = vpop.f32.mrf.mxu0 }
 0x127   : > { %4024 = vst [vmem:[#allocation23_spill] sm:$0xff] %v3247_v36  ;;  %4025 = vst [vmem:[#allocation24_spill] sm:$0xff] %v3249_v37 }
 0x128   : > { %v3251_v38 = vpop.f32.mrf.mxu1  ;;  %v3253_v39 = vpop.f32.mrf.mxu0 }
 0x129   : > { %4026 = vst [vmem:[#allocation25_spill] sm:$0xff] %v3251_v38  ;;  %4027 = vst [vmem:[#allocation26_spill] sm:$0xff] %v3253_v39 }
 0x12a   : > { %v3255_v23 = vpop.f32.mrf.mxu1  ;;  %v3259_v31 = vpop.f32.mrf.mxu0 }
 0x12b   : > { %4028 = vst [vmem:[#allocation27_spill] sm:$0xff] %v3255_v23  ;;  %4029 = vst [vmem:[#allocation28_spill] sm:$0xff] %v3259_v31 }
 0x12c   : > { %v3263_v3 = vpop.f32.mrf.mxu1  ;;  %v3265_v13 = vpop.f32.mrf.mxu0 }
 0x12d   : > { %4030 = vst [vmem:[#allocation29_spill] sm:$0xff] %v3263_v3  ;;  %4031 = vst [vmem:[#allocation30_spill] sm:$0xff] %v3265_v13 }
 0x12e   : > { %v804_v1 = vpop.f32.mrf.mxu1  ;;  %v701_v11 = vpop.f32.mrf.mxu0 }
 0x130   : > { %v806_v47 = vpop.f32.mrf.mxu1  ;;  %v703_v57 = vpop.f32.mrf.mxu0 }
 0x132   : > { %v808_v45 = vpop.f32.mrf.mxu1  ;;  %v705_v55 = vpop.f32.mrf.mxu0 }
 0x133   : > { %v1327_v20 = vpack.c.bf16 %v808_v45, %v804_v1  ;;  %v1307_v45 = vpack.c.bf16 %v3153_v58, %v3140_v52  ;;  %v4034_v58 = vpack.c.bf16 %v3145_v54, %v3131_v50 }
 0x134   : > { %v810_v39 = vpop.f32.mrf.mxu1  ;;  %v707_v38 = vpop.f32.mrf.mxu0 }
 0x135   : > { %v1334_v31 = vpack.c.bf16 %v810_v39, %v806_v47 }
 0x136   : > { %v814_v17 = vpop.f32.mrf.mxu1  ;;  %v711_v22 = vpop.f32.mrf.mxu0 }
 0x138   : > { %v816_v21 = vpop.f32.mrf.mxu1  ;;  %v713_v36 = vpop.f32.mrf.mxu0 }
 0x13a   : > { %v818_v23 = vpop.f32.mrf.mxu1  ;;  %v715_v27 = vpop.f32.mrf.mxu0 }
 0x13b   : > { %v1328_v13 = vpack.c.bf16 %v818_v23, %v814_v17  ;;  %v1314_v17 = vpack.c.bf16 %v715_v27, %v711_v22  ;;  %v1306_v22 = vpack.c.bf16 %v3127_v48, %v3114_v42 }
 0x13c   : > { %v820_v32 = vpop.f32.mrf.mxu1  ;;  %v717_v37 = vpop.f32.mrf.mxu0 }
 0x13d   : > { %v1335_v33 = vpack.c.bf16 %v820_v32, %v816_v21  ;;  %v1321_v29 = vpack.c.bf16 %v717_v37, %v713_v36  ;;  %v1320_v32 = vpack.c.bf16 %v707_v38, %v703_v57  ;;  %v3274_v57 = vld [vmem:[%s2912_s30 + $0x4] ss:$8 sps:$4 sm:$0xff]  }
 0x13e   : > { %v824_v3 = vpop.f32.mrf.mxu1  ;;  %v3267_v25 = vpop.f32.mrf.mxu0  ;;  %4032 = vst [vmem:[#allocation31_spill] sm:$0xff] %v3274_v57  ;;  %1499 = vmatprep.mubr.bf16.mxu0 %v3274_v57  ;;  %1602 = vmatprep.mubr.bf16.mxu1 %v3274_v57 }
 0x13f   : > { %1467 = vmatprep.subr.bf16.mxu0 %v1335_v33 }
 0x140   : > { %v826_v19 = vpop.f32.mrf.mxu1  ;;  %1468 = vmatpush1.bf16.msra.mxu0 %v1334_v31  ;;  %v723_v16 = vpop.f32.mrf.mxu0 }
 0x141   : > { %1469 = vmatprep.subr.bf16.mxu0 %v1328_v13  ;;  %v1313_v13 = vpack.c.bf16 %v705_v55, %v701_v11 }
 0x142   : > { %v828_v35 = vpop.f32.mrf.mxu1  ;;  %v3269_v26 = vpop.f32.mrf.mxu0 }
 0x143   : > { %v1329_v42 = vpack.c.bf16 %v828_v35, %v824_v3  ;;  %v4037_v3 = vpack.c.bf16 %v3119_v44, %v3105_v40  ;;  %v4040_v40 = vpack.c.bf16 %v3149_v56, %v3135_v51 }
 0x144   : > { %v830_v30 = vpop.f32.mrf.mxu1  ;;  %1470 = vmatpush1.bf16.msra.mxu0 %v1327_v20  ;;  %v727_v21 = vpop.f32.mrf.mxu0 }
 0x145   : > { %1471 = vmatprep.subr.bf16.mxu0 %v1321_v29  ;;  %v1336_v27 = vpack.c.bf16 %v830_v30, %v826_v19  ;;  %v1293_v19 = vpack.c.bf16 %v3155_v59, %v3143_v53  ;;  %v1292_v53 = vpack.c.bf16 %v3129_v49, %v3117_v43  ;;  %v1322_v59 = vpack.c.bf16 %v727_v21, %v723_v16 }
 0x146   : > { %v834_v47 = vpop.f32.mrf.mxu1  ;;  %v731_v23 = vpop.f32.mrf.mxu0  ;;  %v1315_v43 = vpack.c.bf16 %v3269_v26, %v3267_v25  ;;  %v1309_v16 = vpack.c.bf16 %v3203_v14, %v3191_v8  ;;  %v1308_v8 = vpack.c.bf16 %v3179_v4, %v3166_v62 }
 0x148   : > { %v836_v33 = vpop.f32.mrf.mxu1  ;;  %1472 = vmatpush1.bf16.msra.mxu0 %v1320_v32  ;;  %v733_v31 = vpop.f32.mrf.mxu0 }
 0x149   : > { %1473 = vmatprep.subr.bf16.mxu0 %v1314_v17 }
 0x14a   : > { %v838_v39 = vpop.f32.mrf.mxu1  ;;  %v735_v1 = vpop.f32.mrf.mxu0 }
 0x14b   : > { %v1330_v38 = vpack.c.bf16 %v838_v39, %v834_v47  ;;  %v4042_v39 = vpack.c.bf16 %v3123_v46, %v3109_v41 }
 0x14c   : > { %v840_v36 = vpop.f32.mrf.mxu1  ;;  %1474 = vmatpush1.bf16.msra.mxu0 %v1313_v13  ;;  %v737_v29 = vpop.f32.mrf.mxu0 }
 0x14d   : > { %v1337_v20 = vpack.c.bf16 %v840_v36, %v836_v33  ;;  %1475 = vmatprep.subr.bf16.mxu0 %v1307_v45  ;;  %v1323_v30 = vpack.c.bf16 %v737_v29, %v733_v31  ;;  %v1316_v33 = vpack.c.bf16 %v735_v1, %v731_v23  ;;  %v4046_v1 = vpack.c.bf16 %v3195_v10, %v3183_v7 }
 0x14e   : > { %v3278_v37 = vpop.f32.mrf.mxu1  ;;  %v3280_v55 = vpop.f32.mrf.mxu0  ;;  %v1295_v36 = vpack.c.bf16 %v3205_v15, %v3193_v9  ;;  %v4051_v7 = vpack.c.bf16 %v3171_v0, %v3157_v60  ;;  %v1294_v9 = vpack.c.bf16 %v3181_v5, %v3169_v63 }
 0x14f   : > { %1570 = vmatprep.subr.bf16.mxu1 %v1337_v20  ;;  %4033 = vst [vmem:[#allocation32_spill] sm:$0xff] %v3280_v55 }
 0x150   : > { %v3283_v52 = vpop.f32.mrf.mxu1  ;;  %1476 = vmatpush1.bf16.msra.mxu0 %v1306_v22  ;;  %1571 = vmatpush1.bf16.msra.mxu1 %v1336_v27  ;;  %v3288_v11 = vpop.f32.mrf.mxu0 }
 0x151   : > { %1477 = vmatprep.subr.bf16.mxu0 %v4034_v58  ;;  %1572 = vmatprep.subr.bf16.mxu1 %v1330_v38  ;;  %4035 = vst [vmem:[#allocation33_spill] sm:$0xff] %v3288_v11  ;;  %v4053_v38 = vpack.c.bf16 %v3199_v12, %v3187_v6 }
 0x152   : > { %v3290_v48 = vpop.f32.mrf.mxu1  ;;  %v3297_v47 = vpop.f32.mrf.mxu0 }
 0x153   : > { %4036 = vst [vmem:[#allocation34_spill] sm:$0xff] %v3297_v47 }
 0x154   : > { %v3301_v54 = vpop.f32.mrf.mxu1  ;;  %1478 = vmatpush1.bf16.msra.mxu0 %v4037_v3  ;;  %1573 = vmatpush1.bf16.msra.mxu1 %v1329_v42  ;;  %v3306_v35 = vpop.f32.mrf.mxu0 }
 0x155   : > { %1479 = vmatprep.subr.bf16.mxu0 %v1293_v19  ;;  %1574 = vmatprep.subr.bf16.mxu1 %v1323_v30  ;;  %4038 = vst [vmem:[#allocation35_spill] sm:$0xff] %v3306_v35  ;;  %v4054_v19 = vpack.c.bf16 %v3175_v2, %v3161_v61 }
 0x156   : > { %v3310_v17 = vpop.f32.mrf.mxu1  ;;  %v3312_v31 = vpop.f32.mrf.mxu0 }
 0x157   : > { %4039 = vst [vmem:[#allocation36_spill] sm:$0xff] %v3312_v31 }
 0x158   : > { %v3314_v13 = vpop.f32.mrf.mxu1  ;;  %1480 = vmatpush1.bf16.msra.mxu0 %v1292_v53  ;;  %1575 = vmatpush1.bf16.msra.mxu1 %v1322_v59  ;;  %v3319_v44 = vpop.f32.mrf.mxu0 }
 0x159   : > { %1481 = vmatprep.subr.bf16.mxu0 %v4040_v40  ;;  %1576 = vmatprep.subr.bf16.mxu1 %v1316_v33 }
 0x15a   : > { %v3323_v49 = vpop.f32.mrf.mxu1  ;;  %v3329_v23 = vpop.f32.mrf.mxu0 }
 0x15b   : > { %4041 = vst [vmem:[#allocation37_spill] sm:$0xff] %v3329_v23 }
 0x15c   : > { %v3333_v56 = vpop.f32.mrf.mxu1  ;;  %1482 = vmatpush1.bf16.msra.mxu0 %v4042_v39  ;;  %1577 = vmatpush1.bf16.msra.mxu1 %v1315_v43  ;;  %v3338_v25 = vpop.f32.mrf.mxu0 }
 0x15d   : > { %1578 = vmatprep.subr.bf16.mxu1 %v1309_v16 }
 0x15e   : > { %v3342_v14 = vpop.f32.mrf.mxu1  ;;  %v3344_v26 = vpop.f32.mrf.mxu0 }
 0x15f   : > { %4043 = vst [vmem:[#allocation38_spill] sm:$0xff] %v3342_v14  ;;  %4044 = vst [vmem:[#allocation39_spill] sm:$0xff] %v3344_v26 }
 0x160   : > { %v3346_v45 = vpop.f32.mrf.mxu1  ;;  %1579 = vmatpush1.bf16.msra.mxu1 %v1308_v8  ;;  %v3351_v41 = vpop.f32.mrf.mxu0 }
 0x161   : > { %4045 = vst [vmem:[#allocation40_spill] sm:$0xff] %v3346_v45  ;;  %1580 = vmatprep.subr.bf16.mxu1 %v4046_v1  ;;  %4047 = vst [vmem:[#allocation41_spill] sm:$0xff] %v3351_v41 }
 0x162   : > { %v3353_v46 = vpop.f32.mrf.mxu1  ;;  %v3359_v4 = vpop.f32.mrf.mxu0 }
 0x163   : > { %4048 = vst [vmem:[#allocation42_spill] sm:$0xff] %v3353_v46  ;;  %4049 = vst [vmem:[#allocation43_spill] sm:$0xff] %v3359_v4 }
 0x164   : > { %v3363_v29 = vpop.f32.mrf.mxu1  ;;  %1581 = vmatpush1.bf16.msra.mxu1 %v4051_v7  ;;  %v3368_v10 = vpop.f32.mrf.mxu0 }
 0x165   : > { %4050 = vst [vmem:[#allocation44_spill] sm:$0xff] %v3363_v29  ;;  %1582 = vmatprep.subr.bf16.mxu1 %v1295_v36  ;;  %4052 = vst [vmem:[#allocation45_spill] sm:$0xff] %v3368_v10 }
 0x166   : > { %v3372_v15 = vpop.f32.mrf.mxu1  ;;  %v3374_v22 = vpop.f32.mrf.mxu0 }
 0x168   : > { %v3376_v27 = vpop.f32.mrf.mxu1  ;;  %1583 = vmatpush1.bf16.msra.mxu1 %v1294_v9  ;;  %v3381_v58 = vpop.f32.mrf.mxu0 }
 0x169   : > { %1584 = vmatprep.subr.bf16.mxu1 %v4053_v38 }
 0x16a   : > { %v3383_v60 = vpop.f32.mrf.mxu1  ;;  %v3387_v42 = vpop.f32.mrf.mxu0 }
 0x16c   : > { %v3391_v5 = vpop.f32.mrf.mxu1  ;;  %1585 = vmatpush1.bf16.msra.mxu1 %v4054_v19  ;;  %v3398_v12 = vpop.f32.mrf.mxu0 }
 0x16e   : > { %v3402_v3 = vpop.f32.mrf.mxu1  ;;  %v3404_v53 = vpop.f32.mrf.mxu0 }
 0x170   : > { %v3406_v59 = vpop.f32.mrf.mxu1  ;;  %v3408_v33 = vpop.f32.mrf.mxu0 }
 0x172   : > { %v3410_v40 = vpop.f32.mrf.mxu1  ;;  %v3414_v2 = vpop.f32.mrf.mxu0 }
 0x174   : > { %v3418_v16 = vpop.f32.mrf.mxu1  ;;  %v3422_v8 = vpop.f32.mrf.mxu0 }
 0x176   : > { %v3426_v36 = vpop.f32.mrf.mxu1  ;;  %v3428_v7 = vpop.f32.mrf.mxu0 }
 0x177   : > { %4055 = vst [vmem:[#allocation46_spill] sm:$0xff] %v3428_v7 }
 0x178   : > { %v3430_v9 = vpop.f32.mrf.mxu1  ;;  %v3432_v38 = vpop.f32.mrf.mxu0 }
 0x179   : > { %4056 = vst [vmem:[#allocation47_spill] sm:$0xff] %v3432_v38 }
 0x17a   : > { %v3434_v19 = vpop.f32.mrf.mxu1  ;;  %v3438_v62 = vpop.f32.mrf.mxu0 }
 0x17b   : > { %4057 = vst [vmem:[#allocation48_spill] sm:$0xff] %v3438_v62 }
 0x17c   : > { %v3442_v51 = vpop.f32.mrf.mxu1  ;;  %v3446_v21 = vpop.f32.mrf.mxu0 }
 0x17d   : > { %4058 = vst [vmem:[#allocation49_spill] sm:$0xff] %v3446_v21 }
 0x17e   : > { %v3450_v43 = vpop.f32.mrf.mxu1  ;;  %v3452_v30 = vpop.f32.mrf.mxu0 }
 0x17f   : > { %4059 = vst [vmem:[#allocation50_spill] sm:$0xff] %v3452_v30 }
 0x180   : > { %v3454_v20 = vpop.f32.mrf.mxu1  ;;  %v3456_v1 = vpop.f32.mrf.mxu0 }
 0x181   : > { %4060 = vst [vmem:[#allocation51_spill] sm:$0xff] %v3456_v1 }
 0x182   : > { %v3458_v0 = vpop.f32.mrf.mxu1  ;;  %v3462_v61 = vpop.f32.mrf.mxu0 }
 0x183   : > { %4061 = vst [vmem:[#allocation52_spill] sm:$0xff] %v3462_v61 }
 0x184   : > { %v3466_v6 = vpop.f32.mrf.mxu1  ;;  %v3470_v39 = vpop.f32.mrf.mxu0 }
 0x185   : > { %4062 = vst [vmem:[#allocation53_spill] sm:$0xff] %v3470_v39 }
 0x186   : > { %v3474_v26 = vpop.f32.mrf.mxu1  ;;  %v3476_v4 = vpop.f32.mrf.mxu0 }
 0x187   : > { %4063 = vst [vmem:[#allocation54_spill] sm:$0xff] %v3474_v26  ;;  %4064 = vst [vmem:[#allocation55_spill] sm:$0xff] %v3476_v4 }
 0x188   : > { %v3478_v50 = vpop.f32.mrf.mxu1  ;;  %v3480_v10 = vpop.f32.mrf.mxu0 }
 0x189   : > { %4065 = vst [vmem:[#allocation56_spill] sm:$0xff] %v3478_v50  ;;  %4066 = vst [vmem:[#allocation57_spill] sm:$0xff] %v3480_v10 }
 0x18a   : > { %v3482_v41 = vpop.f32.mrf.mxu1  ;;  %v3486_v14 = vpop.f32.mrf.mxu0 }
 0x18b   : > { %4067 = vst [vmem:[#allocation58_spill] sm:$0xff] %v3482_v41  ;;  %4068 = vst [vmem:[#allocation59_spill] sm:$0xff] %v3486_v14 }
 0x18c   : > { %v3490_v46 = vpop.f32.mrf.mxu1  ;;  %v3494_v29 = vpop.f32.mrf.mxu0 }
 0x18d   : > { %4069 = vst [vmem:[#allocation60_spill] sm:$0xff] %v3490_v46  ;;  %4070 = vst [vmem:[#allocation61_spill] sm:$0xff] %v3494_v29 }
 0x18e   : > { %v3498_v24 = vpop.f32.mrf.mxu1  ;;  %v3500_v18 = vpop.f32.mrf.mxu0 }
 0x18f   : > { %4071 = vst [vmem:[#allocation62_spill] sm:$0xff] %v3498_v24  ;;  %4072 = vst [vmem:[#allocation63_spill] sm:$0xff] %v3500_v18 }
 0x190   : > { %v3502_v32 = vpop.f32.mrf.mxu1  ;;  %v3504_v26 = vpop.f32.mrf.mxu0 }
 0x191   : > { %4073 = vst [vmem:[#allocation64_spill] sm:$0xff] %v3502_v32  ;;  %4074 = vst [vmem:[#allocation65_spill] sm:$0xff] %v3504_v26 }
 0x192   : > { %v3506_v41 = vpop.f32.mrf.mxu1  ;;  %v3510_v4 = vpop.f32.mrf.mxu0 }
 0x193   : > { %4075 = vst [vmem:[#allocation66_spill] sm:$0xff] %v3506_v41  ;;  %4076 = vst [vmem:[#allocation67_spill] sm:$0xff] %v3510_v4 }
 0x194   : > { %v3514_v14 = vpop.f32.mrf.mxu1  ;;  %v3518_v10 = vpop.f32.mrf.mxu0 }
 0x195   : > { %4077 = vst [vmem:[#allocation68_spill] sm:$0xff] %v3514_v14  ;;  %4078 = vst [vmem:[#allocation69_spill] sm:$0xff] %v3518_v10 }
 0x196   : > { %v3522_v50 = vpop.f32.mrf.mxu1  ;;  %v3524_v46 = vpop.f32.mrf.mxu0 }
 0x197   : > { %4079 = vst [vmem:[#allocation70_spill] sm:$0xff] %v3522_v50  ;;  %4080 = vst [vmem:[#allocation71_spill] sm:$0xff] %v3524_v46 }
 0x198   : > { %v3526_v63 = vpop.f32.mrf.mxu1  ;;  %v3528_v24 = vpop.f32.mrf.mxu0 }
 0x199   : > { %4081 = vst [vmem:[#allocation72_spill] sm:$0xff] %v3526_v63  ;;  %4082 = vst [vmem:[#allocation73_spill] sm:$0xff] %v3528_v24 }
 0x19a   : > { %v3530_v41 = vpop.f32.mrf.mxu1  ;;  %v3534_v18 = vpop.f32.mrf.mxu0 }
 0x19b   : > { %4083 = vst [vmem:[#allocation74_spill] sm:$0xff] %v3530_v41  ;;  %4084 = vst [vmem:[#allocation75_spill] sm:$0xff] %v3534_v18 }
 0x19c   : > { %v3538_v4 = vpop.f32.mrf.mxu1  ;;  %v3542_v26 = vpop.f32.mrf.mxu0 }
 0x19d   : > { %4085 = vst [vmem:[#allocation76_spill] sm:$0xff] %v3538_v4  ;;  %4086 = vst [vmem:[#allocation77_spill] sm:$0xff] %v3542_v26 }
 0x19e   : > { %v1216_v32 = vpop.f32.mrf.mxu1  ;;  %v1113_v14 = vpop.f32.mrf.mxu0 }
 0x1a0   : > { %v1218_v55 = vpop.f32.mrf.mxu1  ;;  %v1115_v47 = vpop.f32.mrf.mxu0 }
 0x1a2   : > { %v1220_v57 = vpop.f32.mrf.mxu1  ;;  %v1117_v50 = vpop.f32.mrf.mxu0 }
 0x1a3   : > { %v1383_v61 = vpack.c.bf16 %v1220_v57, %v1216_v32 }
 0x1a4   : > { %v1222_v41 = vpop.f32.mrf.mxu1  ;;  %v1119_v7 = vpop.f32.mrf.mxu0 }
 0x1a5   : > { %v1390_v31 = vpack.c.bf16 %v1222_v41, %v1218_v55 }
 0x1a6   : > { %v1226_v62 = vpop.f32.mrf.mxu1  ;;  %v1123_v45 = vpop.f32.mrf.mxu0 }
 0x1a8   : > { %v1228_v46 = vpop.f32.mrf.mxu1  ;;  %v1125_v18 = vpop.f32.mrf.mxu0 }
 0x1aa   : > { %v1230_v34 = vpop.f32.mrf.mxu1  ;;  %v1127_v28 = vpop.f32.mrf.mxu0 }
 0x1ab   : > { %v1384_v10 = vpack.c.bf16 %v1230_v34, %v1226_v62  ;;  %v1370_v55 = vpack.c.bf16 %v1127_v28, %v1123_v45 }
 0x1ac   : > { %v1232_v29 = vpop.f32.mrf.mxu1  ;;  %v1129_v4 = vpop.f32.mrf.mxu0 }
 0x1ad   : > { %v1391_v63 = vpack.c.bf16 %v1232_v29, %v1228_v46  ;;  %v1377_v21 = vpack.c.bf16 %v1129_v4, %v1125_v18  ;;  %v1376_v46 = vpack.c.bf16 %v1119_v7, %v1115_v47  ;;  %v4087_v18 = vpack.c.bf16 %v3418_v16, %v3406_v59 }
 0x1ae   : > { %v1236_v23 = vpop.f32.mrf.mxu1  ;;  %v3546_v24 = vpop.f32.mrf.mxu0  ;;  %v4089_v4 = vpack.c.bf16 %v3410_v40, %v3402_v3  ;;  %v4091_v3 = vpack.c.bf16 %v3422_v8, %v3408_v33  ;;  %v4093_v33 = vpack.c.bf16 %v3414_v2, %v3404_v53  ;;  %v4095_v2 = vpack.c.bf16 %v3466_v6, %v3454_v20 }
 0x1af   : > { %1483 = vmatprep.subr.bf16.mxu0 %v1391_v63  ;;  %v1369_v63 = vpack.c.bf16 %v1117_v50, %v1113_v14  ;;  %v4088_v50 = vpack.c.bf16 %v3391_v5, %v3376_v27  ;;  %v4090_v27 = vpack.c.bf16 %v3383_v60, %v3372_v15  ;;  %v4092_v15 = vpack.c.bf16 %v3398_v12, %v3381_v58  ;;  %v3599_v58 = vld [vmem:[%s2912_s30] ss:$8 sps:$4 sm:$0xff]  }
 0x1b0   : > { %v1238_v26 = vpop.f32.mrf.mxu1  ;;  %1484 = vmatpush2.bf16.msra.mxu0 %v1390_v31  ;;  %v1135_v30 = vpop.f32.mrf.mxu0 }
 0x1b1   : > { %1485 = vmatprep.subr.bf16.mxu0 %v1384_v10 }
 0x1b2   : > { %v1240_v38 = vpop.f32.mrf.mxu1  ;;  %v1137_v35 = vpop.f32.mrf.mxu0 }
 0x1b4   : > { %v1242_v11 = vpop.f32.mrf.mxu1  ;;  %1486 = vmatpush2.bf16.msra.mxu0 %v1383_v61  ;;  %v1139_v1 = vpop.f32.mrf.mxu0 }
 0x1b5   : > { %1487 = vmatprep.subr.bf16.mxu0 %v1377_v21  ;;  %v1392_v21 = vpack.c.bf16 %v1242_v11, %v1238_v26  ;;  %v1385_v11 = vpack.c.bf16 %v1240_v38, %v1236_v23  ;;  %v1378_v23 = vpack.c.bf16 %v1139_v1, %v1135_v30  ;;  %v1371_v30 = vpack.c.bf16 %v1137_v35, %v3546_v24 }
 0x1b6   : > { %v1246_v29 = vpop.f32.mrf.mxu1  ;;  %v1143_v41 = vpop.f32.mrf.mxu0  ;;  %v1338_v24 = vpack.c.bf16 %v3301_v54, %v3283_v52  ;;  %v4098_v52 = vpack.c.bf16 %v3323_v49, %v3310_v17  ;;  %v4102_v17 = vld [vmem:[#allocation51_spill] sm:$0xff] }
 0x1b8   : > { %v1248_v34 = vpop.f32.mrf.mxu1  ;;  %1488 = vmatpush2.bf16.msra.mxu0 %v1376_v46  ;;  %v1145_v62 = vpop.f32.mrf.mxu0  ;;  %v1339_v46 = vpack.c.bf16 %v3333_v56, %v3314_v13  ;;  %v3616_v56 = vld [vmem:[%s2912_s30 + $0x14] ss:$8 sps:$4 sm:$0xff]  }
 0x1b9   : > { %1489 = vmatprep.subr.bf16.mxu0 %v1370_v55  ;;  %v1325_v55 = vpack.c.bf16 %v3338_v25, %v3319_v44 }
 0x1ba   : > { %v1250_v31 = vpop.f32.mrf.mxu1  ;;  %v1147_v10 = vpop.f32.mrf.mxu0 }
 0x1bb   : > { %v1386_v28 = vpack.c.bf16 %v1250_v31, %v1246_v29  ;;  %v1372_v7 = vpack.c.bf16 %v1147_v10, %v1143_v41  ;;  %v4094_v29 = vpack.c.bf16 %v3387_v42, %v3374_v22  ;;  %v4096_v22 = vpack.c.bf16 %v3442_v51, %v3430_v9  ;;  %v3632_v51 = vld [vmem:[%s2912_s30 + $0x10] ss:$8 sps:$4 sm:$0xff]  }
 0x1bc   : > { %v1252_v39 = vpop.f32.mrf.mxu1  ;;  %1490 = vmatpush2.bf16.msra.mxu0 %v1369_v63  ;;  %v1149_v32 = vpop.f32.mrf.mxu0  ;;  %v4097_v42 = vpack.c.bf16 %v3458_v0, %v3450_v43  ;;  %v4099_v9 = vpack.c.bf16 %v3434_v19, %v3426_v36  ;;  %v4100_v0 = vpack.c.bf16 %v3290_v48, %v3278_v37  ;;  %v4101_v43 = vld [vmem:[#allocation53_spill] sm:$0xff]  ;;  %v3646_v63 = vld [vmem:[%s2912_s30 + $0x24] ss:$8 sps:$4 sm:$0xff]   ;;  %v4110_v10 = vld [vmem:[#allocation50_spill] sm:$0xff] }
 0x1bd   : > { %v1393_v57 = vpack.c.bf16 %v1252_v39, %v1248_v34  ;;  %1491 = vmatprep.subr.bf16.mxu0 %v4087_v18  ;;  %v1379_v61 = vpack.c.bf16 %v1149_v32, %v1145_v62  ;;  %v4103_v49 = vpack.c.bf16 %v4101_v43, %v4102_v17  ;;  %v4104_v41 = vld [vmem:[#allocation33_spill] sm:$0xff]  ;;  %v4105_v34 = vld [vmem:[#allocation35_spill] sm:$0xff]  ;;  %v4109_v48 = vld [vmem:[#allocation52_spill] sm:$0xff] }
 0x1be   : > { %v3551_v47 = vpop.f32.mrf.mxu1  ;;  %v3553_v45 = vpop.f32.mrf.mxu0  ;;  %v1324_v62 = vpack.c.bf16 %v4105_v34, %v4104_v41  ;;  %v4106_v36 = vld [vmem:[#allocation49_spill] sm:$0xff]  ;;  %v4107_v19 = vld [vmem:[#allocation47_spill] sm:$0xff]  ;;  %v4113_v32 = vld [vmem:[#allocation36_spill] sm:$0xff] }
 0x1bf   : > { %1586 = vmatprep.subr.bf16.mxu1 %v1393_v57  ;;  %v4108_v31 = vpack.c.bf16 %v4106_v36, %v4107_v19  ;;  %v4111_v57 = vpack.c.bf16 %v4109_v48, %v4110_v10  ;;  %v4112_v18 = vld [vmem:[#allocation37_spill] sm:$0xff]  ;;  %v4131_v43 = vld [vmem:[#allocation22_spill] sm:$0xff]  ;;  %v4132_v41 = vld [vmem:[#allocation11_spill] sm:$0xff] }
 0x1c0   : > { %1492 = vmatpush2.bf16.msra.mxu0 %v4088_v50  ;;  %1587 = vmatpush2.bf16.msra.mxu1 %v1392_v21  ;;  %v3558_v14 = vpop.f32.mrf.mxu1  ;;  %v3563_v59 = vpop.f32.mrf.mxu0  ;;  %v4114_v21 = vpack.c.bf16 %v4112_v18, %v4113_v32  ;;  %v4115_v50 = vld [vmem:[#allocation17_spill] sm:$0xff]  ;;  %v4133_v34 = vld [vmem:[#allocation7_spill] sm:$0xff]  ;;  %v4136_v36 = vld [vmem:[#allocation38_spill] sm:$0xff] }
 0x1c1   : > { %1493 = vmatprep.subr.bf16.mxu0 %v4089_v4  ;;  %1588 = vmatprep.subr.bf16.mxu1 %v1386_v28  ;;  %v4116_v4 = vld [vmem:[#allocation21_spill] sm:$0xff]  ;;  %v3700_v32 = vld [vmem:[%s2912_s30 + $0x44] ss:$8 sps:$4 sm:$0xff]  }
 0x1c2   : > { %v3565_v26 = vpop.f32.mrf.mxu1  ;;  %v3567_v16 = vpop.f32.mrf.mxu0  ;;  %v4140_v10 = vld [vmem:[#allocation41_spill] sm:$0xff] }
 0x1c4   : > { %1494 = vmatpush2.bf16.msra.mxu0 %v4090_v27  ;;  %1589 = vmatpush2.bf16.msra.mxu1 %v1385_v11  ;;  %v3572_v5 = vpop.f32.mrf.mxu1  ;;  %v3577_v40 = vpop.f32.mrf.mxu0  ;;  %v1311_v11 = vpack.c.bf16 %v4116_v4, %v4115_v50  ;;  %v4117_v27 = vld [vmem:[#allocation48_spill] sm:$0xff] }
 0x1c5   : > { %1495 = vmatprep.subr.bf16.mxu0 %v4091_v3  ;;  %1590 = vmatprep.subr.bf16.mxu1 %v1379_v61  ;;  %v3662_v61 = vld [vmem:[%s2912_s30 + $0x20] ss:$8 sps:$4 sm:$0xff]   ;;  %v4118_v3 = vld [vmem:[#allocation46_spill] sm:$0xff] }
 0x1c6   : > { %v3579_v39 = vpop.f32.mrf.mxu1  ;;  %v3581_v38 = vpop.f32.mrf.mxu0  ;;  %v4143_v50 = vld [vmem:[#allocation16_spill] sm:$0xff] }
 0x1c7   : > { %v3712_v4 = vld [vmem:[%s2912_s30 + $0x40] ss:$8 sps:$4 sm:$0xff]  }
 0x1c8   : > { %1496 = vmatpush2.bf16.msra.mxu0 %v4092_v15  ;;  %1591 = vmatpush2.bf16.msra.mxu1 %v1378_v23  ;;  %v3586_v60 = vpop.f32.mrf.mxu1  ;;  %v3591_v8 = vpop.f32.mrf.mxu0  ;;  %v4119_v23 = vpack.c.bf16 %v4117_v27, %v4118_v3  ;;  %v4121_v15 = vld [vmem:[#allocation32_spill] sm:$0xff] }
 0x1c9   : > { %1497 = vmatprep.subr.bf16.mxu0 %v4093_v33  ;;  %1592 = vmatprep.subr.bf16.mxu1 %v1372_v7  ;;  %v4120_v7 = vld [vmem:[#allocation34_spill] sm:$0xff]  ;;  %v4146_v27 = vld [vmem:[#allocation8_spill] sm:$0xff] }
 0x1ca   : > { %v3594_v1 = vpop.f32.mrf.mxu1  ;;  %v3601_v12 = vpop.f32.mrf.mxu0  ;;  %v4122_v33 = vpack.c.bf16 %v4120_v7, %v4121_v15  ;;  %v4149_v7 = vld [vmem:[#allocation39_spill] sm:$0xff] }
 0x1cc   : > { %1498 = vmatpush2.bf16.msra.mxu0 %v4094_v29  ;;  %1593 = vmatpush2.bf16.msra.mxu1 %v1371_v30  ;;  %v3606_v53 = vpop.f32.mrf.mxu1  ;;  %v3613_v13 = vpop.f32.mrf.mxu0  ;;  %v4124_v29 = vld [vmem:[#allocation13_spill] sm:$0xff] }
 0x1cd   : > { %1594 = vmatprep.subr.bf16.mxu1 %v4095_v2  ;;  %1673 = vmatprep.subr.bf16.mxu0 %v1339_v46  ;;  %v4123_v46 = vld [vmem:[#allocation9_spill] sm:$0xff] }
 0x1ce   : > { %v1276_v35 = vpop.f32.mrf.mxu1  ;;  %v1173_v6 = vpop.f32.mrf.mxu0  ;;  %v1310_v2 = vpack.c.bf16 %v4124_v29, %v4123_v46  ;;  %v4154_v29 = vld [vmem:[#allocation25_spill] sm:$0xff] }
 0x1cf   : > { %1500 = vmatmul.mubr.bf16.vlgmr.msra.gmra.mxu0 %v3599_v58 }
 0x1d0   : > { %1595 = vmatpush2.bf16.msra.mxu1 %v4096_v22  ;;  %1674 = vmatpush1.bf16.msra.mxu0 %v1338_v24  ;;  %v1278_v20 = vpop.f32.mrf.mxu1  ;;  %v1175_v25 = vpop.f32.mrf.mxu0  ;;  %v4125_v24 = vld [vmem:[#allocation40_spill] sm:$0xff] }
 0x1d1   : > { %1596 = vmatprep.subr.bf16.mxu1 %v4097_v42  ;;  %1675 = vmatprep.subr.bf16.mxu0 %v4098_v52  ;;  %v4126_v22 = vld [vmem:[#allocation44_spill] sm:$0xff]  ;;  %v3675_v52 = vld [vmem:[%s2912_s30 + $0x34] ss:$8 sps:$4 sm:$0xff]  }
 0x1d2   : > { %v1280_v54 = vpop.f32.mrf.mxu1  ;;  %1509 = vmatprep.mubr.bf16.mxu0 %v3616_v56  ;;  %v1177_v28 = vpop.f32.mrf.mxu0 }
 0x1d3   : > { %v1389_v30 = vpack.c.bf16 %v1280_v54, %v1276_v35  ;;  %v4127_v35 = vld [vmem:[#allocation19_spill] sm:$0xff] }
 0x1d4   : > { %1597 = vmatpush2.bf16.msra.mxu1 %v4099_v9  ;;  %1676 = vmatpush1.bf16.msra.mxu0 %v4100_v0  ;;  %v1282_v44 = vpop.f32.mrf.mxu1  ;;  %v1179_v42 = vpop.f32.mrf.mxu0  ;;  %v4128_v54 = vld [vmem:[#allocation15_spill] sm:$0xff]  ;;  %v4130_v0 = vld [vmem:[#allocation18_spill] sm:$0xff] }
 0x1d5   : > { %1598 = vmatprep.subr.bf16.mxu1 %v4103_v49  ;;  %1677 = vmatprep.subr.bf16.mxu0 %v1325_v55  ;;  %v1396_v37 = vpack.c.bf16 %v1282_v44, %v1278_v20  ;;  %v1340_v20 = vpack.c.bf16 %v4126_v22, %v4125_v24  ;;  %v4129_v55 = vpack.c.bf16 %v4127_v35, %v4128_v54  ;;  %v3687_v49 = vld [vmem:[%s2912_s30 + $0x30] ss:$8 sps:$4 sm:$0xff]   ;;  %v4160_v54 = vld [vmem:[#allocation23_spill] sm:$0xff] }
 0x1d6   : > { %v1382_v9 = vpack.c.bf16 %v1179_v42, %v1175_v25  ;;  %v1297_v17 = vpack.c.bf16 %v4131_v43, %v4130_v0  ;;  %v4135_v44 = vld [vmem:[#allocation42_spill] sm:$0xff]  ;;  %v1388_v22 = vpack.c.bf16 %v3594_v1, %v3579_v39  ;;  %v4159_v1 = vld [vmem:[#allocation27_spill] sm:$0xff]  ;;  %v4163_v0 = vld [vmem:[#allocation73_spill] sm:$0xff] }
 0x1d7   : > { %1510 = vmatmul.mubr.bf16.gmra.mxu0 %v3632_v51  ;;  %v4137_v19 = vpack.c.bf16 %v4135_v44, %v4136_v36  ;;  %v4138_v25 = vld [vmem:[#allocation10_spill] sm:$0xff]  ;;  %v1373_v36 = vpack.c.bf16 %v3567_v16, %v3553_v45 }
 0x1d8   : > { %1599 = vmatpush2.bf16.msra.mxu1 %v4108_v31  ;;  %1678 = vmatpush1.bf16.msra.mxu0 %v1324_v62  ;;  %v4134_v62 = vpack.c.bf16 %v4132_v41, %v4133_v34  ;;  %v1375_v31 = vpack.c.bf16 %v1177_v28, %v1173_v6  ;;  %v1395_v28 = vpack.c.bf16 %v3606_v53, %v3586_v60  ;;  %v3728_v53 = vld [vmem:[%s2912_s30 + $0x54] ss:$8 sps:$4 sm:$0xff]   ;;  %v2772_v39 = vld [vmem:[%s2912_s30 + $0x50] ss:$8 sps:$4 sm:$0xff]   ;;  %v2773_v34 = vld [vmem:[%s2912_s30 + $0x64] ss:$8 sps:$4 sm:$0xff]  }
 0x1d9   : > { %1600 = vmatprep.subr.bf16.mxu1 %v4111_v57  ;;  %1679 = vmatprep.subr.bf16.mxu0 %v4114_v21  ;;  %v4141_v57 = vld [vmem:[#allocation45_spill] sm:$0xff]  ;;  %v4142_v21 = vld [vmem:[#allocation20_spill] sm:$0xff]  ;;  %v1394_v60 = vpack.c.bf16 %v3572_v5, %v3558_v14  ;;  %v4157_v42 = vld [vmem:[#allocation70_spill] sm:$0xff]  ;;  %v1387_v14 = vpack.c.bf16 %v3565_v26, %v3551_v47  ;;  %v1381_v5 = vpack.c.bf16 %v3613_v13, %v3591_v8 }
 0x1da   : > { %1519 = vmatprep.mubr.bf16.mxu0 %v3646_v63  ;;  %v1326_v18 = vpack.c.bf16 %v4141_v57, %v4140_v10  ;;  %v4144_v6 = vpack.c.bf16 %v4142_v21, %v4143_v50  ;;  %v4165_v47 = vld [vmem:[#allocation26_spill] sm:$0xff]  ;;  %v1380_v41 = vpack.c.bf16 %v3577_v40, %v3563_v59  ;;  %v1374_v8 = vpack.c.bf16 %v3601_v12, %v3581_v38  ;;  %v4167_v13 = vld [vmem:[#allocation75_spill] sm:$0xff]  ;;  %v4170_v40 = vld [vmem:[#allocation28_spill] sm:$0xff] }
 0x1db   : > { %v4166_v26 = vld [vmem:[#allocation30_spill] sm:$0xff]  ;;  %v2775_v59 = vld [vmem:[%s2912_s30 + $0x60] ss:$8 sps:$4 sm:$0xff]  }
 0x1dc   : > { %1601 = vmatpush2.bf16.msra.mxu1 %v4119_v23  ;;  %1680 = vmatpush1.bf16.msra.mxu0 %v4122_v33  ;;  %v4148_v23 = vld [vmem:[#allocation43_spill] sm:$0xff]  ;;  %v4151_v33 = vld [vmem:[#allocation76_spill] sm:$0xff]  ;;  %v4179_v45 = vld [vmem:[#allocation66_spill] sm:$0xff] }
 0x1dd   : > { %1681 = vmatprep.subr.bf16.mxu0 %v1311_v11  ;;  %2642 = vmatprep.subr.bf16.mxu1 %v1396_v37  ;;  %v4139_v37 = vld [vmem:[#allocation14_spill] sm:$0xff]  ;;  %v4145_v11 = vld [vmem:[#allocation12_spill] sm:$0xff]  ;;  %v4150_v15 = vpack.c.bf16 %v4148_v23, %v4149_v7  ;;  %v4190_v23 = vld [vmem:[#allocation57_spill] sm:$0xff] }
 0x1de   : > { %v1296_v48 = vpack.c.bf16 %v4139_v37, %v4138_v25  ;;  %v4147_v3 = vpack.c.bf16 %v4145_v11, %v4146_v27  ;;  %v4171_v38 = vld [vmem:[#allocation24_spill] sm:$0xff]  ;;  %v4180_v16 = vld [vmem:[#allocation62_spill] sm:$0xff]  ;;  %v4187_v11 = vld [vmem:[#allocation65_spill] sm:$0xff] }
 0x1df   : > { %1603 = vmatmul.mubr.bf16.vlgmr.msra.gmra.mxu1 %v3599_v58  ;;  %1520 = vmatmul.mubr.bf16.gmra.mxu0 %v3662_v61  ;;  %v4172_v12 = vpack.c.bf16 %v4170_v40, %v4171_v38  ;;  %v4176_v37 = vld [vmem:[#allocation60_spill] sm:$0xff]  ;;  %v4181_v57 = vpack.c.bf16 %v4179_v45, %v4180_v16  ;;  %v4183_v21 = vld [vmem:[#allocation58_spill] sm:$0xff] }
 0x1e0   : > { %1682 = vmatpush1.bf16.msra.mxu0 %v1310_v2  ;;  %2643 = vmatpush3.bf16.msra.mxu1 %v1340_v20  ;;  %v4155_v2 = vld [vmem:[#allocation29_spill] sm:$0xff]  ;;  %v4156_v20 = vld [vmem:[#allocation74_spill] sm:$0xff] }
 0x1e1   : > { %1683 = vmatprep.subr.bf16.mxu0 %v4129_v55  ;;  %2644 = vmatprep.subr.bf16.mxu1 %v1389_v30  ;;  %v4152_v30 = vld [vmem:[#allocation72_spill] sm:$0xff]  ;;  %v1312_v24 = vpack.c.bf16 %v4155_v2, %v4154_v29  ;;  %v4158_v35 = vpack.c.bf16 %v4156_v20, %v4157_v42  ;;  %v4161_v55 = vpack.c.bf16 %v4159_v1, %v4160_v54  ;;  %v4184_v50 = vld [vmem:[#allocation54_spill] sm:$0xff]  ;;  %v4196_v29 = vld [vmem:[#allocation55_spill] sm:$0xff] }
 0x1e2   : > { %1612 = vmatprep.mubr.bf16.mxu1 %v3616_v56  ;;  %1529 = vmatprep.mubr.bf16.mxu0 %v3675_v52  ;;  %v4153_v46 = vpack.c.bf16 %v4151_v33, %v4152_v30  ;;  %v4193_v33 = vld [vmem:[#allocation63_spill] sm:$0xff] }
 0x1e4   : > { %1684 = vmatpush1.bf16.msra.mxu0 %v4134_v62  ;;  %2645 = vmatpush3.bf16.msra.mxu1 %v4137_v19  ;;  %v4168_v62 = vld [vmem:[#allocation71_spill] sm:$0xff]  ;;  %v4173_v19 = vld [vmem:[#allocation68_spill] sm:$0xff] }
 0x1e5   : > { %1685 = vmatprep.subr.bf16.mxu0 %v1297_v17  ;;  %2646 = vmatprep.subr.bf16.mxu1 %v1382_v9  ;;  %v4162_v9 = vld [vmem:[#allocation77_spill] sm:$0xff]  ;;  %v1298_v17 = vpack.c.bf16 %v4166_v26, %v4165_v47  ;;  %v4169_v44 = vpack.c.bf16 %v4167_v13, %v4168_v62 }
 0x1e6   : > { %v4164_v43 = vpack.c.bf16 %v4162_v9, %v4163_v0 }
 0x1e7   : > { %1613 = vmatmul.mubr.bf16.gmra.mxu1 %v3632_v51  ;;  %1530 = vmatmul.mubr.bf16.gmra.mxu0 %v3687_v49 }
 0x1e8   : > { %1686 = vmatpush1.bf16.msra.mxu0 %v1296_v48  ;;  %2647 = vmatpush3.bf16.msra.mxu1 %v1326_v18  ;;  %v4177_v48 = vld [vmem:[#allocation56_spill] sm:$0xff]  ;;  %v4182_v18 = vld [vmem:[#allocation31_spill] sm:$0xff] }
 0x1e9   : > { %1687 = vmatprep.subr.bf16.mxu0 %v4144_v6  ;;  %2648 = vmatprep.subr.bf16.mxu1 %v1375_v31  ;;  %v4174_v31 = vld [vmem:[#allocation64_spill] sm:$0xff]  ;;  %v4178_v10 = vpack.c.bf16 %v4176_v37, %v4177_v48  ;;  %v4185_v6 = vpack.c.bf16 %v4183_v21, %v4184_v50 }
 0x1ea   : > { %1622 = vmatprep.mubr.bf16.mxu1 %v3646_v63  ;;  %1539 = vmatprep.mubr.bf16.mxu0 %v3700_v32  ;;  %v4175_v25 = vpack.c.bf16 %v4173_v19, %v4174_v31 }
 0x1ec   : > { %1688 = vmatpush1.bf16.msra.mxu0 %v4147_v3  ;;  %2649 = vmatpush3.bf16.msra.mxu1 %v4150_v15  ;;  %v4189_v3 = vld [vmem:[#allocation61_spill] sm:$0xff]  ;;  %v4192_v15 = vld [vmem:[#allocation67_spill] sm:$0xff] }
 0x1ed   : > { %1689 = vmatprep.subr.bf16.mxu0 %v1395_v28  ;;  %2650 = vmatprep.subr.bf16.mxu1 %v4153_v46  ;;  %v4186_v28 = vld [vmem:[#allocation69_spill] sm:$0xff]  ;;  %v4191_v7 = vpack.c.bf16 %v4189_v3, %v4190_v23  ;;  %v4194_v30 = vpack.c.bf16 %v4192_v15, %v4193_v33  ;;  %v4195_v46 = vld [vmem:[#allocation59_spill] sm:$0xff] }
 0x1ee   : > { %v4188_v27 = vpack.c.bf16 %v4186_v28, %v4187_v11  ;;  %v4197_v2 = vpack.c.bf16 %v4195_v46, %v4196_v29 }
 0x1ef   : > { %1623 = vmatmul.mubr.bf16.gmra.mxu1 %v3662_v61  ;;  %1540 = vmatmul.mubr.bf16.gmra.mxu0 %v3712_v4 }
 0x1f0   : > { %1690 = vmatpush2.bf16.msra.mxu0 %v1394_v60  ;;  %2651 = vmatpush3.bf16.msra.mxu1 %v1312_v24 }
 0x1f1   : > { %1691 = vmatprep.subr.bf16.mxu0 %v1388_v22  ;;  %2652 = vmatprep.subr.bf16.mxu1 %v4158_v35 }
 0x1f2   : > { %1632 = vmatprep.mubr.bf16.mxu1 %v3675_v52  ;;  %1549 = vmatprep.mubr.bf16.mxu0 %v3728_v53 }
 0x1f4   : > { %1692 = vmatpush2.bf16.msra.mxu0 %v1387_v14  ;;  %2653 = vmatpush3.bf16.msra.mxu1 %v4161_v55 }
 0x1f5   : > { %1693 = vmatprep.subr.bf16.mxu0 %v1381_v5  ;;  %2654 = vmatprep.subr.bf16.mxu1 %v4164_v43 }
 0x1f7   : > { %1633 = vmatmul.mubr.bf16.gmra.mxu1 %v3687_v49  ;;  %1550 = vmatmul.mubr.bf16.gmra.mxu0 %v2772_v39 }
 0x1f8   : > { %1694 = vmatpush2.bf16.msra.mxu0 %v1380_v41  ;;  %2655 = vmatpush3.bf16.msra.mxu1 %v1298_v17 }
 0x1f9   : > { %1695 = vmatprep.subr.bf16.mxu0 %v1374_v8  ;;  %2656 = vmatprep.subr.bf16.mxu1 %v4169_v44 }
 0x1fa   : > { %1642 = vmatprep.mubr.bf16.mxu1 %v3700_v32  ;;  %1559 = vmatprep.mubr.bf16.mxu0 %v2773_v34 }
 0x1fc   : > { %1696 = vmatpush2.bf16.msra.mxu0 %v1373_v36  ;;  %2657 = vmatpush3.bf16.msra.mxu1 %v4172_v12 }
 0x1fd   : > { %1697 = vmatprep.subr.bf16.mxu0 %v4175_v25 }
 0x1ff   : > { %1643 = vmatmul.mubr.bf16.gmra.mxu1 %v3712_v4  ;;  %1560 = vmatmul.mubr.bf16.gmra.mxu0 %v2775_v59 }
 0x200   : > { %1698 = vmatpush2.bf16.msra.mxu0 %v4178_v10  ;;  %1652 = vmatprep.mubr.bf16.mxu1 %v3728_v53 }
 0x201   : > { %1699 = vmatprep.subr.bf16.mxu0 %v4181_v57  ;;  %1705 = vmatprep.mubr.bf16.mxu0 %v4182_v18 }
 0x204   : > { %1700 = vmatpush2.bf16.msra.mxu0 %v4185_v6 }
 0x205   : > { %1701 = vmatprep.subr.bf16.mxu0 %v4188_v27 }
 0x207   : > { %1653 = vmatmul.mubr.bf16.gmra.mxu1 %v2772_v39 }
 0x208   : > { %1702 = vmatpush2.bf16.msra.mxu0 %v4191_v7  ;;  %1662 = vmatprep.mubr.bf16.mxu1 %v2773_v34 }
 0x209   : > { %1703 = vmatprep.subr.bf16.mxu0 %v4194_v30 }
 0x20c   : > { %1704 = vmatpush2.bf16.msra.mxu0 %v4197_v2 }
 0x20f   : > { %1663 = vmatmul.mubr.bf16.gmra.mxu1 %v2775_v59  ;;  %1706 = vmatmul.mubr.bf16.vlgmr.msra.gmra.mxu0 %v3599_v58 }
 0x210   : > { %1808 = vmatprep.mubr.bf16.mxu1 %v4182_v18  ;;  %1715 = vmatprep.mubr.bf16.mxu0 %v3616_v56 }
 0x217   : > { %1809 = vmatmul.mubr.bf16.vlgmr.msra.gmra.mxu1 %v3599_v58  ;;  %1716 = vmatmul.mubr.bf16.gmra.mxu0 %v3632_v51 }
 0x218   : > { %1816 = vmatprep.mubr.bf16.mxu1 %v3616_v56  ;;  %1725 = vmatprep.mubr.bf16.mxu0 %v3646_v63 }
 0x21f   : > { %1817 = vmatmul.mubr.bf16.gmra.mxu1 %v3632_v51  ;;  %1726 = vmatmul.mubr.bf16.gmra.mxu0 %v3662_v61 }
 0x220   : > { %1824 = vmatprep.mubr.bf16.mxu1 %v3646_v63  ;;  %1735 = vmatprep.mubr.bf16.mxu0 %v3675_v52 }
 0x227   : > { %1825 = vmatmul.mubr.bf16.gmra.mxu1 %v3662_v61  ;;  %1736 = vmatmul.mubr.bf16.gmra.mxu0 %v3687_v49 }
 0x228   : > { %1832 = vmatprep.mubr.bf16.mxu1 %v3675_v52  ;;  %1745 = vmatprep.mubr.bf16.mxu0 %v3700_v32 }
 0x22f   : > { %1833 = vmatmul.mubr.bf16.gmra.mxu1 %v3687_v49  ;;  %1746 = vmatmul.mubr.bf16.gmra.mxu0 %v3712_v4 }
 0x230   : > { %1840 = vmatprep.mubr.bf16.mxu1 %v3700_v32  ;;  %1755 = vmatprep.mubr.bf16.mxu0 %v3728_v53 }
 0x237   : > { %1841 = vmatmul.mubr.bf16.gmra.mxu1 %v3712_v4  ;;  %1756 = vmatmul.mubr.bf16.gmra.mxu0 %v2772_v39 }
 0x238   : > { %1848 = vmatprep.mubr.bf16.mxu1 %v3728_v53  ;;  %1765 = vmatprep.mubr.bf16.mxu0 %v2773_v34 }
 0x23f   : > { %1849 = vmatmul.mubr.bf16.gmra.mxu1 %v2772_v39  ;;  %1766 = vmatmul.mubr.bf16.gmra.mxu0 %v2775_v59 }
 0x240   : > { %1856 = vmatprep.mubr.bf16.mxu1 %v2773_v34 }
 0x247   : > { %1857 = vmatmul.mubr.bf16.gmra.mxu1 %v2775_v59 }
 0x28f   : > { %v1501_v58 = vpop.f32.mrf.mxu0 }
 0x291   : > { %v1503_v56 = vpop.f32.mrf.mxu0 }
 0x292   : > { %v2586_v51 = vpack.c.bf16 %v1503_v56, %v1501_v58 }
 0x293   : > { %v1505_v63 = vpop.f32.mrf.mxu0 }
 0x294   : > { %2173 = vst [vmem:[%s2917_s9] sm:$0xff] %v2586_v51 }
 0x295   : > { %v1507_v61 = vpop.f32.mrf.mxu0 }
 0x296   : > { %v2590_v52 = vpack.c.bf16 %v1507_v61, %v1505_v63 }
 0x297   : > { %v1511_v49 = vpop.f32.mrf.mxu0 }
 0x298   : > { %2177 = vst [vmem:[%s2917_s9 + $0x1c] sm:$0xff] %v2590_v52 }
 0x299   : > { %v1513_v32 = vpop.f32.mrf.mxu0 }
 0x29a   : > { %v2594_v4 = vpack.c.bf16 %v1513_v32, %v1511_v49 }
 0x29b   : > { %v1515_v24 = vpop.f32.mrf.mxu0 }
 0x29c   : > { %2181 = vst [vmem:[%s2917_s9 + $0x38] sm:$0xff] %v2594_v4 }
 0x29d   : > { %v1517_v60 = vpop.f32.mrf.mxu0 }
 0x29e   : > { %v2598_v53 = vpack.c.bf16 %v1517_v60, %v1515_v24 }
 0x29f   : > { %v1604_v22 = vpop.f32.mrf.mxu1  ;;  %v1521_v20 = vpop.f32.mrf.mxu0 }
 0x2a0   : > { %2185 = vst [vmem:[%s2917_s9 + $0x54] sm:$0xff] %v2598_v53 }
 0x2a1   : > { %v1606_v42 = vpop.f32.mrf.mxu1  ;;  %v1523_v35 = vpop.f32.mrf.mxu0 }
 0x2a2   : > { %v2587_v14 = vpack.c.bf16 %v1606_v42, %v1604_v22  ;;  %v2602_v5 = vpack.c.bf16 %v1523_v35, %v1521_v20 }
 0x2a3   : > { %v1608_v39 = vpop.f32.mrf.mxu1  ;;  %v1525_v1 = vpop.f32.mrf.mxu0 }
 0x2a4   : > { %2174 = vst [vmem:[%s2917_s9 + $0x8] sm:$0xff] %v2587_v14  ;;  %2189 = vst [vmem:[%s2917_s9 + $0x70] sm:$0xff] %v2602_v5 }
 0x2a5   : > { %v1610_v54 = vpop.f32.mrf.mxu1  ;;  %v1527_v55 = vpop.f32.mrf.mxu0 }
 0x2a6   : > { %v2591_v9 = vpack.c.bf16 %v1610_v54, %v1608_v39  ;;  %v2606_v0 = vpack.c.bf16 %v1527_v55, %v1525_v1 }
 0x2a7   : > { %v1614_v43 = vpop.f32.mrf.mxu1  ;;  %v1531_v47 = vpop.f32.mrf.mxu0 }
 0x2a8   : > { %2178 = vst [vmem:[%s2917_s9 + $0x24] sm:$0xff] %v2591_v9  ;;  %2193 = vst [vmem:[%s2917_s9 + $0x8c] sm:$0xff] %v2606_v0 }
 0x2a9   : > { %v1616_v26 = vpop.f32.mrf.mxu1  ;;  %v1533_v17 = vpop.f32.mrf.mxu0 }
 0x2aa   : > { %v2595_v41 = vpack.c.bf16 %v1616_v26, %v1614_v43  ;;  %v2610_v34 = vpack.c.bf16 %v1533_v17, %v1531_v47 }
 0x2ab   : > { %v1618_v8 = vpop.f32.mrf.mxu1  ;;  %v1535_v13 = vpop.f32.mrf.mxu0 }
 0x2ac   : > { %2182 = vst [vmem:[%s2917_s9 + $0x40] sm:$0xff] %v2595_v41  ;;  %2197 = vst [vmem:[%s2917_s9 + $0xa8] sm:$0xff] %v2610_v34 }
 0x2ad   : > { %v1620_v62 = vpop.f32.mrf.mxu1  ;;  %v1537_v44 = vpop.f32.mrf.mxu0 }
 0x2ae   : > { %v2599_v36 = vpack.c.bf16 %v1620_v62, %v1618_v8  ;;  %v2614_v59 = vpack.c.bf16 %v1537_v44, %v1535_v13 }
 0x2af   : > { %v1624_v40 = vpop.f32.mrf.mxu1  ;;  %v1541_v38 = vpop.f32.mrf.mxu0 }
 0x2b0   : > { %2186 = vst [vmem:[%s2917_s9 + $0x5c] sm:$0xff] %v2599_v36  ;;  %2201 = vst [vmem:[%s2917_s9 + $0xc4] sm:$0xff] %v2614_v59 }
 0x2b1   : > { %v1626_v12 = vpop.f32.mrf.mxu1  ;;  %v1543_v19 = vpop.f32.mrf.mxu0 }
 0x2b2   : > { %v2603_v31 = vpack.c.bf16 %v1626_v12, %v1624_v40  ;;  %v2618_v25 = vpack.c.bf16 %v1543_v19, %v1541_v38 }
 0x2b3   : > { %v1628_v37 = vpop.f32.mrf.mxu1  ;;  %v1545_v48 = vpop.f32.mrf.mxu0 }
 0x2b4   : > { %2190 = vst [vmem:[%s2917_s9 + $0x78] sm:$0xff] %v2603_v31  ;;  %2205 = vst [vmem:[%s2917_s9 + $0xe0] sm:$0xff] %v2618_v25 }
 0x2b5   : > { %v1630_v10 = vpop.f32.mrf.mxu1  ;;  %v1547_v45 = vpop.f32.mrf.mxu0 }
 0x2b6   : > { %v2607_v16 = vpack.c.bf16 %v1630_v10, %v1628_v37  ;;  %v2622_v57 = vpack.c.bf16 %v1547_v45, %v1545_v48 }
 0x2b7   : > { %v1634_v18 = vpop.f32.mrf.mxu1  ;;  %v1551_v21 = vpop.f32.mrf.mxu0 }
 0x2b8   : > { %2194 = vst [vmem:[%s2917_s9 + $0x94] sm:$0xff] %v2607_v16  ;;  %2209 = vst [vmem:[%s2917_s9 + $0xfc] sm:$0xff] %v2622_v57 }
 0x2b9   : > { %v1636_v50 = vpop.f32.mrf.mxu1  ;;  %v1553_v6 = vpop.f32.mrf.mxu0 }
 0x2ba   : > { %v2611_v28 = vpack.c.bf16 %v1636_v50, %v1634_v18  ;;  %v2626_v11 = vpack.c.bf16 %v1553_v6, %v1551_v21 }
 0x2bb   : > { %v1638_v27 = vpop.f32.mrf.mxu1  ;;  %v1555_v3 = vpop.f32.mrf.mxu0 }
 0x2bc   : > { %2198 = vst [vmem:[%s2917_s9 + $0xb0] sm:$0xff] %v2611_v28  ;;  %2213 = vst [vmem:[%s2917_s9 + $0x118] sm:$0xff] %v2626_v11 }
 0x2bd   : > { %v1640_v23 = vpop.f32.mrf.mxu1  ;;  %v1557_v7 = vpop.f32.mrf.mxu0 }
 0x2be   : > { %v2615_v15 = vpack.c.bf16 %v1640_v23, %v1638_v27  ;;  %v2630_v33 = vpack.c.bf16 %v1557_v7, %v1555_v3 }
 0x2bf   : > { %v1644_v30 = vpop.f32.mrf.mxu1  ;;  %v1561_v46 = vpop.f32.mrf.mxu0 }
 0x2c0   : > { %2202 = vst [vmem:[%s2917_s9 + $0xcc] sm:$0xff] %v2615_v15  ;;  %2217 = vst [vmem:[%s2917_s9 + $0x134] sm:$0xff] %v2630_v33 }
 0x2c1   : > { %v1646_v29 = vpop.f32.mrf.mxu1  ;;  %v1563_v2 = vpop.f32.mrf.mxu0 }
 0x2c2   : > { %v2619_v58 = vpack.c.bf16 %v1646_v29, %v1644_v30  ;;  %v2634_v56 = vpack.c.bf16 %v1563_v2, %v1561_v46 }
 0x2c3   : > { %v1648_v51 = vpop.f32.mrf.mxu1  ;;  %v1565_v63 = vpop.f32.mrf.mxu0 }
 0x2c4   : > { %2206 = vst [vmem:[%s2917_s9 + $0xe8] sm:$0xff] %v2619_v58  ;;  %2221 = vst [vmem:[%s2917_s9 + $0x150] sm:$0xff] %v2634_v56 }
 0x2c5   : > { %v1650_v61 = vpop.f32.mrf.mxu1  ;;  %v1567_v52 = vpop.f32.mrf.mxu0 }
 0x2c6   : > { %v2623_v49 = vpack.c.bf16 %v1650_v61, %v1648_v51  ;;  %v2638_v32 = vpack.c.bf16 %v1567_v52, %v1565_v63 }
 0x2c7   : > { %v1654_v4 = vpop.f32.mrf.mxu1 }
 0x2c8   : > { %2210 = vst [vmem:[%s2917_s9 + $0x104] sm:$0xff] %v2623_v49  ;;  %2225 = vst [vmem:[%s2917_s9 + $0x16c] sm:$0xff] %v2638_v32 }
 0x2c9   : > { %v1656_v24 = vpop.f32.mrf.mxu1 }
 0x2ca   : > { %v2627_v60 = vpack.c.bf16 %v1656_v24, %v1654_v4 }
 0x2cb   : > { %v1658_v53 = vpop.f32.mrf.mxu1 }
 0x2cc   : > { %2214 = vst [vmem:[%s2917_s9 + $0x120] sm:$0xff] %v2627_v60 }
 0x2cd   : > { %v1660_v22 = vpop.f32.mrf.mxu1 }
 0x2ce   : > { %v2631_v20 = vpack.c.bf16 %v1660_v22, %v1658_v53 }
 0x2cf   : > { %v1664_v42 = vpop.f32.mrf.mxu1  ;;  %v1707_v35 = vpop.f32.mrf.mxu0 }
 0x2d0   : > { %2218 = vst [vmem:[%s2917_s9 + $0x13c] sm:$0xff] %v2631_v20 }
 0x2d1   : > { %v1666_v14 = vpop.f32.mrf.mxu1  ;;  %v1709_v5 = vpop.f32.mrf.mxu0 }
 0x2d2   : > { %v2635_v39 = vpack.c.bf16 %v1666_v14, %v1664_v42  ;;  %v2588_v1 = vpack.c.bf16 %v1709_v5, %v1707_v35 }
 0x2d3   : > { %v1668_v54 = vpop.f32.mrf.mxu1  ;;  %v1711_v55 = vpop.f32.mrf.mxu0 }
 0x2d4   : > { %2222 = vst [vmem:[%s2917_s9 + $0x158] sm:$0xff] %v2635_v39  ;;  %2175 = vst [vmem:[%s2917_s9 + $0x10] sm:$0xff] %v2588_v1 }
 0x2d5   : > { %v1670_v9 = vpop.f32.mrf.mxu1  ;;  %v1713_v0 = vpop.f32.mrf.mxu0 }
 0x2d6   : > { %v2639_v43 = vpack.c.bf16 %v1670_v9, %v1668_v54  ;;  %v2592_v47 = vpack.c.bf16 %v1713_v0, %v1711_v55 }
 0x2d7   : > { %v2658_v26 = vpop.f32.mrf.mxu1  ;;  %v1717_v17 = vpop.f32.mrf.mxu0 }
 0x2d8   : > { %2226 = vst [vmem:[%s2917_s9 + $0x174] sm:$0xff] %v2639_v43  ;;  %2179 = vst [vmem:[%s2917_s9 + $0x2c] sm:$0xff] %v2592_v47 }
 0x2d9   : > { %v2659_v41 = vpop.f32.mrf.mxu1  ;;  %v1719_v34 = vpop.f32.mrf.mxu0 }
 0x2da   : > { %v2660_v8 = vadd.f32 %v2659_v41, %v2658_v26  ;;  %v2596_v13 = vpack.c.bf16 %v1719_v34, %v1717_v17 }
 0x2db   : > { %v2661_v62 = vpop.f32.mrf.mxu1  ;;  %v1721_v44 = vpop.f32.mrf.mxu0 }
 0x2dc   : > { %v2589_v36 = vpack.c.bf16 %v2660_v8, %v2660_v8  ;;  %2183 = vst [vmem:[%s2917_s9 + $0x48] sm:$0xff] %v2596_v13 }
 0x2dd   : > { %v2662_v59 = vpop.f32.mrf.mxu1  ;;  %v1723_v40 = vpop.f32.mrf.mxu0 }
 0x2de   : > { %2176 = vst [vmem:[%s2917_s9 + $0x18] sm:$0xf] %v2589_v36  ;;  %v2663_v38 = vadd.f32 %v2662_v59, %v2661_v62  ;;  %v2600_v12 = vpack.c.bf16 %v1723_v40, %v1721_v44 }
 0x2df   : > { %v2664_v19 = vpop.f32.mrf.mxu1  ;;  %v1727_v31 = vpop.f32.mrf.mxu0 }
 0x2e0   : > { %v2593_v25 = vpack.c.bf16 %v2663_v38, %v2663_v38  ;;  %2187 = vst [vmem:[%s2917_s9 + $0x64] sm:$0xff] %v2600_v12 }
 0x2e1   : > { %v2665_v37 = vpop.f32.mrf.mxu1  ;;  %v1729_v48 = vpop.f32.mrf.mxu0 }
 0x2e2   : > { %2180 = vst [vmem:[%s2917_s9 + $0x34] sm:$0xf] %v2593_v25  ;;  %v2666_v10 = vadd.f32 %v2665_v37, %v2664_v19  ;;  %v2604_v45 = vpack.c.bf16 %v1729_v48, %v1727_v31 }
 0x2e3   : > { %v2667_v16 = vpop.f32.mrf.mxu1  ;;  %v1731_v57 = vpop.f32.mrf.mxu0 }
 0x2e4   : > { %v2597_v18 = vpack.c.bf16 %v2666_v10, %v2666_v10  ;;  %2191 = vst [vmem:[%s2917_s9 + $0x80] sm:$0xff] %v2604_v45 }
 0x2e5   : > { %v2668_v21 = vpop.f32.mrf.mxu1  ;;  %v1733_v50 = vpop.f32.mrf.mxu0 }
 0x2e6   : > { %2184 = vst [vmem:[%s2917_s9 + $0x50] sm:$0xf] %v2597_v18  ;;  %v2669_v6 = vadd.f32 %v2668_v21, %v2667_v16  ;;  %v2608_v28 = vpack.c.bf16 %v1733_v50, %v1731_v57 }
 0x2e7   : > { %v2670_v11 = vpop.f32.mrf.mxu1  ;;  %v1737_v27 = vpop.f32.mrf.mxu0 }
 0x2e8   : > { %v2601_v3 = vpack.c.bf16 %v2669_v6, %v2669_v6  ;;  %2195 = vst [vmem:[%s2917_s9 + $0x9c] sm:$0xff] %v2608_v28 }
 0x2e9   : > { %v2671_v23 = vpop.f32.mrf.mxu1  ;;  %v1739_v7 = vpop.f32.mrf.mxu0 }
 0x2ea   : > { %2188 = vst [vmem:[%s2917_s9 + $0x6c] sm:$0xf] %v2601_v3  ;;  %v2672_v15 = vadd.f32 %v2671_v23, %v2670_v11  ;;  %v2612_v33 = vpack.c.bf16 %v1739_v7, %v1737_v27 }
 0x2eb   : > { %v2673_v30 = vpop.f32.mrf.mxu1  ;;  %v1741_v46 = vpop.f32.mrf.mxu0 }
 0x2ec   : > { %v2605_v29 = vpack.c.bf16 %v2672_v15, %v2672_v15  ;;  %2199 = vst [vmem:[%s2917_s9 + $0xb8] sm:$0xff] %v2612_v33 }
 0x2ed   : > { %v2674_v2 = vpop.f32.mrf.mxu1  ;;  %v1743_v58 = vpop.f32.mrf.mxu0 }
 0x2ee   : > { %2192 = vst [vmem:[%s2917_s9 + $0x88] sm:$0xf] %v2605_v29  ;;  %v2675_v56 = vadd.f32 %v2674_v2, %v2673_v30  ;;  %v2616_v51 = vpack.c.bf16 %v1743_v58, %v1741_v46 }
 0x2ef   : > { %v2676_v63 = vpop.f32.mrf.mxu1  ;;  %v1747_v61 = vpop.f32.mrf.mxu0 }
 0x2f0   : > { %v2609_v52 = vpack.c.bf16 %v2675_v56, %v2675_v56  ;;  %2203 = vst [vmem:[%s2917_s9 + $0xd4] sm:$0xff] %v2616_v51 }
 0x2f1   : > { %v2677_v49 = vpop.f32.mrf.mxu1  ;;  %v1749_v32 = vpop.f32.mrf.mxu0 }
 0x2f2   : > { %2196 = vst [vmem:[%s2917_s9 + $0xa4] sm:$0xf] %v2609_v52  ;;  %v2678_v4 = vadd.f32 %v2677_v49, %v2676_v63  ;;  %v2620_v24 = vpack.c.bf16 %v1749_v32, %v1747_v61 }
 0x2f3   : > { %v2679_v60 = vpop.f32.mrf.mxu1  ;;  %v1751_v53 = vpop.f32.mrf.mxu0 }
 0x2f4   : > { %v2613_v22 = vpack.c.bf16 %v2678_v4, %v2678_v4  ;;  %2207 = vst [vmem:[%s2917_s9 + $0xf0] sm:$0xff] %v2620_v24 }
 0x2f5   : > { %v2680_v20 = vpop.f32.mrf.mxu1  ;;  %v1753_v42 = vpop.f32.mrf.mxu0 }
 0x2f6   : > { %2200 = vst [vmem:[%s2917_s9 + $0xc0] sm:$0xf] %v2613_v22  ;;  %v2681_v35 = vadd.f32 %v2680_v20, %v2679_v60  ;;  %v2624_v14 = vpack.c.bf16 %v1753_v42, %v1751_v53 }
 0x2f7   : > { %v2682_v5 = vpop.f32.mrf.mxu1  ;;  %v1757_v39 = vpop.f32.mrf.mxu0 }
 0x2f8   : > { %v2617_v1 = vpack.c.bf16 %v2681_v35, %v2681_v35  ;;  %2211 = vst [vmem:[%s2917_s9 + $0x10c] sm:$0xff] %v2624_v14 }
 0x2f9   : > { %v2683_v54 = vpop.f32.mrf.mxu1  ;;  %v1759_v55 = vpop.f32.mrf.mxu0 }
 0x2fa   : > { %2204 = vst [vmem:[%s2917_s9 + $0xdc] sm:$0xf] %v2617_v1  ;;  %v2684_v9 = vadd.f32 %v2683_v54, %v2682_v5  ;;  %v2628_v0 = vpack.c.bf16 %v1759_v55, %v1757_v39 }
 0x2fb   : > { %v2685_v43 = vpop.f32.mrf.mxu1  ;;  %v1761_v47 = vpop.f32.mrf.mxu0 }
 0x2fc   : > { %v2621_v26 = vpack.c.bf16 %v2684_v9, %v2684_v9  ;;  %2215 = vst [vmem:[%s2917_s9 + $0x128] sm:$0xff] %v2628_v0 }
 0x2fd   : > { %v2686_v17 = vpop.f32.mrf.mxu1  ;;  %v1763_v41 = vpop.f32.mrf.mxu0 }
 0x2fe   : > { %2208 = vst [vmem:[%s2917_s9 + $0xf8] sm:$0xf] %v2621_v26  ;;  %v2687_v34 = vadd.f32 %v2686_v17, %v2685_v43  ;;  %v2632_v8 = vpack.c.bf16 %v1763_v41, %v1761_v47 }
 0x2ff   : > { %v2688_v13 = vpop.f32.mrf.mxu1  ;;  %v1767_v62 = vpop.f32.mrf.mxu0 }
 0x300   : > { %v2625_v44 = vpack.c.bf16 %v2687_v34, %v2687_v34  ;;  %2219 = vst [vmem:[%s2917_s9 + $0x144] sm:$0xff] %v2632_v8 }
 0x301   : > { %v2689_v36 = vpop.f32.mrf.mxu1  ;;  %v1769_v59 = vpop.f32.mrf.mxu0 }
 0x302   : > { %2212 = vst [vmem:[%s2917_s9 + $0x114] sm:$0xf] %v2625_v44  ;;  %v2690_v40 = vadd.f32 %v2689_v36, %v2688_v13  ;;  %v2636_v38 = vpack.c.bf16 %v1769_v59, %v1767_v62 }
 0x303   : > { %v2691_v12 = vpop.f32.mrf.mxu1  ;;  %v1771_v19 = vpop.f32.mrf.mxu0 }
 0x304   : > { %v2629_v31 = vpack.c.bf16 %v2690_v40, %v2690_v40  ;;  %2223 = vst [vmem:[%s2917_s9 + $0x160] sm:$0xff] %v2636_v38 }
 0x305   : > { %v2692_v25 = vpop.f32.mrf.mxu1  ;;  %v1773_v37 = vpop.f32.mrf.mxu0 }
 0x306   : > { %2216 = vst [vmem:[%s2917_s9 + $0x130] sm:$0xf] %v2629_v31  ;;  %v2693_v48 = vadd.f32 %v2692_v25, %v2691_v12  ;;  %v2640_v10 = vpack.c.bf16 %v1773_v37, %v1771_v19 }
 0x307   : > { %v2694_v45 = vpop.f32.mrf.mxu1 }
 0x308   : > { %v2633_v16 = vpack.c.bf16 %v2693_v48, %v2693_v48  ;;  %2227 = vst [vmem:[%s2917_s9 + $0x17c] sm:$0xff] %v2640_v10 }
 0x309   : > { %v2695_v57 = vpop.f32.mrf.mxu1 }
 0x30a   : > { %2220 = vst [vmem:[%s2917_s9 + $0x14c] sm:$0xf] %v2633_v16  ;;  %v2696_v18 = vadd.f32 %v2695_v57, %v2694_v45 }
 0x30b   : > { %v2697_v21 = vpop.f32.mrf.mxu1 }
 0x30c   : > { %v2637_v50 = vpack.c.bf16 %v2696_v18, %v2696_v18 }
 0x30d   : > { %v2698_v6 = vpop.f32.mrf.mxu1 }
 0x30e   : > { %2224 = vst [vmem:[%s2917_s9 + $0x168] sm:$0xf] %v2637_v50  ;;  %v2699_v28 = vadd.f32 %v2698_v6, %v2697_v21 }
 0x310   : > { %v2641_v11 = vpack.c.bf16 %v2699_v28, %v2699_v28 }
 0x312   : > { %2228 = vst [vmem:[%s2917_s9 + $0x184] sm:$0xf] %v2641_v11 }
 0x313 PF: > { %s4198_s24 = sshll.u32 %s2812_s20, 4 }
 0x314   : > { %p2582_p0 = scmp.lt.s32.totalorder %s4198_s24, %s2896_s29 }
 0x316   : > { %2232 = sbr.rel (%p2582_p0) target bundleno = 824 (0x338), region = 40 }
 0x31b   : > { %v2832_v27 = vmov 0  }
 0x31c   : > { %2233 = vst [vmem:[%s2917_s9] sm:$0xff] %v2832_v27  ;;  %2234 = vst [vmem:[%s2917_s9 + $0x8] sm:$0xff] %v2832_v27 }
 0x31d   : > { %2235 = vst [vmem:[%s2917_s9 + $0x10] sm:$0xff] %v2832_v27  ;;  %2236 = vst [vmem:[%s2917_s9 + $0x18] sm:$0xf] %v2832_v27 }
 0x31e   : > { %2237 = vst [vmem:[%s2917_s9 + $0x1c] sm:$0xff] %v2832_v27  ;;  %2238 = vst [vmem:[%s2917_s9 + $0x24] sm:$0xff] %v2832_v27 }
 0x31f   : > { %2239 = vst [vmem:[%s2917_s9 + $0x2c] sm:$0xff] %v2832_v27  ;;  %2240 = vst [vmem:[%s2917_s9 + $0x34] sm:$0xf] %v2832_v27 }
 0x320   : > { %2241 = vst [vmem:[%s2917_s9 + $0x38] sm:$0xff] %v2832_v27  ;;  %2242 = vst [vmem:[%s2917_s9 + $0x40] sm:$0xff] %v2832_v27 }
 0x321   : > { %2243 = vst [vmem:[%s2917_s9 + $0x48] sm:$0xff] %v2832_v27  ;;  %2244 = vst [vmem:[%s2917_s9 + $0x50] sm:$0xf] %v2832_v27 }
 0x322   : > { %2245 = vst [vmem:[%s2917_s9 + $0x54] sm:$0xff] %v2832_v27  ;;  %2246 = vst [vmem:[%s2917_s9 + $0x5c] sm:$0xff] %v2832_v27 }
 0x323   : > { %2247 = vst [vmem:[%s2917_s9 + $0x64] sm:$0xff] %v2832_v27  ;;  %2248 = vst [vmem:[%s2917_s9 + $0x6c] sm:$0xf] %v2832_v27 }
 0x324   : > { %2249 = vst [vmem:[%s2917_s9 + $0x70] sm:$0xff] %v2832_v27  ;;  %2250 = vst [vmem:[%s2917_s9 + $0x78] sm:$0xff] %v2832_v27 }
 0x325   : > { %2251 = vst [vmem:[%s2917_s9 + $0x80] sm:$0xff] %v2832_v27  ;;  %2252 = vst [vmem:[%s2917_s9 + $0x88] sm:$0xf] %v2832_v27 }
 0x326   : > { %2253 = vst [vmem:[%s2917_s9 + $0x8c] sm:$0xff] %v2832_v27  ;;  %2254 = vst [vmem:[%s2917_s9 + $0x94] sm:$0xff] %v2832_v27 }
 0x327   : > { %2255 = vst [vmem:[%s2917_s9 + $0x9c] sm:$0xff] %v2832_v27  ;;  %2256 = vst [vmem:[%s2917_s9 + $0xa4] sm:$0xf] %v2832_v27 }
 0x328   : > { %2257 = vst [vmem:[%s2917_s9 + $0xa8] sm:$0xff] %v2832_v27  ;;  %2258 = vst [vmem:[%s2917_s9 + $0xb0] sm:$0xff] %v2832_v27 }
 0x329   : > { %2259 = vst [vmem:[%s2917_s9 + $0xb8] sm:$0xff] %v2832_v27  ;;  %2260 = vst [vmem:[%s2917_s9 + $0xc0] sm:$0xf] %v2832_v27 }
 0x32a   : > { %2261 = vst [vmem:[%s2917_s9 + $0xc4] sm:$0xff] %v2832_v27  ;;  %2262 = vst [vmem:[%s2917_s9 + $0xcc] sm:$0xff] %v2832_v27 }
 0x32b   : > { %2263 = vst [vmem:[%s2917_s9 + $0xd4] sm:$0xff] %v2832_v27  ;;  %2264 = vst [vmem:[%s2917_s9 + $0xdc] sm:$0xf] %v2832_v27 }
 0x32c   : > { %2265 = vst [vmem:[%s2917_s9 + $0xe0] sm:$0xff] %v2832_v27  ;;  %2266 = vst [vmem:[%s2917_s9 + $0xe8] sm:$0xff] %v2832_v27 }
 0x32d   : > { %2267 = vst [vmem:[%s2917_s9 + $0xf0] sm:$0xff] %v2832_v27  ;;  %2268 = vst [vmem:[%s2917_s9 + $0xf8] sm:$0xf] %v2832_v27 }
 0x32e   : > { %2269 = vst [vmem:[%s2917_s9 + $0xfc] sm:$0xff] %v2832_v27  ;;  %2270 = vst [vmem:[%s2917_s9 + $0x104] sm:$0xff] %v2832_v27 }
 0x32f   : > { %2271 = vst [vmem:[%s2917_s9 + $0x10c] sm:$0xff] %v2832_v27  ;;  %2272 = vst [vmem:[%s2917_s9 + $0x114] sm:$0xf] %v2832_v27 }
 0x330   : > { %2273 = vst [vmem:[%s2917_s9 + $0x118] sm:$0xff] %v2832_v27  ;;  %2274 = vst [vmem:[%s2917_s9 + $0x120] sm:$0xff] %v2832_v27 }
 0x331   : > { %2275 = vst [vmem:[%s2917_s9 + $0x128] sm:$0xff] %v2832_v27  ;;  %2276 = vst [vmem:[%s2917_s9 + $0x130] sm:$0xf] %v2832_v27 }
 0x332   : > { %2277 = vst [vmem:[%s2917_s9 + $0x134] sm:$0xff] %v2832_v27  ;;  %2278 = vst [vmem:[%s2917_s9 + $0x13c] sm:$0xff] %v2832_v27 }
 0x333   : > { %2279 = vst [vmem:[%s2917_s9 + $0x144] sm:$0xff] %v2832_v27  ;;  %2280 = vst [vmem:[%s2917_s9 + $0x14c] sm:$0xf] %v2832_v27 }
 0x334   : > { %2281 = vst [vmem:[%s2917_s9 + $0x150] sm:$0xff] %v2832_v27  ;;  %2282 = vst [vmem:[%s2917_s9 + $0x158] sm:$0xff] %v2832_v27 }
 0x335   : > { %2283 = vst [vmem:[%s2917_s9 + $0x160] sm:$0xff] %v2832_v27  ;;  %2284 = vst [vmem:[%s2917_s9 + $0x168] sm:$0xf] %v2832_v27 }
 0x336   : > { %2285 = vst [vmem:[%s2917_s9 + $0x16c] sm:$0xff] %v2832_v27  ;;  %2286 = vst [vmem:[%s2917_s9 + $0x174] sm:$0xff] %v2832_v27 }
 0x337   : > { %2287 = vst [vmem:[%s2917_s9 + $0x17c] sm:$0xff] %v2832_v27  ;;  %2288 = vst [vmem:[%s2917_s9 + $0x184] sm:$0xf] %v2832_v27 }
 0x338 PF: > { %s20_s23 = sadd.s32 1, %s2828_s23   ;;  %s4199_s25 = sld [smem:[#allocation5_spill]] }
 0x339   : > { %p17_p1 = scmp.ge.s32.totalorder %s20_s23, 6   ;;  %s4200_s26 = sld [smem:[#allocation6_spill]] }
 0x33a   : > { %s4201_s20 = smov %s2820_s22  ;;  %s4202_s21 = smov %s2824_s0 }
 0x33b   :  { %19 = sbr.rel (!%p17_p1) target bundleno = 18 (0x12), region = 76 }
 0x33e   : > { %s4203_s22 = smov %s4199_s25 }
 0x33f   : > { %s4204_s0 = smov %s4200_s26 }

// kernel: _forward.5
= control target key start
LH: loop header
LB: loop body
LE: loop exit
PB: predicated region body
PF: predicated region fallthrough
CT: control target
= control target key end

     0   :  { %s418_s1 = inlined_call_operand.vmem [shape: bf16[128,128], index: 1, kind: input, shape index: {}]   ;;  %s419_s0 = inlined_call_operand.vmem [shape: bf16[64,128], index: 0, kind: input, shape index: {}]   ;;  %s420_s2 = inlined_call_operand.vmem [shape: f32[1,128], index: 2, kind: input, shape index: {}]   ;;  %s421_s3 = inlined_call_operand.vmem [shape: f32[64,128], index: 3, kind: output, shape index: {}]  }
   0x1   :  { %v323_v0 = vld [vmem:[%s418_s1 + $0x38] sm:$0xff]   ;;  %v324_v1 = vld [vmem:[%s418_s1 + $0x30] sm:$0xff]   ;;  %v325_v2 = vld [vmem:[%s418_s1 + $0x28] sm:$0xff]  }
   0x2   :  { %283 = vmatprep.subr.bf16.mxu0 %v323_v0  ;;  %307 = vmatprep.subr.bf16.mxu1 %v323_v0  ;;  %v326_v3 = vld [vmem:[%s418_s1 + $0x20] sm:$0xff]   ;;  %v332_v5 = vld [vmem:[%s419_s0 + $0x10] sm:$0xff]   ;;  %v327_v6 = vld [vmem:[%s418_s1 + $0x18] sm:$0xff]  }
   0x3   :  { %284 = vmatpush3.bf16.msra.mxu0 %v323_v0  ;;  %315 = vmatpush3.bf16.msra.mxu1 %v323_v0  ;;  %v331_v4 = vld [vmem:[%s419_s0] sm:$0xff]   ;;  %v328_v7 = vld [vmem:[%s418_s1 + $0x10] sm:$0xff]   ;;  %v329_v8 = vld [vmem:[%s418_s1 + $0x8] sm:$0xff]  }
   0x4   :  { %285 = vmatprep.subr.bf16.mxu0 %v324_v1  ;;  %308 = vmatprep.subr.bf16.mxu1 %v324_v1  ;;  %v330_v9 = vld [vmem:[%s418_s1] sm:$0xff]   ;;  %v333_v10 = vld [vmem:[%s419_s0 + $0x8] sm:$0xff]   ;;  %v334_v11 = vld [vmem:[%s419_s0 + $0x18] sm:$0xff]  }
   0x5   :  { %299 = vmatprep.mubr.bf16.mxu0 %v331_v4  ;;  %303 = vmatprep.mubr.bf16.mxu1 %v332_v5  ;;  %v270_v12 = vld [vmem:[%s420_s2] ss:$0 sm:$0xff] }
   0x7   :  { %286 = vmatpush3.bf16.msra.mxu0 %v324_v1  ;;  %316 = vmatpush3.bf16.msra.mxu1 %v324_v1 }
   0x8   :  { %287 = vmatprep.subr.bf16.mxu0 %v325_v2  ;;  %309 = vmatprep.subr.bf16.mxu1 %v325_v2 }
   0xb   :  { %288 = vmatpush3.bf16.msra.mxu0 %v325_v2  ;;  %317 = vmatpush3.bf16.msra.mxu1 %v325_v2 }
   0xc   :  { %289 = vmatprep.subr.bf16.mxu0 %v326_v3  ;;  %310 = vmatprep.subr.bf16.mxu1 %v326_v3 }
   0xf   :  { %290 = vmatpush3.bf16.msra.mxu0 %v326_v3  ;;  %318 = vmatpush3.bf16.msra.mxu1 %v326_v3 }
  0x10   :  { %291 = vmatprep.subr.bf16.mxu0 %v327_v6  ;;  %311 = vmatprep.subr.bf16.mxu1 %v327_v6 }
  0x13   :  { %292 = vmatpush3.bf16.msra.mxu0 %v327_v6  ;;  %319 = vmatpush3.bf16.msra.mxu1 %v327_v6 }
  0x14   :  { %293 = vmatprep.subr.bf16.mxu0 %v328_v7  ;;  %312 = vmatprep.subr.bf16.mxu1 %v328_v7 }
  0x17   :  { %294 = vmatpush3.bf16.msra.mxu0 %v328_v7  ;;  %320 = vmatpush3.bf16.msra.mxu1 %v328_v7 }
  0x18   :  { %295 = vmatprep.subr.bf16.mxu0 %v329_v8  ;;  %313 = vmatprep.subr.bf16.mxu1 %v329_v8 }
  0x1b   :  { %296 = vmatpush3.bf16.msra.mxu0 %v329_v8  ;;  %321 = vmatpush3.bf16.msra.mxu1 %v329_v8 }
  0x1c   :  { %297 = vmatprep.subr.bf16.mxu0 %v330_v9  ;;  %314 = vmatprep.subr.bf16.mxu1 %v330_v9 }
  0x1f   :  { %298 = vmatpush3.bf16.msra.mxu0 %v330_v9  ;;  %322 = vmatpush3.bf16.msra.mxu1 %v330_v9 }
  0x22   :  { %300 = vmatmul.mubr.bf16.vlgmr.msra.gmra.mxu0 %v333_v10  ;;  %304 = vmatmul.mubr.bf16.vlgmr.msra.gmra.mxu1 %v334_v11 }
  0xe2   :  { %v301_v13 = vpop.f32.mrf.mxu0  ;;  %v305_v14 = vpop.f32.mrf.mxu1 }
  0xe3   :  { %v232_v15 = vadd.f32 %v301_v13, %v270_v12  ;;  %v236_v16 = vadd.f32 %v305_v14, %v270_v12 }
  0xe4   :  { %v165_v17 = vpop.f32.mrf.mxu0  ;;  %v181_v18 = vpop.f32.mrf.mxu1 }
  0xe5   :  { %v240_v19 = vmax.f32 %v232_v15, 0.0  ;;  %v244_v20 = vmax.f32 %v236_v16, 0.0  ;;  %v230_v21 = vadd.f32 %v270_v12, %v165_v17  ;;  %v234_v22 = vadd.f32 %v270_v12, %v181_v18 }
  0xe6   :  { %v302_v23 = vpop.f32.mrf.mxu0  ;;  %v306_v24 = vpop.f32.mrf.mxu1 }
  0xe7   :  { %248 = vst [vmem:[%s421_s3 + $0x10] sm:$0xff] %v240_v19  ;;  %252 = vst [vmem:[%s421_s3 + $0x30] sm:$0xff] %v244_v20  ;;  %v238_v25 = vmax.f32 %v230_v21, 0.0  ;;  %v242_v26 = vmax.f32 %v234_v22, 0.0  ;;  %v233_v27 = vadd.f32 %v302_v23, %v270_v12  ;;  %v237_v28 = vadd.f32 %v306_v24, %v270_v12 }
  0xe8   :  { %v168_v29 = vpop.f32.mrf.mxu0  ;;  %v184_v30 = vpop.f32.mrf.mxu1 }
  0xe9   :  { %246 = vst [vmem:[%s421_s3] sm:$0xff] %v238_v25  ;;  %250 = vst [vmem:[%s421_s3 + $0x20] sm:$0xff] %v242_v26  ;;  %v241_v31 = vmax.f32 %v233_v27, 0.0  ;;  %v245_v32 = vmax.f32 %v237_v28, 0.0  ;;  %v231_v33 = vadd.f32 %v270_v12, %v168_v29  ;;  %v235_v34 = vadd.f32 %v270_v12, %v184_v30 }
  0xeb   :  { %249 = vst [vmem:[%s421_s3 + $0x18] sm:$0xff] %v241_v31  ;;  %253 = vst [vmem:[%s421_s3 + $0x38] sm:$0xff] %v245_v32  ;;  %v239_v35 = vmax.f32 %v231_v33, 0.0  ;;  %v243_v36 = vmax.f32 %v235_v34, 0.0 }
  0xed   :  { %247 = vst [vmem:[%s421_s3 + $0x8] sm:$0xff] %v239_v35  ;;  %251 = vst [vmem:[%s421_s3 + $0x28] sm:$0xff] %v243_v36 }

// kernel: _forward.4
= control target key start
LH: loop header
LB: loop body
LE: loop exit
PB: predicated region body
PF: predicated region fallthrough
CT: control target
= control target key end

     0   :  { %s3350_s12 = smov 0   ;;  %s3352_s13 = smov 0   ;;  %s3916_s0 = inlined_call_operand.vmem [shape: bf16[64,8192], index: 0, kind: input, shape index: {}]   ;;  %s3917_s1 = inlined_call_operand.vmem [shape: bf16[8192,128], index: 1, kind: input, shape index: {}]   ;;  %s3918_s2 = inlined_call_operand.vmem [shape: f32[1,128], index: 2, kind: input, shape index: {}]   ;;  %s3919_s3 = inlined_call_operand.vmem [shape: bf16[64,128], index: 3, kind: output, shape index: {}]  }
   0x1   :  { %s3354_s14 = smov 0   ;;  %s3356_s15 = smov 0  }
   0x2   :  { %s3358_s16 = smov 0  }
   0x3 LB: > { %s25_s17 = sadd.s32 1, %s3323_s15  ;;  %p48_p1 = scmp.ne.s32.totalorder %s3315_s13, %s3311_s12  ;;  %s3327_s16 = sphi %s3358_s16, %s13_s16   ;;  %s3323_s15 = sphi %s3356_s15, %s3953_s15   ;;  %s3319_s14 = sphi %s3354_s14, %s3952_s14   ;;  %s3315_s13 = sphi %s3352_s13, %s3951_s13   ;;  %s3311_s12 = sphi %s3350_s12, %s3950_s12  }
   0x4   : > { %p26_p0 = scmp.ge.s32.totalorder %s25_s17, 4  ;;  %p49_p2 = scmp.eq.s32.totalorder %s3327_s16, 0 }
   0x5   : > { %s41_s19 = sadd.s32 1, %s3315_s13  ;;  %p2553_p5 = scmp.ge.s32.totalorder %s3327_s16, 4 }
   0x6   : > { %s3955_s17 = smov (%p26_p0, %s25_s17), 0  ;;  %p50_p3 = por %p49_p2, %p48_p1 }
   0x7   : > { %s37_s18 = ssub.s32 %s3323_s15, %s3955_s17  ;;  %162 = sbr.rel (%p2553_p5) target bundleno = 48 (0x30), region = 20 }
   0x8   : > { %p39_p4 = scmp.eq.s32.totalorder %s37_s18, 0 }
   0xa   : > { %s3385_s20 = scalar_select %p39_p4, %s3315_s13, %s41_s19  }
   0xc   : > { %165 = sbr.rel (!%p50_p3) target bundleno = 48 (0x30), region = 24  ;;  %s167_s21 = sand.u32 (%p50_p3), 1, %s3315_s13  }
   0xd   : > { %s2768_s22 = sshll.u32 (%p50_p3), %s3323_s15, 6  ;;  %s2554_s23 = sshll.u32 (%p50_p3), %s167_s21, 9 }
   0xe   : > { %s3393_s26 = scalar_lea.vmem (%p50_p3), %s3916_s0, %s2768_s22  ;;  %s3398_s27 = scalar_lea.vmem (%p50_p3), [#allocation3], %s2554_s23 }
   0xf   : > { %v188_v0 = vld [vmem:[%s3393_s26] sm:$0xff] (%p50_p3)  ;;  %v190_v1 = vld [vmem:[%s3393_s26 + $0x8] sm:$0xff] (%p50_p3)  ;;  %v192_v2 = vld [vmem:[%s3393_s26 + $0x10] sm:$0xff] (%p50_p3) }
  0x10   : > { %189 = vst [vmem:[%s3398_s27] sm:$0xff] (%p50_p3), %v188_v0  ;;  %191 = vst [vmem:[%s3398_s27 + $0x8] sm:$0xff] (%p50_p3), %v190_v1  ;;  %v194_v3 = vld [vmem:[%s3393_s26 + $0x18] sm:$0xff] (%p50_p3)  ;;  %v196_v4 = vld [vmem:[%s3393_s26 + $0x20] sm:$0xff] (%p50_p3) }
  0x11   : > { %193 = vst [vmem:[%s3398_s27 + $0x10] sm:$0xff] %v192_v2  ;;  %v198_v5 = vld [vmem:[%s3393_s26 + $0x28] sm:$0xff]  ;;  %195 = vst [vmem:[%s3398_s27 + $0x18] sm:$0xff] %v194_v3  ;;  %v200_v6 = vld [vmem:[%s3393_s26 + $0x30] sm:$0xff] }
  0x12   : > { %197 = vst [vmem:[%s3398_s27 + $0x20] sm:$0xff] %v196_v4  ;;  %199 = vst [vmem:[%s3398_s27 + $0x28] sm:$0xff] %v198_v5  ;;  %v202_v7 = vld [vmem:[%s3393_s26 + $0x38] sm:$0xff]  ;;  %v204_v8 = vld [vmem:[%s3393_s26 + $0x100] sm:$0xff] }
  0x13   : > { %201 = vst [vmem:[%s3398_s27 + $0x30] sm:$0xff] %v200_v6  ;;  %203 = vst [vmem:[%s3398_s27 + $0x38] sm:$0xff] %v202_v7  ;;  %v206_v9 = vld [vmem:[%s3393_s26 + $0x108] sm:$0xff]  ;;  %v208_v10 = vld [vmem:[%s3393_s26 + $0x110] sm:$0xff] }
  0x14   : > { %205 = vst [vmem:[%s3398_s27 + $0x40] sm:$0xff] %v204_v8  ;;  %v210_v11 = vld [vmem:[%s3393_s26 + $0x118] sm:$0xff]  ;;  %207 = vst [vmem:[%s3398_s27 + $0x48] sm:$0xff] %v206_v9  ;;  %v212_v12 = vld [vmem:[%s3393_s26 + $0x120] sm:$0xff] }
  0x15   : > { %209 = vst [vmem:[%s3398_s27 + $0x50] sm:$0xff] %v208_v10  ;;  %211 = vst [vmem:[%s3398_s27 + $0x58] sm:$0xff] %v210_v11  ;;  %v214_v13 = vld [vmem:[%s3393_s26 + $0x128] sm:$0xff]  ;;  %v216_v14 = vld [vmem:[%s3393_s26 + $0x130] sm:$0xff] }
  0x16   : > { %213 = vst [vmem:[%s3398_s27 + $0x60] sm:$0xff] %v212_v12  ;;  %215 = vst [vmem:[%s3398_s27 + $0x68] sm:$0xff] %v214_v13  ;;  %v218_v15 = vld [vmem:[%s3393_s26 + $0x138] sm:$0xff]  ;;  %v220_v16 = vld [vmem:[%s3393_s26 + $0x200] sm:$0xff] }
  0x17   : > { %217 = vst [vmem:[%s3398_s27 + $0x70] sm:$0xff] %v216_v14  ;;  %v222_v17 = vld [vmem:[%s3393_s26 + $0x208] sm:$0xff]  ;;  %219 = vst [vmem:[%s3398_s27 + $0x78] sm:$0xff] %v218_v15  ;;  %v224_v18 = vld [vmem:[%s3393_s26 + $0x210] sm:$0xff] }
  0x18   : > { %221 = vst [vmem:[%s3398_s27 + $0x80] sm:$0xff] %v220_v16  ;;  %223 = vst [vmem:[%s3398_s27 + $0x88] sm:$0xff] %v222_v17  ;;  %v226_v19 = vld [vmem:[%s3393_s26 + $0x218] sm:$0xff]  ;;  %v228_v20 = vld [vmem:[%s3393_s26 + $0x220] sm:$0xff] }
  0x19   : > { %225 = vst [vmem:[%s3398_s27 + $0x90] sm:$0xff] %v224_v18  ;;  %227 = vst [vmem:[%s3398_s27 + $0x98] sm:$0xff] %v226_v19  ;;  %v230_v21 = vld [vmem:[%s3393_s26 + $0x228] sm:$0xff]  ;;  %v232_v22 = vld [vmem:[%s3393_s26 + $0x230] sm:$0xff] }
  0x1a   : > { %229 = vst [vmem:[%s3398_s27 + $0xa0] sm:$0xff] %v228_v20  ;;  %v234_v23 = vld [vmem:[%s3393_s26 + $0x238] sm:$0xff]  ;;  %231 = vst [vmem:[%s3398_s27 + $0xa8] sm:$0xff] %v230_v21  ;;  %v236_v24 = vld [vmem:[%s3393_s26 + $0x300] sm:$0xff] }
  0x1b   : > { %233 = vst [vmem:[%s3398_s27 + $0xb0] sm:$0xff] %v232_v22  ;;  %235 = vst [vmem:[%s3398_s27 + $0xb8] sm:$0xff] %v234_v23  ;;  %v238_v25 = vld [vmem:[%s3393_s26 + $0x308] sm:$0xff]  ;;  %v240_v26 = vld [vmem:[%s3393_s26 + $0x310] sm:$0xff] }
  0x1c   : > { %237 = vst [vmem:[%s3398_s27 + $0xc0] sm:$0xff] %v236_v24  ;;  %239 = vst [vmem:[%s3398_s27 + $0xc8] sm:$0xff] %v238_v25  ;;  %v242_v27 = vld [vmem:[%s3393_s26 + $0x318] sm:$0xff]  ;;  %v244_v28 = vld [vmem:[%s3393_s26 + $0x320] sm:$0xff] }
  0x1d   : > { %241 = vst [vmem:[%s3398_s27 + $0xd0] sm:$0xff] %v240_v26  ;;  %v246_v29 = vld [vmem:[%s3393_s26 + $0x328] sm:$0xff]  ;;  %243 = vst [vmem:[%s3398_s27 + $0xd8] sm:$0xff] %v242_v27  ;;  %v248_v30 = vld [vmem:[%s3393_s26 + $0x330] sm:$0xff] }
  0x1e   : > { %245 = vst [vmem:[%s3398_s27 + $0xe0] sm:$0xff] %v244_v28  ;;  %247 = vst [vmem:[%s3398_s27 + $0xe8] sm:$0xff] %v246_v29  ;;  %v250_v31 = vld [vmem:[%s3393_s26 + $0x338] sm:$0xff]  ;;  %v252_v32 = vld [vmem:[%s3393_s26 + $0x400] sm:$0xff] }
  0x1f   : > { %249 = vst [vmem:[%s3398_s27 + $0xf0] sm:$0xff] %v248_v30  ;;  %251 = vst [vmem:[%s3398_s27 + $0xf8] sm:$0xff] %v250_v31  ;;  %v254_v33 = vld [vmem:[%s3393_s26 + $0x408] sm:$0xff]  ;;  %v256_v34 = vld [vmem:[%s3393_s26 + $0x410] sm:$0xff] }
  0x20   : > { %253 = vst [vmem:[%s3398_s27 + $0x100] sm:$0xff] %v252_v32  ;;  %v258_v35 = vld [vmem:[%s3393_s26 + $0x418] sm:$0xff]  ;;  %255 = vst [vmem:[%s3398_s27 + $0x108] sm:$0xff] %v254_v33  ;;  %v260_v36 = vld [vmem:[%s3393_s26 + $0x420] sm:$0xff] }
  0x21   : > { %257 = vst [vmem:[%s3398_s27 + $0x110] sm:$0xff] %v256_v34  ;;  %259 = vst [vmem:[%s3398_s27 + $0x118] sm:$0xff] %v258_v35  ;;  %v262_v37 = vld [vmem:[%s3393_s26 + $0x428] sm:$0xff]  ;;  %v264_v38 = vld [vmem:[%s3393_s26 + $0x430] sm:$0xff] }
  0x22   : > { %261 = vst [vmem:[%s3398_s27 + $0x120] sm:$0xff] %v260_v36  ;;  %263 = vst [vmem:[%s3398_s27 + $0x128] sm:$0xff] %v262_v37  ;;  %v266_v39 = vld [vmem:[%s3393_s26 + $0x438] sm:$0xff]  ;;  %v268_v40 = vld [vmem:[%s3393_s26 + $0x500] sm:$0xff] }
  0x23   : > { %265 = vst [vmem:[%s3398_s27 + $0x130] sm:$0xff] %v264_v38  ;;  %v270_v41 = vld [vmem:[%s3393_s26 + $0x508] sm:$0xff]  ;;  %267 = vst [vmem:[%s3398_s27 + $0x138] sm:$0xff] %v266_v39  ;;  %v272_v42 = vld [vmem:[%s3393_s26 + $0x510] sm:$0xff] }
  0x24   : > { %269 = vst [vmem:[%s3398_s27 + $0x140] sm:$0xff] %v268_v40  ;;  %271 = vst [vmem:[%s3398_s27 + $0x148] sm:$0xff] %v270_v41  ;;  %v274_v43 = vld [vmem:[%s3393_s26 + $0x518] sm:$0xff]  ;;  %v276_v44 = vld [vmem:[%s3393_s26 + $0x520] sm:$0xff] }
  0x25   : > { %273 = vst [vmem:[%s3398_s27 + $0x150] sm:$0xff] %v272_v42  ;;  %275 = vst [vmem:[%s3398_s27 + $0x158] sm:$0xff] %v274_v43  ;;  %v278_v45 = vld [vmem:[%s3393_s26 + $0x528] sm:$0xff]  ;;  %v280_v46 = vld [vmem:[%s3393_s26 + $0x530] sm:$0xff] }
  0x26   : > { %277 = vst [vmem:[%s3398_s27 + $0x160] sm:$0xff] %v276_v44  ;;  %v282_v47 = vld [vmem:[%s3393_s26 + $0x538] sm:$0xff]  ;;  %279 = vst [vmem:[%s3398_s27 + $0x168] sm:$0xff] %v278_v45  ;;  %v284_v48 = vld [vmem:[%s3393_s26 + $0x600] sm:$0xff] }
  0x27   : > { %281 = vst [vmem:[%s3398_s27 + $0x170] sm:$0xff] %v280_v46  ;;  %283 = vst [vmem:[%s3398_s27 + $0x178] sm:$0xff] %v282_v47  ;;  %v286_v49 = vld [vmem:[%s3393_s26 + $0x608] sm:$0xff]  ;;  %v288_v50 = vld [vmem:[%s3393_s26 + $0x610] sm:$0xff] }
  0x28   : > { %285 = vst [vmem:[%s3398_s27 + $0x180] sm:$0xff] %v284_v48  ;;  %287 = vst [vmem:[%s3398_s27 + $0x188] sm:$0xff] %v286_v49  ;;  %v290_v51 = vld [vmem:[%s3393_s26 + $0x618] sm:$0xff]  ;;  %v292_v52 = vld [vmem:[%s3393_s26 + $0x620] sm:$0xff] }
  0x29   : > { %289 = vst [vmem:[%s3398_s27 + $0x190] sm:$0xff] %v288_v50  ;;  %v294_v53 = vld [vmem:[%s3393_s26 + $0x628] sm:$0xff]  ;;  %291 = vst [vmem:[%s3398_s27 + $0x198] sm:$0xff] %v290_v51  ;;  %v296_v54 = vld [vmem:[%s3393_s26 + $0x630] sm:$0xff] }
  0x2a   : > { %293 = vst [vmem:[%s3398_s27 + $0x1a0] sm:$0xff] %v292_v52  ;;  %295 = vst [vmem:[%s3398_s27 + $0x1a8] sm:$0xff] %v294_v53  ;;  %v298_v55 = vld [vmem:[%s3393_s26 + $0x638] sm:$0xff]  ;;  %v300_v56 = vld [vmem:[%s3393_s26 + $0x700] sm:$0xff] }
  0x2b   : > { %297 = vst [vmem:[%s3398_s27 + $0x1b0] sm:$0xff] %v296_v54  ;;  %299 = vst [vmem:[%s3398_s27 + $0x1b8] sm:$0xff] %v298_v55  ;;  %v302_v57 = vld [vmem:[%s3393_s26 + $0x708] sm:$0xff]  ;;  %v304_v58 = vld [vmem:[%s3393_s26 + $0x710] sm:$0xff] }
  0x2c   : > { %301 = vst [vmem:[%s3398_s27 + $0x1c0] sm:$0xff] %v300_v56  ;;  %v306_v59 = vld [vmem:[%s3393_s26 + $0x718] sm:$0xff]  ;;  %303 = vst [vmem:[%s3398_s27 + $0x1c8] sm:$0xff] %v302_v57  ;;  %v308_v60 = vld [vmem:[%s3393_s26 + $0x720] sm:$0xff] }
  0x2d   : > { %305 = vst [vmem:[%s3398_s27 + $0x1d0] sm:$0xff] %v304_v58  ;;  %307 = vst [vmem:[%s3398_s27 + $0x1d8] sm:$0xff] %v306_v59  ;;  %v310_v61 = vld [vmem:[%s3393_s26 + $0x728] sm:$0xff]  ;;  %v312_v62 = vld [vmem:[%s3393_s26 + $0x730] sm:$0xff] }
  0x2e   : > { %309 = vst [vmem:[%s3398_s27 + $0x1e0] sm:$0xff] %v308_v60  ;;  %311 = vst [vmem:[%s3398_s27 + $0x1e8] sm:$0xff] %v310_v61  ;;  %v314_v63 = vld [vmem:[%s3393_s26 + $0x738] sm:$0xff] }
  0x2f   : > { %313 = vst [vmem:[%s3398_s27 + $0x1f0] sm:$0xff] %v312_v62  ;;  %315 = vst [vmem:[%s3398_s27 + $0x1f8] sm:$0xff] %v314_v63 }
  0x30 PF: > { %p2557_p6 = scmp.ge.s32.totalorder %s3327_s16, 1  ;;  %p332_p7 = scmp.lt.s32.totalorder %s3327_s16, 5 }
  0x32   : > { %p333_p8 = pnand %p2557_p6, %p332_p7 }
  0x34   : > { %336 = sbr.rel (%p333_p8) target bundleno = 447 (0x1bf), region = 51 }
  0x39   : > { %s339_s28 = sand.u32 1, %s3311_s12   ;;  %s2559_s29 = sshll.u32 %s3319_s14, 8 }
  0x3a   : > { %s2558_s30 = sshll.u32 %s339_s28, 9  ;;  %p379_p9 = scmp.lt.s32.totalorder %s2559_s29, 1023 }
  0x3b   : > { %s3534_s8 = scalar_lea.vmem [#allocation3], %s2558_s30  ;;  %p2561_p10 = scmp.ne.s32.totalorder %s3319_s14, 0 }
  0x3c   : > { %s3957_s29 = smov (!%p379_p9, %s2559_s29), 1023 }
  0x3d   : > { %s2560_s4 = sshll.u32 %s3957_s29, 2  ;;  %403 = sbr.rel (%p2561_p10) target bundleno = 71 (0x47), region = 59 }
  0x3e   : > { %s3532_s7 = scalar_lea.vmem %s3917_s1, %s2560_s4 }
  0x42   : > { %v3329_v0 = vmov 0.0  }
  0x43   : > { %404 = vst [vmem:[#allocation2 + $0x30] sm:$0xff] %v3329_v0  ;;  %405 = vst [vmem:[#allocation2] sm:$0xff] %v3329_v0 }
  0x44   : > { %406 = vst [vmem:[#allocation2 + $0x18] sm:$0xff] %v3329_v0  ;;  %407 = vst [vmem:[#allocation2 + $0x10] sm:$0xff] %v3329_v0 }
  0x45   : > { %408 = vst [vmem:[#allocation2 + $0x8] sm:$0xff] %v3329_v0  ;;  %409 = vst [vmem:[#allocation2 + $0x20] sm:$0xff] %v3329_v0 }
  0x46   : > { %410 = vst [vmem:[#allocation2 + $0x28] sm:$0xff] %v3329_v0  ;;  %411 = vst [vmem:[#allocation2 + $0x38] sm:$0xff] %v3329_v0 }
  0x47 PF: > { %v3161_v1 = vld [vmem:[%s3532_s7 + $0x78] sm:$0xff]   ;;  %v3165_v5 = vld [vmem:[%s3532_s7 + $0x70] sm:$0xff]   ;;  %v3169_v9 = vld [vmem:[%s3532_s7 + $0x68] sm:$0xff]   ;;  %p2754_p11 = scmp.ne.s32.totalorder %s3319_s14, 3 }
  0x48   : > { %v3162_v2 = vld [vmem:[%s3532_s7 + $0xf8] sm:$0xff]   ;;  %2800 = vmatprep.subr.bf16.mxu0 %v3161_v1  ;;  %v3166_v6 = vld [vmem:[%s3532_s7 + $0xf0] sm:$0xff]   ;;  %v3170_v10 = vld [vmem:[%s3532_s7 + $0xe8] sm:$0xff]  }
  0x49   : > { %v3163_v3 = vld [vmem:[%s3532_s7 + $0x38] sm:$0xff]   ;;  %2840 = vmatprep.subr.bf16.mxu1 %v3162_v2  ;;  %v3167_v7 = vld [vmem:[%s3532_s7 + $0x30] sm:$0xff]   ;;  %v3171_v11 = vld [vmem:[%s3532_s7 + $0x28] sm:$0xff]  }
  0x4a   : > { %v3164_v4 = vld [vmem:[%s3532_s7 + $0xb8] sm:$0xff]   ;;  %2801 = vmatpush3.bf16.msra.mxu0 %v3163_v3  ;;  %v3168_v8 = vld [vmem:[%s3532_s7 + $0xb0] sm:$0xff]   ;;  %v3172_v12 = vld [vmem:[%s3532_s7 + $0xa8] sm:$0xff]  }
  0x4b   : > { %2841 = vmatpush3.bf16.msra.mxu1 %v3164_v4  ;;  %2802 = vmatprep.subr.bf16.mxu0 %v3165_v5  ;;  %v3173_v13 = vld [vmem:[%s3532_s7 + $0x60] sm:$0xff]   ;;  %v3177_v17 = vld [vmem:[%s3532_s7 + $0x58] sm:$0xff]   ;;  %v3181_v21 = vld [vmem:[%s3532_s7 + $0x50] sm:$0xff]  }
  0x4c   : > { %2842 = vmatprep.subr.bf16.mxu1 %v3166_v6  ;;  %v3174_v14 = vld [vmem:[%s3532_s7 + $0xe0] sm:$0xff]   ;;  %v3178_v18 = vld [vmem:[%s3532_s7 + $0xd8] sm:$0xff]   ;;  %v3182_v22 = vld [vmem:[%s3532_s7 + $0xd0] sm:$0xff]  }
  0x4d   : > { %v3175_v15 = vld [vmem:[%s3532_s7 + $0x20] sm:$0xff]   ;;  %v3179_v19 = vld [vmem:[%s3532_s7 + $0x18] sm:$0xff]   ;;  %v3183_v23 = vld [vmem:[%s3532_s7 + $0x10] sm:$0xff]  }
  0x4e   : > { %2803 = vmatpush3.bf16.msra.mxu0 %v3167_v7  ;;  %v3176_v16 = vld [vmem:[%s3532_s7 + $0xa0] sm:$0xff]   ;;  %v3180_v20 = vld [vmem:[%s3532_s7 + $0x98] sm:$0xff]   ;;  %v3184_v24 = vld [vmem:[%s3532_s7 + $0x90] sm:$0xff]  }
  0x4f   : > { %2843 = vmatpush3.bf16.msra.mxu1 %v3168_v8  ;;  %2804 = vmatprep.subr.bf16.mxu0 %v3169_v9  ;;  %v3185_v25 = vld [vmem:[%s3532_s7 + $0x48] sm:$0xff]   ;;  %v3189_v29 = vld [vmem:[%s3532_s7 + $0x40] sm:$0xff]   ;;  %v3193_v41 = vld [vmem:[%s3532_s7 + $0x178] sm:$0xff]  }
  0x50   : > { %2844 = vmatprep.subr.bf16.mxu1 %v3170_v10  ;;  %v3186_v26 = vld [vmem:[%s3532_s7 + $0xc8] sm:$0xff]   ;;  %v3190_v30 = vld [vmem:[%s3532_s7 + $0xc0] sm:$0xff]   ;;  %v3194_v42 = vld [vmem:[%s3532_s7 + $0x1f8] sm:$0xff]  }
  0x51   : > { %v3187_v27 = vld [vmem:[%s3532_s7 + $0x8] sm:$0xff]   ;;  %v3191_v31 = vld [vmem:[%s3532_s7] sm:$0xff]   ;;  %v3195_v43 = vld [vmem:[%s3532_s7 + $0x138] sm:$0xff]  }
  0x52   : > { %2805 = vmatpush3.bf16.msra.mxu0 %v3171_v11  ;;  %v3188_v28 = vld [vmem:[%s3532_s7 + $0x88] sm:$0xff]   ;;  %v3192_v32 = vld [vmem:[%s3532_s7 + $0x80] sm:$0xff]   ;;  %v3196_v44 = vld [vmem:[%s3532_s7 + $0x1b8] sm:$0xff]  }
  0x53   : > { %2845 = vmatpush3.bf16.msra.mxu1 %v3172_v12  ;;  %2806 = vmatprep.subr.bf16.mxu0 %v3173_v13  ;;  %v420_v33 = vld [vmem:[%s3534_s8] sm:$0xff]  ;;  %v421_v35 = vld [vmem:[%s3534_s8 + $0x8] sm:$0xff]  ;;  %v3197_v45 = vld [vmem:[%s3532_s7 + $0x170] sm:$0xff]  }
  0x54   : > { %2846 = vmatprep.subr.bf16.mxu1 %v3174_v14  ;;  %v428_v34 = vld [vmem:[%s3534_s8 + $0x40] sm:$0xff]  ;;  %v429_v38 = vld [vmem:[%s3534_s8 + $0x48] sm:$0xff]  ;;  %v3198_v46 = vld [vmem:[%s3532_s7 + $0x1f0] sm:$0xff]  }
  0x55   : > { %v2562_v36 = vcombine.low %v420_v33, %v428_v34  ;;  %v2563_v37 = vcombine.high %v420_v33, %v428_v34  ;;  %v2564_v39 = vcombine.low %v421_v35, %v429_v38  ;;  %v2565_v40 = vcombine.high %v421_v35, %v429_v38  ;;  %v3199_v47 = vld [vmem:[%s3532_s7 + $0x130] sm:$0xff]   ;;  %v436_v49 = vld [vmem:[%s3534_s8 + $0x80] sm:$0xff]  ;;  %v437_v52 = vld [vmem:[%s3534_s8 + $0x88] sm:$0xff] }
  0x56   : > { %2807 = vmatpush3.bf16.msra.mxu0 %v3175_v15  ;;  %v3200_v48 = vld [vmem:[%s3532_s7 + $0x1b0] sm:$0xff]   ;;  %v444_v50 = vld [vmem:[%s3534_s8 + $0xc0] sm:$0xff]  ;;  %v445_v53 = vld [vmem:[%s3534_s8 + $0xc8] sm:$0xff] }
  0x57   : > { %2847 = vmatpush3.bf16.msra.mxu1 %v3176_v16  ;;  %2808 = vmatprep.subr.bf16.mxu0 %v3177_v17  ;;  %v2579_v51 = vcombine.high %v436_v49, %v444_v50  ;;  %v2578_v54 = vcombine.low %v436_v49, %v444_v50  ;;  %v2581_v55 = vcombine.high %v437_v52, %v445_v53  ;;  %v3201_v57 = vld [vmem:[%s3532_s7 + $0x168] sm:$0xff]   ;;  %v3205_v61 = vld [vmem:[%s3532_s7 + $0x160] sm:$0xff]   ;;  %v3209_v9 = vld [vmem:[%s3532_s7 + $0x158] sm:$0xff]  }
  0x58   : > { %2848 = vmatprep.subr.bf16.mxu1 %v3178_v18  ;;  %1860 = vmatprep.mubr.bf16.mxu0 %v2563_v37  ;;  %v2580_v56 = vcombine.low %v437_v52, %v445_v53  ;;  %v3202_v58 = vld [vmem:[%s3532_s7 + $0x1e8] sm:$0xff]   ;;  %v3206_v62 = vld [vmem:[%s3532_s7 + $0x1e0] sm:$0xff]   ;;  %v3210_v10 = vld [vmem:[%s3532_s7 + $0x1d8] sm:$0xff]  }
  0x59   : > { %1925 = vmatprep.mubr.bf16.mxu1 %v2565_v40  ;;  %v3203_v59 = vld [vmem:[%s3532_s7 + $0x128] sm:$0xff]   ;;  %v3207_v63 = vld [vmem:[%s3532_s7 + $0x120] sm:$0xff]   ;;  %v3211_v11 = vld [vmem:[%s3532_s7 + $0x118] sm:$0xff]  }
  0x5a   : > { %2809 = vmatpush3.bf16.msra.mxu0 %v3179_v19  ;;  %v3204_v60 = vld [vmem:[%s3532_s7 + $0x1a8] sm:$0xff]   ;;  %v3208_v0 = vld [vmem:[%s3532_s7 + $0x1a0] sm:$0xff]   ;;  %v3212_v12 = vld [vmem:[%s3532_s7 + $0x198] sm:$0xff]  }
  0x5b   : > { %2849 = vmatpush3.bf16.msra.mxu1 %v3180_v20  ;;  %2810 = vmatprep.subr.bf16.mxu0 %v3181_v21  ;;  %v452_v1 = vld [vmem:[%s3534_s8 + $0x100] sm:$0xff]  ;;  %v453_v3 = vld [vmem:[%s3534_s8 + $0x108] sm:$0xff]  ;;  %v3213_v13 = vld [vmem:[%s3532_s7 + $0x150] sm:$0xff]  }
  0x5c   : > { %2850 = vmatprep.subr.bf16.mxu1 %v3182_v22  ;;  %v460_v2 = vld [vmem:[%s3534_s8 + $0x140] sm:$0xff]  ;;  %v461_v4 = vld [vmem:[%s3534_s8 + $0x148] sm:$0xff]  ;;  %v3214_v14 = vld [vmem:[%s3532_s7 + $0x1d0] sm:$0xff]  }
  0x5d   : > { %v2595_v5 = vcombine.high %v452_v1, %v460_v2  ;;  %v2597_v6 = vcombine.high %v453_v3, %v461_v4  ;;  %v2594_v7 = vcombine.low %v452_v1, %v460_v2  ;;  %v2596_v8 = vcombine.low %v453_v3, %v461_v4  ;;  %v3215_v15 = vld [vmem:[%s3532_s7 + $0x110] sm:$0xff]   ;;  %v468_v17 = vld [vmem:[%s3534_s8 + $0x180] sm:$0xff]  ;;  %v469_v19 = vld [vmem:[%s3534_s8 + $0x188] sm:$0xff] }
  0x5e   : > { %2811 = vmatpush3.bf16.msra.mxu0 %v3183_v23  ;;  %v3216_v16 = vld [vmem:[%s3532_s7 + $0x190] sm:$0xff]   ;;  %v476_v18 = vld [vmem:[%s3534_s8 + $0x1c0] sm:$0xff]  ;;  %v477_v21 = vld [vmem:[%s3534_s8 + $0x1c8] sm:$0xff] }
  0x5f   : > { %2851 = vmatpush3.bf16.msra.mxu1 %v3184_v24  ;;  %2812 = vmatprep.subr.bf16.mxu0 %v3185_v25  ;;  %v2611_v20 = vcombine.high %v468_v17, %v476_v18  ;;  %v2610_v22 = vcombine.low %v468_v17, %v476_v18  ;;  %v2613_v23 = vcombine.high %v469_v19, %v477_v21  ;;  %v3217_v25 = vld [vmem:[%s3532_s7 + $0x148] sm:$0xff]   ;;  %v422_v33 = vld [vmem:[%s3534_s8 + $0x10] sm:$0xff]  ;;  %v423_v37 = vld [vmem:[%s3534_s8 + $0x18] sm:$0xff] }
  0x60   : > { %2852 = vmatprep.subr.bf16.mxu1 %v3186_v26  ;;  %v2612_v24 = vcombine.low %v469_v19, %v477_v21  ;;  %v3218_v26 = vld [vmem:[%s3532_s7 + $0x1c8] sm:$0xff]   ;;  %v430_v34 = vld [vmem:[%s3534_s8 + $0x50] sm:$0xff]  ;;  %v431_v38 = vld [vmem:[%s3534_s8 + $0x58] sm:$0xff] }
  0x61   : > { %v2566_v35 = vcombine.low %v422_v33, %v430_v34  ;;  %v2569_v40 = vcombine.high %v423_v37, %v431_v38  ;;  %v438_v49 = vld [vmem:[%s3534_s8 + $0x90] sm:$0xff]  ;;  %v447_v52 = vld [vmem:[%s3534_s8 + $0xd8] sm:$0xff] }
  0x62   : > { %2813 = vmatpush3.bf16.msra.mxu0 %v3187_v27  ;;  %v3219_v27 = vld [vmem:[%s3532_s7 + $0x108] sm:$0xff]   ;;  %v446_v50 = vld [vmem:[%s3534_s8 + $0xd0] sm:$0xff]  ;;  %v455_v3 = vld [vmem:[%s3534_s8 + $0x118] sm:$0xff] }
  0x63   : > { %2853 = vmatpush3.bf16.msra.mxu1 %v3188_v28  ;;  %2814 = vmatprep.subr.bf16.mxu0 %v3189_v29  ;;  %v3220_v28 = vld [vmem:[%s3532_s7 + $0x188] sm:$0xff]   ;;  %v3221_v29 = vld [vmem:[%s3532_s7 + $0x140] sm:$0xff]   ;;  %v2583_v53 = vcombine.high %v438_v49, %v446_v50  ;;  %v454_v1 = vld [vmem:[%s3534_s8 + $0x110] sm:$0xff] }
  0x64   : > { %2854 = vmatprep.subr.bf16.mxu1 %v3190_v30  ;;  %v3222_v30 = vld [vmem:[%s3532_s7 + $0x1c0] sm:$0xff]   ;;  %v462_v2 = vld [vmem:[%s3534_s8 + $0x150] sm:$0xff]  ;;  %v479_v21 = vld [vmem:[%s3534_s8 + $0x1d8] sm:$0xff] }
  0x65   : > { %v2599_v4 = vcombine.high %v454_v1, %v462_v2  ;;  %v470_v17 = vld [vmem:[%s3534_s8 + $0x190] sm:$0xff] }
  0x66   : > { %2815 = vmatpush3.bf16.msra.mxu0 %v3191_v31  ;;  %v3223_v31 = vld [vmem:[%s3532_s7 + $0x100] sm:$0xff]   ;;  %v478_v18 = vld [vmem:[%s3534_s8 + $0x1d0] sm:$0xff] }
  0x67   : > { %2855 = vmatpush3.bf16.msra.mxu1 %v3192_v32  ;;  %2880 = vmatprep.subr.bf16.mxu0 %v3193_v41  ;;  %v3224_v32 = vld [vmem:[%s3532_s7 + $0x180] sm:$0xff]   ;;  %v3225_v41 = vld [vmem:[%s3532_s7 + $0x278] sm:$0xff]   ;;  %v2615_v19 = vcombine.high %v470_v17, %v478_v18 }
  0x68   : > { %2920 = vmatprep.subr.bf16.mxu1 %v3194_v42  ;;  %v3226_v42 = vld [vmem:[%s3532_s7 + $0x2f8] sm:$0xff]  }
  0x69   : > { %1861 = vmatmul.mubr.bf16.vlgmr.msra.gmra.mxu0 %v2562_v36  ;;  %v2567_v36 = vcombine.high %v422_v33, %v430_v34  ;;  %v424_v33 = vld [vmem:[%s3534_s8 + $0x20] sm:$0xff] }
  0x6a   : > { %1926 = vmatmul.mubr.bf16.vlgmr.msra.gmra.mxu1 %v2564_v39  ;;  %2881 = vmatpush3.bf16.msra.mxu0 %v3195_v43  ;;  %v2568_v39 = vcombine.low %v423_v37, %v431_v38  ;;  %v3227_v43 = vld [vmem:[%s3532_s7 + $0x238] sm:$0xff]   ;;  %v432_v34 = vld [vmem:[%s3534_s8 + $0x60] sm:$0xff] }
  0x6b   : > { %2921 = vmatpush3.bf16.msra.mxu1 %v3196_v44  ;;  %2882 = vmatprep.subr.bf16.mxu0 %v3197_v45  ;;  %v3228_v44 = vld [vmem:[%s3532_s7 + $0x2b8] sm:$0xff]   ;;  %v3229_v45 = vld [vmem:[%s3532_s7 + $0x270] sm:$0xff]   ;;  %v2570_v37 = vcombine.low %v424_v33, %v432_v34  ;;  %v2571_v38 = vcombine.high %v424_v33, %v432_v34 }
  0x6c   : > { %2922 = vmatprep.subr.bf16.mxu1 %v3198_v46  ;;  %1868 = vmatprep.mubr.bf16.mxu0 %v2579_v51  ;;  %v3230_v46 = vld [vmem:[%s3532_s7 + $0x2f0] sm:$0xff]   ;;  %v439_v51 = vld [vmem:[%s3534_s8 + $0x98] sm:$0xff] }
  0x6d   : > { %1933 = vmatprep.mubr.bf16.mxu1 %v2581_v55  ;;  %v2582_v55 = vcombine.low %v438_v49, %v446_v50  ;;  %v440_v49 = vld [vmem:[%s3534_s8 + $0xa0] sm:$0xff]  ;;  %v426_v33 = vld [vmem:[%s3534_s8 + $0x30] sm:$0xff] }
  0x6e   : > { %2883 = vmatpush3.bf16.msra.mxu0 %v3199_v47  ;;  %v3231_v47 = vld [vmem:[%s3532_s7 + $0x230] sm:$0xff]   ;;  %v448_v50 = vld [vmem:[%s3534_s8 + $0xe0] sm:$0xff] }
  0x6f   : > { %2923 = vmatpush3.bf16.msra.mxu1 %v3200_v48  ;;  %2884 = vmatprep.subr.bf16.mxu0 %v3201_v57  ;;  %v3232_v48 = vld [vmem:[%s3532_s7 + $0x2b0] sm:$0xff]   ;;  %v3233_v57 = vld [vmem:[%s3532_s7 + $0x268] sm:$0xff]  }
  0x70   : > { %2924 = vmatprep.subr.bf16.mxu1 %v3202_v58  ;;  %v3234_v58 = vld [vmem:[%s3532_s7 + $0x2e8] sm:$0xff]   ;;  %v434_v34 = vld [vmem:[%s3534_s8 + $0x70] sm:$0xff] }
  0x71   : > { %1869 = vmatmul.mubr.bf16.gmra.mxu0 %v2578_v54  ;;  %v2585_v54 = vcombine.high %v439_v51, %v447_v52 }
  0x72   : > { %1934 = vmatmul.mubr.bf16.gmra.mxu1 %v2580_v56  ;;  %2885 = vmatpush3.bf16.msra.mxu0 %v3203_v59  ;;  %v2584_v56 = vcombine.low %v439_v51, %v447_v52  ;;  %v3235_v59 = vld [vmem:[%s3532_s7 + $0x228] sm:$0xff]   ;;  %v2587_v52 = vcombine.high %v440_v49, %v448_v50 }
  0x73   : > { %2925 = vmatpush3.bf16.msra.mxu1 %v3204_v60  ;;  %2886 = vmatprep.subr.bf16.mxu0 %v3205_v61  ;;  %v3236_v60 = vld [vmem:[%s3532_s7 + $0x2a8] sm:$0xff]   ;;  %v3237_v61 = vld [vmem:[%s3532_s7 + $0x260] sm:$0xff]  }
  0x74   : > { %2926 = vmatprep.subr.bf16.mxu1 %v3206_v62  ;;  %1876 = vmatprep.mubr.bf16.mxu0 %v2595_v5  ;;  %v3238_v62 = vld [vmem:[%s3532_s7 + $0x2e0] sm:$0xff]   ;;  %v463_v5 = vld [vmem:[%s3534_s8 + $0x158] sm:$0xff]  ;;  %v441_v51 = vld [vmem:[%s3534_s8 + $0xa8] sm:$0xff] }
  0x75   : > { %1941 = vmatprep.mubr.bf16.mxu1 %v2597_v6  ;;  %v2598_v6 = vcombine.low %v454_v1, %v462_v2  ;;  %v456_v1 = vld [vmem:[%s3534_s8 + $0x120] sm:$0xff] }
  0x76   : > { %2887 = vmatpush3.bf16.msra.mxu0 %v3207_v63  ;;  %v3239_v63 = vld [vmem:[%s3532_s7 + $0x220] sm:$0xff]  }
  0x77   : > { %2927 = vmatpush3.bf16.msra.mxu1 %v3208_v0  ;;  %2888 = vmatprep.subr.bf16.mxu0 %v3209_v9  ;;  %v3240_v0 = vld [vmem:[%s3532_s7 + $0x2a0] sm:$0xff]   ;;  %v3241_v9 = vld [vmem:[%s3532_s7 + $0x258] sm:$0xff]  }
  0x78   : > { %2928 = vmatprep.subr.bf16.mxu1 %v3210_v10  ;;  %v3242_v10 = vld [vmem:[%s3532_s7 + $0x2d8] sm:$0xff]   ;;  %v464_v2 = vld [vmem:[%s3534_s8 + $0x160] sm:$0xff] }
  0x79   : > { %1877 = vmatmul.mubr.bf16.gmra.mxu0 %v2594_v7  ;;  %v2601_v7 = vcombine.high %v455_v3, %v463_v5 }
  0x7a   : > { %1942 = vmatmul.mubr.bf16.gmra.mxu1 %v2596_v8  ;;  %2889 = vmatpush3.bf16.msra.mxu0 %v3211_v11  ;;  %v2600_v8 = vcombine.low %v455_v3, %v463_v5  ;;  %v3243_v11 = vld [vmem:[%s3532_s7 + $0x218] sm:$0xff]   ;;  %v2603_v3 = vcombine.high %v456_v1, %v464_v2  ;;  %v465_v5 = vld [vmem:[%s3534_s8 + $0x168] sm:$0xff] }
  0x7b   : > { %2929 = vmatpush3.bf16.msra.mxu1 %v3212_v12  ;;  %2890 = vmatprep.subr.bf16.mxu0 %v3213_v13  ;;  %v3244_v12 = vld [vmem:[%s3532_s7 + $0x298] sm:$0xff]   ;;  %v3245_v13 = vld [vmem:[%s3532_s7 + $0x250] sm:$0xff]  }
  0x7c   : > { %2930 = vmatprep.subr.bf16.mxu1 %v3214_v14  ;;  %1884 = vmatprep.mubr.bf16.mxu0 %v2611_v20  ;;  %v3246_v14 = vld [vmem:[%s3532_s7 + $0x2d0] sm:$0xff]   ;;  %v471_v20 = vld [vmem:[%s3534_s8 + $0x198] sm:$0xff] }
  0x7d   : > { %1949 = vmatprep.mubr.bf16.mxu1 %v2613_v23  ;;  %v2617_v23 = vcombine.high %v471_v20, %v479_v21 }
  0x7e   : > { %2891 = vmatpush3.bf16.msra.mxu0 %v3215_v15  ;;  %v3247_v15 = vld [vmem:[%s3532_s7 + $0x210] sm:$0xff]  }
  0x7f   : > { %2931 = vmatpush3.bf16.msra.mxu1 %v3216_v16  ;;  %2892 = vmatprep.subr.bf16.mxu0 %v3217_v25  ;;  %v3248_v16 = vld [vmem:[%s3532_s7 + $0x290] sm:$0xff]   ;;  %v3249_v25 = vld [vmem:[%s3532_s7 + $0x248] sm:$0xff]  }
  0x80   : > { %2932 = vmatprep.subr.bf16.mxu1 %v3218_v26  ;;  %v3250_v26 = vld [vmem:[%s3532_s7 + $0x2c8] sm:$0xff]  }
  0x81   : > { %1885 = vmatmul.mubr.bf16.gmra.mxu0 %v2610_v22  ;;  %v2614_v22 = vcombine.low %v470_v17, %v478_v18  ;;  %v472_v17 = vld [vmem:[%s3534_s8 + $0x1a0] sm:$0xff] }
  0x82   : > { %1950 = vmatmul.mubr.bf16.gmra.mxu1 %v2612_v24  ;;  %2893 = vmatpush3.bf16.msra.mxu0 %v3219_v27  ;;  %v2616_v24 = vcombine.low %v471_v20, %v479_v21  ;;  %v3251_v27 = vld [vmem:[%s3532_s7 + $0x208] sm:$0xff]   ;;  %v480_v18 = vld [vmem:[%s3534_s8 + $0x1e0] sm:$0xff] }
  0x83   : > { %2933 = vmatpush3.bf16.msra.mxu1 %v3220_v28  ;;  %2894 = vmatprep.subr.bf16.mxu0 %v3221_v29  ;;  %v3252_v28 = vld [vmem:[%s3532_s7 + $0x288] sm:$0xff]   ;;  %v3253_v29 = vld [vmem:[%s3532_s7 + $0x240] sm:$0xff]   ;;  %v2619_v21 = vcombine.high %v472_v17, %v480_v18 }
  0x84   : > { %2934 = vmatprep.subr.bf16.mxu1 %v3222_v30  ;;  %1990 = vmatprep.mubr.bf16.mxu0 %v2567_v36  ;;  %v3254_v30 = vld [vmem:[%s3532_s7 + $0x2c0] sm:$0xff]   ;;  %v433_v36 = vld [vmem:[%s3534_s8 + $0x68] sm:$0xff] }
  0x85   : > { %2055 = vmatprep.mubr.bf16.mxu1 %v2569_v40  ;;  %v481_v20 = vld [vmem:[%s3534_s8 + $0x1e8] sm:$0xff] }
  0x86   : > { %2895 = vmatpush3.bf16.msra.mxu0 %v3223_v31  ;;  %v3255_v31 = vld [vmem:[%s3532_s7 + $0x200] sm:$0xff]  }
  0x87   : > { %2935 = vmatpush3.bf16.msra.mxu1 %v3224_v32  ;;  %2960 = vmatprep.subr.bf16.mxu0 %v3225_v41  ;;  %v3256_v32 = vld [vmem:[%s3532_s7 + $0x280] sm:$0xff]   ;;  %v3257_v41 = vld [vmem:[%s3532_s7 + $0x378] sm:$0xff]  }
  0x88   : > { %3000 = vmatprep.subr.bf16.mxu1 %v3226_v42  ;;  %v3258_v42 = vld [vmem:[%s3532_s7 + $0x3f8] sm:$0xff]  }
  0x89   : > { %1991 = vmatmul.mubr.bf16.vlgmr.msra.gmra.mxu0 %v2566_v35  ;;  %v425_v35 = vld [vmem:[%s3534_s8 + $0x28] sm:$0xff] }
  0x8a   : > { %2056 = vmatmul.mubr.bf16.vlgmr.msra.gmra.mxu1 %v2568_v39  ;;  %2961 = vmatpush3.bf16.msra.mxu0 %v3227_v43  ;;  %v2572_v39 = vcombine.low %v425_v35, %v433_v36  ;;  %v2573_v40 = vcombine.high %v425_v35, %v433_v36  ;;  %v3259_v43 = vld [vmem:[%s3532_s7 + $0x338] sm:$0xff]   ;;  %v2574_v36 = vcombine.low %v426_v33, %v434_v34 }
  0x8b   : > { %3001 = vmatpush3.bf16.msra.mxu1 %v3228_v44  ;;  %2962 = vmatprep.subr.bf16.mxu0 %v3229_v45  ;;  %v3260_v44 = vld [vmem:[%s3532_s7 + $0x3b8] sm:$0xff]   ;;  %v3261_v45 = vld [vmem:[%s3532_s7 + $0x370] sm:$0xff]  }
  0x8c   : > { %3002 = vmatprep.subr.bf16.mxu1 %v3230_v46  ;;  %1998 = vmatprep.mubr.bf16.mxu0 %v2583_v53  ;;  %v3262_v46 = vld [vmem:[%s3532_s7 + $0x3f0] sm:$0xff]   ;;  %v449_v53 = vld [vmem:[%s3534_s8 + $0xe8] sm:$0xff]  ;;  %v427_v35 = vld [vmem:[%s3534_s8 + $0x38] sm:$0xff] }
  0x8d   : > { %2063 = vmatprep.mubr.bf16.mxu1 %v2585_v54  ;;  %v2586_v54 = vcombine.low %v440_v49, %v448_v50  ;;  %v459_v49 = vld [vmem:[%s3534_s8 + $0x138] sm:$0xff] }
  0x8e   : > { %2963 = vmatpush3.bf16.msra.mxu0 %v3231_v47  ;;  %v3263_v47 = vld [vmem:[%s3532_s7 + $0x330] sm:$0xff]   ;;  %v467_v50 = vld [vmem:[%s3534_s8 + $0x178] sm:$0xff] }
  0x8f   : > { %3003 = vmatpush3.bf16.msra.mxu1 %v3232_v48  ;;  %2964 = vmatprep.subr.bf16.mxu0 %v3233_v57  ;;  %v3264_v48 = vld [vmem:[%s3532_s7 + $0x3b0] sm:$0xff]   ;;  %v3265_v57 = vld [vmem:[%s3532_s7 + $0x368] sm:$0xff]  }
  0x90   : > { %3004 = vmatprep.subr.bf16.mxu1 %v3234_v58  ;;  %v3266_v58 = vld [vmem:[%s3532_s7 + $0x3e8] sm:$0xff]  }
  0x91   : > { %1999 = vmatmul.mubr.bf16.gmra.mxu0 %v2582_v55  ;;  %v2589_v55 = vcombine.high %v441_v51, %v449_v53 }
  0x92   : > { %2064 = vmatmul.mubr.bf16.gmra.mxu1 %v2584_v56  ;;  %2965 = vmatpush3.bf16.msra.mxu0 %v3235_v59  ;;  %v2588_v56 = vcombine.low %v441_v51, %v449_v53  ;;  %v3267_v59 = vld [vmem:[%s3532_s7 + $0x328] sm:$0xff]  }
  0x93   : > { %3005 = vmatpush3.bf16.msra.mxu1 %v3236_v60  ;;  %2966 = vmatprep.subr.bf16.mxu0 %v3237_v61  ;;  %v3268_v60 = vld [vmem:[%s3532_s7 + $0x3a8] sm:$0xff]   ;;  %v3269_v61 = vld [vmem:[%s3532_s7 + $0x360] sm:$0xff]  }
  0x94   : > { %3006 = vmatprep.subr.bf16.mxu1 %v3238_v62  ;;  %2006 = vmatprep.mubr.bf16.mxu0 %v2599_v4  ;;  %v3270_v62 = vld [vmem:[%s3532_s7 + $0x3e0] sm:$0xff]   ;;  %v457_v4 = vld [vmem:[%s3534_s8 + $0x128] sm:$0xff] }
  0x95   : > { %2071 = vmatprep.mubr.bf16.mxu1 %v2601_v7  ;;  %v2605_v7 = vcombine.high %v457_v4, %v465_v5 }
  0x96   : > { %2967 = vmatpush3.bf16.msra.mxu0 %v3239_v63  ;;  %v3271_v63 = vld [vmem:[%s3532_s7 + $0x320] sm:$0xff]  }
  0x97   : > { %3007 = vmatpush3.bf16.msra.mxu1 %v3240_v0  ;;  %2968 = vmatprep.subr.bf16.mxu0 %v3241_v9  ;;  %v3272_v0 = vld [vmem:[%s3532_s7 + $0x3a0] sm:$0xff]   ;;  %v3273_v9 = vld [vmem:[%s3532_s7 + $0x358] sm:$0xff]  }
  0x98   : > { %3008 = vmatprep.subr.bf16.mxu1 %v3242_v10  ;;  %v3274_v10 = vld [vmem:[%s3532_s7 + $0x3d8] sm:$0xff]  }
  0x99   : > { %2007 = vmatmul.mubr.bf16.gmra.mxu0 %v2598_v6  ;;  %v2602_v6 = vcombine.low %v456_v1, %v464_v2 }
  0x9a   : > { %2072 = vmatmul.mubr.bf16.gmra.mxu1 %v2600_v8  ;;  %2969 = vmatpush3.bf16.msra.mxu0 %v3243_v11  ;;  %v2604_v8 = vcombine.low %v457_v4, %v465_v5  ;;  %v3275_v11 = vld [vmem:[%s3532_s7 + $0x318] sm:$0xff]  }
  0x9b   : > { %3009 = vmatpush3.bf16.msra.mxu1 %v3244_v12  ;;  %2970 = vmatprep.subr.bf16.mxu0 %v3245_v13  ;;  %v3276_v12 = vld [vmem:[%s3532_s7 + $0x398] sm:$0xff]   ;;  %v3277_v13 = vld [vmem:[%s3532_s7 + $0x350] sm:$0xff]  }
  0x9c   : > { %3010 = vmatprep.subr.bf16.mxu1 %v3246_v14  ;;  %2014 = vmatprep.mubr.bf16.mxu0 %v2615_v19  ;;  %v3278_v14 = vld [vmem:[%s3532_s7 + $0x3d0] sm:$0xff]   ;;  %v473_v19 = vld [vmem:[%s3534_s8 + $0x1a8] sm:$0xff] }
  0x9d   : > { %2079 = vmatprep.mubr.bf16.mxu1 %v2617_v23  ;;  %v2618_v23 = vcombine.low %v472_v17, %v480_v18 }
  0x9e   : > { %2971 = vmatpush3.bf16.msra.mxu0 %v3247_v15  ;;  %v3279_v15 = vld [vmem:[%s3532_s7 + $0x310] sm:$0xff]  }
  0x9f   : > { %3011 = vmatpush3.bf16.msra.mxu1 %v3248_v16  ;;  %2972 = vmatprep.subr.bf16.mxu0 %v3249_v25  ;;  %v3280_v16 = vld [vmem:[%s3532_s7 + $0x390] sm:$0xff]   ;;  %v3281_v25 = vld [vmem:[%s3532_s7 + $0x348] sm:$0xff]  }
  0xa0   : > { %3012 = vmatprep.subr.bf16.mxu1 %v3250_v26  ;;  %v3282_v26 = vld [vmem:[%s3532_s7 + $0x3c8] sm:$0xff]  }
  0xa1   : > { %2015 = vmatmul.mubr.bf16.gmra.mxu0 %v2614_v22  ;;  %v2621_v22 = vcombine.high %v473_v19, %v481_v20 }
  0xa2   : > { %2080 = vmatmul.mubr.bf16.gmra.mxu1 %v2616_v24  ;;  %2973 = vmatpush3.bf16.msra.mxu0 %v3251_v27  ;;  %v2620_v24 = vcombine.low %v473_v19, %v481_v20  ;;  %v3283_v27 = vld [vmem:[%s3532_s7 + $0x308] sm:$0xff]  }
  0xa3   : > { %3013 = vmatpush3.bf16.msra.mxu1 %v3252_v28  ;;  %2974 = vmatprep.subr.bf16.mxu0 %v3253_v29  ;;  %v3284_v28 = vld [vmem:[%s3532_s7 + $0x388] sm:$0xff]   ;;  %v3285_v29 = vld [vmem:[%s3532_s7 + $0x340] sm:$0xff]  }
  0xa4   : > { %3014 = vmatprep.subr.bf16.mxu1 %v3254_v30  ;;  %2120 = vmatprep.mubr.bf16.mxu0 %v2571_v38  ;;  %v3286_v30 = vld [vmem:[%s3532_s7 + $0x3c0] sm:$0xff]   ;;  %v435_v38 = vld [vmem:[%s3534_s8 + $0x78] sm:$0xff] }
  0xa5   : > { %2185 = vmatprep.mubr.bf16.mxu1 %v2573_v40  ;;  %v450_v40 = vld [vmem:[%s3534_s8 + $0xf0] sm:$0xff] }
  0xa6   : > { %2975 = vmatpush3.bf16.msra.mxu0 %v3255_v31  ;;  %v3287_v31 = vld [vmem:[%s3532_s7 + $0x300] sm:$0xff]  }
  0xa7   : > { %3015 = vmatpush3.bf16.msra.mxu1 %v3256_v32  ;;  %3040 = vmatprep.subr.bf16.mxu0 %v3257_v41  ;;  %v3288_v32 = vld [vmem:[%s3532_s7 + $0x380] sm:$0xff]   ;;  %v2576_v41 = vcombine.low %v427_v35, %v435_v38 }
  0xa8   : > { %3080 = vmatprep.subr.bf16.mxu1 %v3258_v42  ;;  %v2577_v42 = vcombine.high %v427_v35, %v435_v38 }
  0xa9   : > { %2121 = vmatmul.mubr.bf16.vlgmr.msra.gmra.mxu0 %v2570_v37  ;;  %v2575_v37 = vcombine.high %v426_v33, %v434_v34 }
  0xaa   : > { %2186 = vmatmul.mubr.bf16.vlgmr.msra.gmra.mxu1 %v2572_v39  ;;  %3041 = vmatpush3.bf16.msra.mxu0 %v3259_v43  ;;  %v442_v39 = vld [vmem:[%s3534_s8 + $0xb0] sm:$0xff] }
  0xab   : > { %3081 = vmatpush3.bf16.msra.mxu1 %v3260_v44  ;;  %3042 = vmatprep.subr.bf16.mxu0 %v3261_v45  ;;  %v2591_v43 = vcombine.high %v442_v39, %v450_v40  ;;  %v443_v44 = vld [vmem:[%s3534_s8 + $0xb8] sm:$0xff]  ;;  %v2590_v51 = vcombine.low %v442_v39, %v450_v40 }
  0xac   : > { %3082 = vmatprep.subr.bf16.mxu1 %v3262_v46  ;;  %2128 = vmatprep.mubr.bf16.mxu0 %v2587_v52  ;;  %v451_v45 = vld [vmem:[%s3534_s8 + $0xf8] sm:$0xff] }
  0xad   : > { %2193 = vmatprep.mubr.bf16.mxu1 %v2589_v55  ;;  %v2593_v46 = vcombine.high %v443_v44, %v451_v45  ;;  %v2592_v52 = vcombine.low %v443_v44, %v451_v45  ;;  %v474_v55 = vld [vmem:[%s3534_s8 + $0x1b0] sm:$0xff] }
  0xae   : > { %3043 = vmatpush3.bf16.msra.mxu0 %v3263_v47  ;;  %v458_v47 = vld [vmem:[%s3534_s8 + $0x130] sm:$0xff] }
  0xaf   : > { %3083 = vmatpush3.bf16.msra.mxu1 %v3264_v48  ;;  %3044 = vmatprep.subr.bf16.mxu0 %v3265_v57  ;;  %v466_v48 = vld [vmem:[%s3534_s8 + $0x170] sm:$0xff]  ;;  %v475_v57 = vld [vmem:[%s3534_s8 + $0x1b8] sm:$0xff] }
  0xb0   : > { %3084 = vmatprep.subr.bf16.mxu1 %v3266_v58  ;;  %v2607_v53 = vcombine.high %v458_v47, %v466_v48  ;;  %v483_v58 = vld [vmem:[%s3534_s8 + $0x1f8] sm:$0xff] }
  0xb1   : > { %2129 = vmatmul.mubr.bf16.gmra.mxu0 %v2586_v54  ;;  %v2609_v54 = vcombine.high %v459_v49, %v467_v50 }
  0xb2   : > { %2194 = vmatmul.mubr.bf16.gmra.mxu1 %v2588_v56  ;;  %3045 = vmatpush3.bf16.msra.mxu0 %v3267_v59  ;;  %v482_v56 = vld [vmem:[%s3534_s8 + $0x1f0] sm:$0xff]  ;;  %v2606_v59 = vcombine.low %v458_v47, %v466_v48 }
  0xb3   : > { %3085 = vmatpush3.bf16.msra.mxu1 %v3268_v60  ;;  %3046 = vmatprep.subr.bf16.mxu0 %v3269_v61  ;;  %v2608_v60 = vcombine.low %v459_v49, %v467_v50  ;;  %v2623_v61 = vcombine.high %v474_v55, %v482_v56 }
  0xb4   : > { %3086 = vmatprep.subr.bf16.mxu1 %v3270_v62  ;;  %2136 = vmatprep.mubr.bf16.mxu0 %v2603_v3  ;;  %v2625_v62 = vcombine.high %v475_v57, %v483_v58 }
  0xb5   : > { %2201 = vmatprep.mubr.bf16.mxu1 %v2605_v7 }
  0xb6   : > { %3047 = vmatpush3.bf16.msra.mxu0 %v3271_v63  ;;  %v2622_v63 = vcombine.low %v474_v55, %v482_v56 }
  0xb7   : > { %3087 = vmatpush3.bf16.msra.mxu1 %v3272_v0  ;;  %3048 = vmatprep.subr.bf16.mxu0 %v3273_v9  ;;  %v2624_v0 = vcombine.low %v475_v57, %v483_v58 }
  0xb8   : > { %3088 = vmatprep.subr.bf16.mxu1 %v3274_v10 }
  0xb9   : > { %2137 = vmatmul.mubr.bf16.gmra.mxu0 %v2602_v6 }
  0xba   : > { %2202 = vmatmul.mubr.bf16.gmra.mxu1 %v2604_v8  ;;  %3049 = vmatpush3.bf16.msra.mxu0 %v3275_v11 }
  0xbb   : > { %3089 = vmatpush3.bf16.msra.mxu1 %v3276_v12  ;;  %3050 = vmatprep.subr.bf16.mxu0 %v3277_v13 }
  0xbc   : > { %3090 = vmatprep.subr.bf16.mxu1 %v3278_v14  ;;  %2144 = vmatprep.mubr.bf16.mxu0 %v2619_v21 }
  0xbd   : > { %2209 = vmatprep.mubr.bf16.mxu1 %v2621_v22 }
  0xbe   : > { %3051 = vmatpush3.bf16.msra.mxu0 %v3279_v15 }
  0xbf   : > { %3091 = vmatpush3.bf16.msra.mxu1 %v3280_v16  ;;  %3052 = vmatprep.subr.bf16.mxu0 %v3281_v25 }
  0xc0   : > { %3092 = vmatprep.subr.bf16.mxu1 %v3282_v26 }
  0xc1   : > { %2145 = vmatmul.mubr.bf16.gmra.mxu0 %v2618_v23 }
  0xc2   : > { %2210 = vmatmul.mubr.bf16.gmra.mxu1 %v2620_v24  ;;  %3053 = vmatpush3.bf16.msra.mxu0 %v3283_v27 }
  0xc3   : > { %3093 = vmatpush3.bf16.msra.mxu1 %v3284_v28  ;;  %3054 = vmatprep.subr.bf16.mxu0 %v3285_v29 }
  0xc4   : > { %3094 = vmatprep.subr.bf16.mxu1 %v3286_v30  ;;  %2250 = vmatprep.mubr.bf16.mxu0 %v2575_v37 }
  0xc5   : > { %2315 = vmatprep.mubr.bf16.mxu1 %v2577_v42 }
  0xc6   : > { %3055 = vmatpush3.bf16.msra.mxu0 %v3287_v31 }
  0xc7   : > { %3095 = vmatpush3.bf16.msra.mxu1 %v3288_v32 }
  0xc9   : > { %2251 = vmatmul.mubr.bf16.vlgmr.msra.gmra.mxu0 %v2574_v36 }
  0xca   : > { %2316 = vmatmul.mubr.bf16.vlgmr.msra.gmra.mxu1 %v2576_v41  ;;  %2258 = vmatprep.mubr.bf16.mxu0 %v2591_v43 }
  0xcb   : > { %2323 = vmatprep.mubr.bf16.mxu1 %v2593_v46 }
  0xd1   : > { %2259 = vmatmul.mubr.bf16.gmra.mxu0 %v2590_v51 }
  0xd2   : > { %2324 = vmatmul.mubr.bf16.gmra.mxu1 %v2592_v52  ;;  %2266 = vmatprep.mubr.bf16.mxu0 %v2607_v53 }
  0xd3   : > { %2331 = vmatprep.mubr.bf16.mxu1 %v2609_v54 }
  0xd9   : > { %2267 = vmatmul.mubr.bf16.gmra.mxu0 %v2606_v59 }
  0xda   : > { %2332 = vmatmul.mubr.bf16.gmra.mxu1 %v2608_v60  ;;  %2274 = vmatprep.mubr.bf16.mxu0 %v2623_v61 }
  0xdb   : > { %2339 = vmatprep.mubr.bf16.mxu1 %v2625_v62 }
  0xe1   : > { %2275 = vmatmul.mubr.bf16.gmra.mxu0 %v2622_v63 }
  0xe2   : > { %2340 = vmatmul.mubr.bf16.gmra.mxu1 %v2624_v0 }
 0x129   : > { %v2816_v1 = vpop.f32.mrf.mxu0 }
 0x12a   : > { %v2856_v2 = vpop.f32.mrf.mxu1 }
 0x12b   : > { %v2817_v3 = vpop.f32.mrf.mxu0 }
 0x12c   : > { %v2818_v4 = vadd.f32 %v2817_v3, %v2816_v1  ;;  %v2857_v5 = vpop.f32.mrf.mxu1 }
 0x12d   : > { %v2858_v6 = vadd.f32 %v2857_v5, %v2856_v2  ;;  %v2819_v7 = vpop.f32.mrf.mxu0 }
 0x12e   : > { %v2859_v8 = vpop.f32.mrf.mxu1 }
 0x12f   : > { %v3729_v9 = vadd.f32 %v2858_v6, %v2818_v4  ;;  %v2820_v10 = vpop.f32.mrf.mxu0 }
 0x130   : > { %v2821_v11 = vadd.f32 %v2820_v10, %v2819_v7  ;;  %v2860_v12 = vpop.f32.mrf.mxu1 }
 0x131   : > { %v2861_v13 = vadd.f32 %v2860_v12, %v2859_v8  ;;  %v2822_v14 = vpop.f32.mrf.mxu0 }
 0x132   : > { %v2862_v16 = vpop.f32.mrf.mxu1 }
 0x133   : > { %v3731_v15 = vadd.f32 %v2861_v13, %v2821_v11  ;;  %v2823_v17 = vpop.f32.mrf.mxu0 }
 0x134   : > { %v2824_v18 = vadd.f32 %v2823_v17, %v2822_v14  ;;  %v2863_v19 = vpop.f32.mrf.mxu1 }
 0x135   : > { %v2864_v20 = vadd.f32 %v2863_v19, %v2862_v16  ;;  %v2825_v21 = vpop.f32.mrf.mxu0 }
 0x136   : > { %v2865_v22 = vpop.f32.mrf.mxu1 }
 0x137   : > { %v3733_v23 = vadd.f32 %v2864_v20, %v2824_v18  ;;  %v2826_v24 = vpop.f32.mrf.mxu0 }
 0x138   : > { %v2827_v25 = vadd.f32 %v2826_v24, %v2825_v21  ;;  %v2866_v26 = vpop.f32.mrf.mxu1 }
 0x139   : > { %v2867_v27 = vadd.f32 %v2866_v26, %v2865_v22  ;;  %v2828_v29 = vpop.f32.mrf.mxu0 }
 0x13a   : > { %v2868_v30 = vpop.f32.mrf.mxu1 }
 0x13b   : > { %v3735_v28 = vadd.f32 %v2867_v27, %v2827_v25  ;;  %v2829_v31 = vpop.f32.mrf.mxu0 }
 0x13c   : > { %v2869_v32 = vpop.f32.mrf.mxu1  ;;  %v2830_v33 = vadd.f32 %v2829_v31, %v2828_v29 }
 0x13d   : > { %v2870_v34 = vadd.f32 %v2869_v32, %v2868_v30  ;;  %v2831_v35 = vpop.f32.mrf.mxu0 }
 0x13e   : > { %v2871_v36 = vpop.f32.mrf.mxu1 }
 0x13f   : > { %v3737_v37 = vadd.f32 %v2870_v34, %v2830_v33  ;;  %v2832_v38 = vpop.f32.mrf.mxu0 }
 0x140   : > { %v2872_v39 = vpop.f32.mrf.mxu1  ;;  %v2833_v40 = vadd.f32 %v2832_v38, %v2831_v35 }
 0x141   : > { %v2873_v41 = vadd.f32 %v2872_v39, %v2871_v36  ;;  %v2834_v43 = vpop.f32.mrf.mxu0 }
 0x142   : > { %v2874_v44 = vpop.f32.mrf.mxu1 }
 0x143   : > { %v3739_v42 = vadd.f32 %v2873_v41, %v2833_v40  ;;  %v2835_v45 = vpop.f32.mrf.mxu0 }
 0x144   : > { %v2836_v46 = vadd.f32 %v2835_v45, %v2834_v43  ;;  %v2875_v47 = vpop.f32.mrf.mxu1 }
 0x145   : > { %v2876_v48 = vadd.f32 %v2875_v47, %v2874_v44  ;;  %v2837_v49 = vpop.f32.mrf.mxu0 }
 0x146   : > { %v2877_v50 = vpop.f32.mrf.mxu1 }
 0x147   : > { %v3741_v51 = vadd.f32 %v2876_v48, %v2836_v46  ;;  %v2838_v52 = vpop.f32.mrf.mxu0 }
 0x148   : > { %v2839_v53 = vadd.f32 %v2838_v52, %v2837_v49  ;;  %v2878_v54 = vpop.f32.mrf.mxu1 }
 0x149   : > { %3920 = vst [vmem:[#allocation4_spill] sm:$0xff] %v3741_v51  ;;  %v2879_v55 = vadd.f32 %v2878_v54, %v2877_v50  ;;  %v2896_v56 = vpop.f32.mrf.mxu0 }
 0x14a   : > { %v2936_v58 = vpop.f32.mrf.mxu1 }
 0x14b   : > { %v3743_v57 = vadd.f32 %v2879_v55, %v2839_v53  ;;  %v2897_v59 = vpop.f32.mrf.mxu0 }
 0x14c   : > { %v2937_v60 = vpop.f32.mrf.mxu1 }
 0x14d   : > { %3921 = vst [vmem:[#allocation5_spill] sm:$0xff] %v3743_v57  ;;  %v2899_v61 = vpop.f32.mrf.mxu0 }
 0x14e   : > { %v3745_v62 = vpop.f32.mrf.mxu1 }
 0x14f   : > { %v2900_v63 = vpop.f32.mrf.mxu0 }
 0x150   : > { %v3747_v0 = vpop.f32.mrf.mxu1 }
 0x151   : > { %v2902_v1 = vpop.f32.mrf.mxu0 }
 0x152   : > { %v3749_v2 = vpop.f32.mrf.mxu1 }
 0x153   : > { %v2903_v3 = vpop.f32.mrf.mxu0 }
 0x154   : > { %v3751_v4 = vpop.f32.mrf.mxu1 }
 0x155   : > { %v3753_v5 = vpop.f32.mrf.mxu0 }
 0x156   : > { %v3755_v6 = vpop.f32.mrf.mxu1 }
 0x157   : > { %v3757_v7 = vpop.f32.mrf.mxu0 }
 0x158   : > { %v3759_v8 = vpop.f32.mrf.mxu1 }
 0x159   : > { %v3761_v10 = vpop.f32.mrf.mxu0 }
 0x15a   : > { %v3763_v11 = vpop.f32.mrf.mxu1 }
 0x15b   : > { %v3765_v12 = vpop.f32.mrf.mxu0 }
 0x15c   : > { %v3767_v13 = vpop.f32.mrf.mxu1 }
 0x15d   : > { %v3769_v14 = vpop.f32.mrf.mxu0 }
 0x15e   : > { %v3771_v16 = vpop.f32.mrf.mxu1 }
 0x15f   : > { %v3773_v17 = vpop.f32.mrf.mxu0 }
 0x160   : > { %v3775_v18 = vpop.f32.mrf.mxu1 }
 0x161   : > { %v3777_v19 = vpop.f32.mrf.mxu0 }
 0x162   : > { %v3779_v20 = vpop.f32.mrf.mxu1 }
 0x163   : > { %3922 = vst [vmem:[#allocation6_spill] sm:$0xff] %v3779_v20  ;;  %v3781_v21 = vpop.f32.mrf.mxu0  ;;  %v2901_v20 = vadd.f32 %v2900_v63, %v2899_v61 }
 0x164   : > { %v3783_v22 = vpop.f32.mrf.mxu1 }
 0x165   : > { %3923 = vst [vmem:[#allocation7_spill] sm:$0xff] %v3783_v22  ;;  %v3785_v24 = vpop.f32.mrf.mxu0 }
 0x166   : > { %3924 = vst [vmem:[#allocation8_spill] sm:$0xff] %v3785_v24  ;;  %v3787_v25 = vpop.f32.mrf.mxu1 }
 0x167   : > { %3925 = vst [vmem:[#allocation9_spill] sm:$0xff] %v3787_v25  ;;  %v3789_v26 = vpop.f32.mrf.mxu0 }
 0x168   : > { %3926 = vst [vmem:[#allocation10_spill] sm:$0xff] %v3789_v26  ;;  %v3791_v27 = vpop.f32.mrf.mxu1 }
 0x169   : > { %3927 = vst [vmem:[#allocation11_spill] sm:$0xff] %v3791_v27  ;;  %v2976_v29 = vpop.f32.mrf.mxu0  ;;  %v2898_v27 = vadd.f32 %v2897_v59, %v2896_v56  ;;  %v1996_v56 = vadd.f32 %v2901_v20, %v3731_v15  ;;  %v2944_v15 = vadd.f32 %v3751_v4, %v3749_v2  ;;  %v2947_v2 = vadd.f32 %v3759_v8, %v3755_v6 }
 0x16a   : > { %v3016_v30 = vpop.f32.mrf.mxu1 }
 0x16b   : > { %v2977_v31 = vpop.f32.mrf.mxu0  ;;  %v1993_v22 = vadd.f32 %v2898_v27, %v3729_v9  ;;  %v2941_v9 = vadd.f32 %v3747_v0, %v3745_v62 }
 0x16c   : > { %v3017_v32 = vpop.f32.mrf.mxu1  ;;  %v2978_v24 = vadd.f32 %v2977_v31, %v2976_v29  ;;  %v2907_v29 = vadd.f32 %v3757_v7, %v3753_v5 }
 0x16d   : > { %v2979_v33 = vpop.f32.mrf.mxu0  ;;  %v2061_v27 = vadd.f32 %v2941_v9, %v1996_v56 }
 0x16e   : > { %v3019_v34 = vpop.f32.mrf.mxu1 }
 0x16f   : > { %v2980_v35 = vpop.f32.mrf.mxu0 }
 0x170   : > { %v3020_v36 = vpop.f32.mrf.mxu1  ;;  %v2981_v63 = vadd.f32 %v2980_v35, %v2979_v33  ;;  %v2004_v33 = vadd.f32 %v2907_v29, %v3735_v28  ;;  %v2913_v28 = vadd.f32 %v3773_v17, %v3769_v14  ;;  %v2916_v29 = vadd.f32 %v3781_v21, %v3777_v19 }
 0x171   : > { %v2982_v38 = vpop.f32.mrf.mxu0  ;;  %v3021_v35 = vadd.f32 %v3020_v36, %v3019_v34 }
 0x172   : > { %v3793_v39 = vpop.f32.mrf.mxu1  ;;  %v2069_v34 = vadd.f32 %v2947_v2, %v2004_v33  ;;  %v3938_v33 = vld [vmem:[#allocation10_spill] sm:$0xff] }
 0x173   : > { %v2983_v40 = vpop.f32.mrf.mxu0 }
 0x174   : > { %v3795_v41 = vpop.f32.mrf.mxu1  ;;  %v2984_v20 = vadd.f32 %v2983_v40, %v2982_v38 }
 0x175   : > { %v2985_v43 = vpop.f32.mrf.mxu0 }
 0x176   : > { %v3797_v44 = vpop.f32.mrf.mxu1 }
 0x177   : > { %v2986_v45 = vpop.f32.mrf.mxu0 }
 0x178   : > { %v3799_v46 = vpop.f32.mrf.mxu1 }
 0x179   : > { %v3801_v47 = vpop.f32.mrf.mxu0 }
 0x17a   : > { %v3803_v48 = vpop.f32.mrf.mxu1 }
 0x17b   : > { %3928 = vst [vmem:[#allocation12_spill] sm:$0xff] %v3803_v48  ;;  %v3805_v49 = vpop.f32.mrf.mxu0 }
 0x17c   : > { %v3807_v50 = vpop.f32.mrf.mxu1 }
 0x17d   : > { %3929 = vst [vmem:[#allocation13_spill] sm:$0xff] %v3807_v50  ;;  %v3809_v52 = vpop.f32.mrf.mxu0  ;;  %v2938_v50 = vadd.f32 %v2937_v60, %v2936_v58 }
 0x17e   : > { %v3811_v53 = vpop.f32.mrf.mxu1 }
 0x17f   : > { %3930 = vst [vmem:[#allocation14_spill] sm:$0xff] %v3811_v53  ;;  %v3813_v54 = vpop.f32.mrf.mxu0 }
 0x180   : > { %3931 = vst [vmem:[#allocation15_spill] sm:$0xff] %v3813_v54  ;;  %v3815_v55 = vpop.f32.mrf.mxu1  ;;  %v2904_v54 = vadd.f32 %v2903_v3, %v2902_v1  ;;  %v3018_v1 = vadd.f32 %v3017_v32, %v3016_v30  ;;  %v412_v32 = vld [vmem:[#allocation2 + $0x30] sm:$0xff] }
 0x181   : > { %3932 = vst [vmem:[#allocation16_spill] sm:$0xff] %v3815_v55  ;;  %v3817_v25 = vpop.f32.mrf.mxu0  ;;  %v2058_v55 = vadd.f32 %v2938_v50, %v1993_v22  ;;  %v2126_v50 = vadd.f32 %v2981_v63, %v2061_v27  ;;  %v413_v63 = vld [vmem:[#allocation2] sm:$0xff]  ;;  %v2012_v27 = vadd.f32 %v2913_v28, %v3739_v42 }
 0x182   : > { %v3819_v57 = vpop.f32.mrf.mxu1  ;;  %v2001_v58 = vadd.f32 %v2904_v54, %v3733_v23  ;;  %v2910_v23 = vadd.f32 %v3765_v12, %v3761_v10  ;;  %v2987_v54 = vadd.f32 %v2986_v45, %v2985_v43  ;;  %v2950_v43 = vadd.f32 %v3767_v13, %v3763_v11 }
 0x183   : > { %3933 = vst [vmem:[#allocation17_spill] sm:$0xff] %v3819_v57  ;;  %v3822_v48 = vpop.f32.mrf.mxu0  ;;  %v2123_v61 = vadd.f32 %v2978_v24, %v2058_v55  ;;  %v2191_v40 = vadd.f32 %v3021_v35, %v2126_v50  ;;  %v3027_v11 = vadd.f32 %v3799_v46, %v3797_v44  ;;  %v3936_v44 = vld [vmem:[#allocation4_spill] sm:$0xff] }
 0x184   : > { %v3824_v26 = vpop.f32.mrf.mxu1  ;;  %v2066_v0 = vadd.f32 %v2944_v15, %v2001_v58  ;;  %v2009_v10 = vadd.f32 %v2910_v23, %v3737_v37  ;;  %v2990_v37 = vadd.f32 %v3805_v49, %v3801_v47  ;;  %v2953_v47 = vadd.f32 %v3775_v18, %v3771_v16  ;;  %v3940_v16 = vld [vmem:[#allocation13_spill] sm:$0xff] }
 0x185   : > { %v3826_v51 = vpop.f32.mrf.mxu0  ;;  %v2188_v31 = vadd.f32 %v3018_v1, %v2123_v61  ;;  %v2017_v46 = vadd.f32 %v2916_v29, %v3936_v44 }
 0x186   : > { %v3828_v53 = vpop.f32.mrf.mxu1  ;;  %v2131_v4 = vadd.f32 %v2984_v20, %v2066_v0  ;;  %v2077_v23 = vadd.f32 %v2953_v47, %v2012_v27 }
 0x187   : > { %v3831_v59 = vpop.f32.mrf.mxu0  ;;  %v3935_v49 = vld [vmem:[#allocation15_spill] sm:$0xff] }
 0x188   : > { %v3833_v57 = vpop.f32.mrf.mxu1  ;;  %v2999_v29 = vadd.f32 %v3831_v59, %v3826_v51 }
 0x189   : > { %3934 = vst [vmem:[#allocation18_spill] sm:$0xff] %v3833_v57  ;;  %v3056_v60 = vpop.f32.mrf.mxu0 }
 0x18a   : > { %v3096_v3 = vpop.f32.mrf.mxu1 }
 0x18b   : > { %v3057_v22 = vpop.f32.mrf.mxu0 }
 0x18c   : > { %v3058_v57 = vadd.f32 %v3057_v22, %v3056_v60  ;;  %v3097_v62 = vpop.f32.mrf.mxu1  ;;  %v2134_v60 = vadd.f32 %v2987_v54, %v2069_v34  ;;  %v2993_v22 = vadd.f32 %v3935_v49, %v3809_v52  ;;  %v3943_v34 = vld [vmem:[#allocation5_spill] sm:$0xff] }
 0x18d   : > { %v3059_v24 = vpop.f32.mrf.mxu0  ;;  %v3098_v7 = vadd.f32 %v3097_v62, %v3096_v3 }
 0x18e   : > { %v2253_v5 = vadd.f32 %v3058_v57, %v2188_v31  ;;  %v3099_v30 = vpop.f32.mrf.mxu1  ;;  %v3024_v57 = vadd.f32 %v3795_v41, %v3793_v39  ;;  %v2074_v41 = vadd.f32 %v2950_v43, %v2009_v10  ;;  %v414_v31 = vld [vmem:[#allocation2 + $0x18] sm:$0xff]  ;;  %v2199_v42 = vadd.f32 %v3027_v11, %v2134_v60 }
 0x18f   : > { %v3060_v38 = vpop.f32.mrf.mxu0  ;;  %v2142_v54 = vadd.f32 %v2993_v22, %v2077_v23  ;;  %v2996_v10 = vadd.f32 %v3822_v48, %v3817_v25  ;;  %v416_v25 = vld [vmem:[#allocation2 + $0x8] sm:$0xff] }
 0x190   : > { %v2318_v55 = vadd.f32 %v3098_v7, %v2253_v5  ;;  %v3061_v56 = vadd.f32 %v3060_v38, %v3059_v24  ;;  %v3100_v9 = vpop.f32.mrf.mxu1  ;;  %v2196_v45 = vadd.f32 %v3024_v57, %v2131_v4  ;;  %v2139_v62 = vadd.f32 %v2990_v37, %v2074_v41  ;;  %v3937_v24 = vld [vmem:[#allocation8_spill] sm:$0xff]  ;;  %v3942_v38 = vld [vmem:[#allocation7_spill] sm:$0xff]  ;;  %v3949_v44 = vld [vmem:[#allocation18_spill] sm:$0xff] }
 0x191   : > { %v3062_v12 = vpop.f32.mrf.mxu0  ;;  %v3101_v8 = vadd.f32 %v3100_v9, %v3099_v30  ;;  %v2919_v35 = vadd.f32 %v3938_v33, %v3937_v24  ;;  %v3939_v7 = vld [vmem:[#allocation12_spill] sm:$0xff] }
 0x192   : > { %v2348_v36 = vadd.f32 %v2318_v55, %v412_v32  ;;  %v2256_v6 = vadd.f32 %v3061_v56, %v2191_v40  ;;  %v3102_v61 = vpop.f32.mrf.mxu1  ;;  %v3030_v18 = vadd.f32 %v3940_v16, %v3939_v7  ;;  %v3941_v32 = vld [vmem:[#allocation6_spill] sm:$0xff] }
 0x193   : > { %v3063_v58 = vpop.f32.mrf.mxu0  ;;  %v2956_v40 = vadd.f32 %v3942_v38, %v3941_v32  ;;  %v415_v55 = vld [vmem:[#allocation2 + $0x10] sm:$0xff]  ;;  %v419_v38 = vld [vmem:[#allocation2 + $0x38] sm:$0xff] }
 0x194   : > { %2356 = vst [vmem:[#allocation2 + $0x30] sm:$0xff] %v2348_v36  ;;  %v2321_v14 = vadd.f32 %v3101_v8, %v2256_v6  ;;  %v3064_v17 = vadd.f32 %v3063_v58, %v3062_v12  ;;  %v3103_v39 = vpop.f32.mrf.mxu1  ;;  %v2204_v9 = vadd.f32 %v3030_v18, %v2139_v62  ;;  %v2020_v36 = vadd.f32 %v2919_v35, %v3943_v34  ;;  %v3944_v6 = vld [vmem:[#allocation14_spill] sm:$0xff]  ;;  %v3945_v8 = vld [vmem:[#allocation16_spill] sm:$0xff] }
 0x195   : > { %v3065_v1 = vpop.f32.mrf.mxu0  ;;  %v3104_v15 = vadd.f32 %v3103_v39, %v3102_v61  ;;  %v3033_v61 = vadd.f32 %v3945_v8, %v3944_v6 }
 0x196   : > { %v2349_v13 = vadd.f32 %v2321_v14, %v413_v63  ;;  %v2261_v3 = vadd.f32 %v3064_v17, %v2196_v45  ;;  %v3105_v20 = vpop.f32.mrf.mxu1  ;;  %v2082_v45 = vadd.f32 %v2956_v40, %v2017_v46  ;;  %v3946_v14 = vld [vmem:[#allocation9_spill] sm:$0xff]  ;;  %v3947_v17 = vld [vmem:[#allocation11_spill] sm:$0xff]  ;;  %v3039_v46 = vadd.f32 %v3949_v44, %v3828_v53 }
 0x197   : > { %v3066_v50 = vpop.f32.mrf.mxu0  ;;  %v2959_v39 = vadd.f32 %v3947_v17, %v3946_v14  ;;  %v2207_v41 = vadd.f32 %v3033_v61, %v2142_v54 }
 0x198   : > { %2357 = vst [vmem:[#allocation2] sm:$0xff] %v2349_v13  ;;  %v2326_v19 = vadd.f32 %v3104_v15, %v2261_v3  ;;  %v3067_v21 = vadd.f32 %v3066_v50, %v3065_v1  ;;  %v3106_v0 = vpop.f32.mrf.mxu1  ;;  %v2147_v27 = vadd.f32 %v2996_v10, %v2082_v45 }
 0x199   : > { %v3068_v5 = vpop.f32.mrf.mxu0  ;;  %v3107_v2 = vadd.f32 %v3106_v0, %v3105_v20  ;;  %v2085_v3 = vadd.f32 %v2959_v39, %v2020_v36  ;;  %v3948_v20 = vld [vmem:[#allocation17_spill] sm:$0xff] }
 0x19a   : > { %v2350_v30 = vadd.f32 %v2326_v19, %v414_v31  ;;  %v2264_v52 = vadd.f32 %v3067_v21, %v2199_v42  ;;  %v3108_v4 = vpop.f32.mrf.mxu1  ;;  %v3036_v47 = vadd.f32 %v3824_v26, %v3948_v20  ;;  %v417_v42 = vld [vmem:[#allocation2 + $0x20] sm:$0xff] }
 0x19b   : > { %v3069_v56 = vpop.f32.mrf.mxu0  ;;  %v2150_v21 = vadd.f32 %v2999_v29, %v2085_v3 }
 0x19c   : > { %2358 = vst [vmem:[#allocation2 + $0x18] sm:$0xff] %v2350_v30  ;;  %v2329_v28 = vadd.f32 %v3107_v2, %v2264_v52  ;;  %v3070_v57 = vadd.f32 %v3069_v56, %v3068_v5  ;;  %v3109_v12 = vpop.f32.mrf.mxu1  ;;  %v2212_v19 = vadd.f32 %v3036_v47, %v2147_v27  ;;  %v418_v5 = vld [vmem:[#allocation2 + $0x28] sm:$0xff] }
 0x19d   : > { %v3071_v43 = vpop.f32.mrf.mxu0  ;;  %v3110_v60 = vadd.f32 %v3109_v12, %v3108_v4  ;;  %v2215_v16 = vadd.f32 %v3039_v46, %v2150_v21 }
 0x19e   : > { %v2351_v63 = vadd.f32 %v2329_v28, %v415_v55  ;;  %v2269_v58 = vadd.f32 %v3070_v57, %v2204_v9  ;;  %v3111_v37 = vpop.f32.mrf.mxu1 }
 0x19f   : > { %v3072_v48 = vpop.f32.mrf.mxu0 }
 0x1a0   : > { %2359 = vst [vmem:[#allocation2 + $0x10] sm:$0xff] %v2351_v63  ;;  %v2334_v1 = vadd.f32 %v3110_v60, %v2269_v58  ;;  %v3073_v11 = vadd.f32 %v3072_v48, %v3071_v43  ;;  %v3112_v13 = vpop.f32.mrf.mxu1 }
 0x1a1   : > { %v3074_v15 = vpop.f32.mrf.mxu0  ;;  %v3113_v31 = vadd.f32 %v3112_v13, %v3111_v37 }
 0x1a2   : > { %v2352_v49 = vadd.f32 %v2334_v1, %v416_v25  ;;  %v2272_v22 = vadd.f32 %v3073_v11, %v2207_v41  ;;  %v3114_v50 = vpop.f32.mrf.mxu1 }
 0x1a3   : > { %v3075_v62 = vpop.f32.mrf.mxu0 }
 0x1a4   : > { %2360 = vst [vmem:[#allocation2 + $0x8] sm:$0xff] %v2352_v49  ;;  %v2337_v0 = vadd.f32 %v3113_v31, %v2272_v22  ;;  %v3076_v51 = vadd.f32 %v3075_v62, %v3074_v15  ;;  %v3115_v59 = vpop.f32.mrf.mxu1 }
 0x1a5   : > { %v3077_v23 = vpop.f32.mrf.mxu0  ;;  %v3116_v35 = vadd.f32 %v3115_v59, %v3114_v50 }
 0x1a6   : > { %v2353_v24 = vadd.f32 %v2337_v0, %v417_v42  ;;  %v2277_v33 = vadd.f32 %v3076_v51, %v2212_v19  ;;  %v3117_v26 = vpop.f32.mrf.mxu1 }
 0x1a7   : > { %v3078_v7 = vpop.f32.mrf.mxu0 }
 0x1a8   : > { %2361 = vst [vmem:[#allocation2 + $0x20] sm:$0xff] %v2353_v24  ;;  %v2342_v18 = vadd.f32 %v3116_v35, %v2277_v33  ;;  %v3079_v30 = vadd.f32 %v3078_v7, %v3077_v23  ;;  %v3118_v52 = vpop.f32.mrf.mxu1 }
 0x1a9   : > { %v3119_v32 = vadd.f32 %v3118_v52, %v3117_v26 }
 0x1aa   : > { %v2354_v2 = vadd.f32 %v2342_v18, %v418_v5  ;;  %v2280_v4 = vadd.f32 %v3079_v30, %v2215_v16 }
 0x1ac   : > { %2362 = vst [vmem:[#allocation2 + $0x28] sm:$0xff] %v2354_v2  ;;  %v2345_v40 = vadd.f32 %v3119_v32, %v2280_v4  ;;  %2367 = sbr.rel (%p2754_p11) target bundleno = 447 (0x1bf), region = 63 }
 0x1ae   : > { %v2355_v54 = vadd.f32 %v2345_v40, %v419_v38 }
 0x1b0   : > { %2363 = vst [vmem:[#allocation2 + $0x38] sm:$0xff] %v2355_v54 }
 0x1b1   : > { %v2368_v53 = vld [vmem:[#allocation2 + $0x30] sm:$0xff]  ;;  %v2369_v55 = vld [vmem:[#allocation2] sm:$0xff]  ;;  %v2370_v28 = vld [vmem:[#allocation2 + $0x18] sm:$0xff] }
 0x1b2   : > { %v2755_v56 = vld [vmem:[%s3918_s2] ss:$0 sm:$0xff]  ;;  %v2371_v57 = vld [vmem:[#allocation2 + $0x10] sm:$0xff]  ;;  %v2372_v12 = vld [vmem:[#allocation2 + $0x8] sm:$0xff] }
 0x1b3   : > { %v2383_v9 = vadd.f32 %v2755_v56, %v2368_v53  ;;  %v2384_v10 = vadd.f32 %v2755_v56, %v2369_v55  ;;  %v2385_v34 = vadd.f32 %v2755_v56, %v2370_v28  ;;  %v2386_v36 = vadd.f32 %v2755_v56, %v2371_v57  ;;  %v2373_v6 = vld [vmem:[#allocation2 + $0x20] sm:$0xff]  ;;  %v2374_v61 = vld [vmem:[#allocation2 + $0x28] sm:$0xff] }
 0x1b4   : > { %v2387_v8 = vadd.f32 %v2755_v56, %v2372_v12  ;;  %v2388_v58 = vadd.f32 %v2755_v56, %v2373_v6  ;;  %v2389_v60 = vadd.f32 %v2755_v56, %v2374_v61 }
 0x1b5   : > { %v2391_v45 = vmax.f32 %v2383_v9, 0.0  ;;  %v2392_v63 = vmax.f32 %v2384_v10, 0.0  ;;  %v2393_v37 = vmax.f32 %v2385_v34, 0.0  ;;  %v2394_v14 = vmax.f32 %v2386_v36, 0.0 }
 0x1b6   : > { %v2395_v17 = vmax.f32 %v2387_v8, 0.0  ;;  %v2396_v25 = vmax.f32 %v2388_v58, 0.0  ;;  %v2397_v48 = vmax.f32 %v2389_v60, 0.0 }
 0x1b7   : > { %v2375_v43 = vld [vmem:[#allocation2 + $0x38] sm:$0xff]  ;;  %v2780_v41 = vpack.c.bf16 %v2392_v63, %v2391_v45  ;;  %v2785_v27 = vpack.c.bf16 %v2394_v14, %v2393_v37 }
 0x1b8   : > { %v2390_v39 = vadd.f32 %v2755_v56, %v2375_v43  ;;  %v2790_v1 = vpack.c.bf16 %v2396_v25, %v2395_v17 }
 0x1b9   : > { %2781 = vst [vmem:[%s3919_s3] sm:$0xff] %v2780_v41   ;;  %2797 = vst [vmem:[%s3919_s3 + $0x8] sm:$0xff] %v2785_v27  }
 0x1ba   : > { %v2398_v29 = vmax.f32 %v2390_v39, 0.0  ;;  %2798 = vst [vmem:[%s3919_s3 + $0x10] sm:$0xff] %v2790_v1  }
 0x1bc   : > { %v2795_v11 = vpack.c.bf16 %v2398_v29, %v2397_v48 }
 0x1be   : > { %2799 = vst [vmem:[%s3919_s3 + $0x18] sm:$0xff] %v2795_v11  }
 0x1bf PF: > { %s13_s16 = sadd.s32 1, %s3327_s16   ;;  %s3950_s12 = smov %s3315_s13 }
 0x1c0   : > { %p10_p12 = scmp.ge.s32.totalorder %s13_s16, 6   ;;  %s3951_s13 = smov %s3385_s20 }
 0x1c1   : > { %s3952_s14 = smov %s3323_s15  ;;  %s3953_s15 = smov %s3955_s17 }
 0x1c2   :  { %12 = sbr.rel (!%p10_p12) target bundleno = 3 (0x3), region = 104 }

</bundles_post_ra>
